<compile_context>
chip_gen: v6e
topology: v6e:2x2x1
jax: 0.10.0
libtpu: 0.0.40
codegen_flags: <defaults>
</compile_context>

<pallas_src>
import jax
import jax.numpy as jnp
from jax.experimental import pallas as pl
from jax.experimental.pallas import tpu as pltpu

_NOUT = 14        # real fc2 output width
_NOUT_PAD = 128   # lane-dense padded output width


def _make_kernel(rows, L, compute_dtype):
    def kernel(x_ref,
               w1_ref, b1_ref, w2_ref, b2_ref, w3_ref, b3_ref,
               fw1_ref, fb1_ref, fw2_ref, fb2_ref,
               o_ref):
        x = x_ref[...]                                          # (rows, 12) f32

        # Hoisted boundary masks.  Rows of one batch element are contiguous in
        # the flattened slab, so the conv padding boundaries are row % L.
        ridx = jax.lax.broadcasted_iota(jnp.int32, (rows, 1), 0)
        pos = ridx % L
        has_prev = pos > 0            # row has a valid l-1 neighbor
        has_next = pos < (L - 1)      # row has a valid l+1 neighbor

        def conv(h, w_ref, b_ref):
            # Shift along the flattened row axis (XLU roll).  The rows that
            # would pick up wrapped / cross-batch data are exactly the masked
            # boundary rows, so zeroing them reproduces Conv1d's zero padding.
            h_prev = jnp.where(has_prev, pltpu.roll(h, shift=1, axis=0), 0.0)
            h_next = jnp.where(has_next, pltpu.roll(h, shift=rows - 1, axis=0), 0.0)
            hcat = jnp.concatenate([h_prev, h, h_next], axis=-1)   # (rows, 3*Cin)
            y = jnp.dot(hcat.astype(compute_dtype), w_ref[...],
                        preferred_element_type=jnp.float32) + b_ref[...]
            return jnp.maximum(y, 0.0)

        h = conv(x, w1_ref, b1_ref)          # (rows, 64)
        h = conv(h, w2_ref, b2_ref)          # (rows, 128)
        h = conv(h, w3_ref, b3_ref)          # (rows, 256)
        h = jnp.maximum(
            jnp.dot(h.astype(compute_dtype), fw1_ref[...],
                    preferred_element_type=jnp.float32) + fb1_ref[...],
            0.0)                             # (rows, 128)
        o = jnp.dot(h.astype(compute_dtype), fw2_ref[...],
                    preferred_element_type=jnp.float32) + fb2_ref[...]  # (rows, 128)
        o_ref[...] = o.astype(o_ref.dtype)

    return kernel


def _pick_tb(B, L, target_rows=256):
    """Largest divisor of B with tb*L <= target_rows (fills MXU M; keeps >=2
    grid steps for v7x dual TensorCores when B is large enough)."""
    tb = max(1, min(B, max(1, target_rows // max(L, 1))))
    while B % tb:
        tb -= 1
    return tb


def one_d_cnn_forward(x, params, *, tb=None, compute_dtype=jnp.float32,
                      target_rows=256):
    """x: (B, L, 12) float32 -> (B, L, 14) float32."""
    B, L, Cin = x.shape
    assert Cin == 12
    (w1, b1), (w2, b2), (w3, b3), (fw1, fb1), (fw2, fb2) = params

    if tb is None:
        tb = _pick_tb(B, L, target_rows)
    assert B % tb == 0, (B, tb)
    rows = tb * L
    assert rows % 8 == 0 or rows == B * L, (rows,)   # sublane-aligned block

    # Lane-dense output: zero-pad fc2 from 14 to 128 output lanes.
    fw2p = jnp.zeros((fw2.shape[0], _NOUT_PAD), fw2.dtype).at[:, :_NOUT].set(fw2)
    fb2p = jnp.zeros((1, _NOUT_PAD), fb2.dtype).at[:, :_NOUT].set(fb2)

    # Pre-cast matmul weights to the compute dtype (halves weight DMA on the
    # bf16 path, removes in-kernel casts).  Biases stay f32 (added post-acc).
    cd = compute_dtype
    weight_args = [w1.astype(cd), b1, w2.astype(cd), b2, w3.astype(cd), b3,
                   fw1.astype(cd), fb1, fw2p.astype(cd), fb2p]

    x2 = x.reshape(B * L, Cin)   # flatten once in the wrapper (free)

    def const_spec(a):
        zeros = (0,) * a.ndim
        return pl.BlockSpec(a.shape, lambda b, _z=zeros: _z)

    in_specs = [pl.BlockSpec((rows, Cin), lambda b: (b, 0))]
    in_specs += [const_spec(a) for a in weight_args]

    out = pl.pallas_call(
        _make_kernel(rows, L, cd),
        out_shape=jax.ShapeDtypeStruct((B * L, _NOUT_PAD), jnp.float32),
        grid_spec=pltpu.PrefetchScalarGridSpec(
            num_scalar_prefetch=0,
            grid=(B // tb,),
            in_specs=in_specs,
            out_specs=pl.BlockSpec((rows, _NOUT_PAD), lambda b: (b, 0)),
        ),
        compiler_params=pltpu.CompilerParams(
            dimension_semantics=("parallel",)),
    )(x2, *weight_args)
    return out.reshape(B, L, _NOUT_PAD)[..., :_NOUT]


def init_params(key):
    """Deterministic synthetic parameters matching the PyTorch module shapes.

    Conv weights are stored tap-folded as (3*Cin, Cout): row k*Cin + c holds
    torch conv.weight[:, c, k], taps ordered (l-1, l, l+1).  Biases are
    (1, Cout).  Linear weights are (in, out)."""
    def conv_w(key, cin, cout):
        scale = 1.0 / jnp.sqrt(cin * 3.0)
        kw, kb = jax.random.split(key)
        w = jax.random.normal(kw, (3 * cin, cout), jnp.float32) * scale
        b = jax.random.normal(kb, (1, cout), jnp.float32) * scale
        return w, b

    def lin_w(key, cin, cout):
        scale = 1.0 / jnp.sqrt(float(cin))
        kw, kb = jax.random.split(key)
        w = jax.random.normal(kw, (cin, cout), jnp.float32) * scale
        b = jax.random.normal(kb, (1, cout), jnp.float32) * scale
        return w, b

    k1, k2, k3, k4, k5 = jax.random.split(key, 5)
    return (conv_w(k1, 12, 64),
            conv_w(k2, 64, 128),
            conv_w(k3, 128, 256),
            lin_w(k4, 256, 128),
            lin_w(k5, 128, 14))


def reference_forward(x, params):
    """Pure-JAX reference with identical semantics (shift + folded-tap matmul)."""
    (w1, b1), (w2, b2), (w3, b3), (fw1, fb1), (fw2, fb2) = params
    hi = jax.lax.Precision.HIGHEST

    def conv(h, w, b):
        zp = jnp.zeros_like(h[:, :1, :])
        h_prev = jnp.concatenate([zp, h[:, :-1, :]], axis=1)
        h_next = jnp.concatenate([h[:, 1:, :], zp], axis=1)
        hcat = jnp.concatenate([h_prev, h, h_next], axis=-1)
        return jax.nn.relu(jnp.einsum('blc,cd->bld', hcat, w, precision=hi) + b[None])

    h = conv(x, w1, b1)
    h = conv(h, w2, b2)
    h = conv(h, w3, b3)
    h = jax.nn.relu(jnp.einsum('blc,cd->bld', h, fw1, precision=hi) + fb1[None])
    return jnp.einsum('blc,cd->bld', h, fw2, precision=hi) + fb2[None]


if __name__ == "__main__":
    key = jax.random.PRNGKey(0)
    kx, kp = jax.random.split(key)

    B, L = 32, 16   # tb=16 -> 256 rows per matmul, grid=(2,) parallel steps
    x = jax.random.normal(kx, (B, L, 12), jnp.float32)   # (batch, seq, channels=12)
    params = init_params(kp)

    # f32 path (matches the PyTorch module's numerics).
    out = jax.block_until_ready(one_d_cnn_forward(x, params))
    ref = reference_forward(x, params)
    assert out.shape == (B, L, _NOUT), out.shape
    assert jnp.allclose(out, ref, atol=2e-3, rtol=2e-3), "mismatch vs reference (f32)"

    # bf16-operand fast path for v6e/v7x MXU (f32 accumulate); sanity only.
    out_bf16 = jax.block_until_ready(
        one_d_cnn_forward(x, params, compute_dtype=jnp.bfloat16))
    assert out_bf16.shape == (B, L, _NOUT)
    assert bool(jnp.all(jnp.isfinite(out_bf16)))

    print("KERNEL_OK")
</pallas_src>

<mosaic_0001>
module attributes {stable_mosaic.version = 11 : i64} {
  func.func @kernel(%arg0: i32, %arg1: memref<256x12xf32, #tpu.memory_space<vmem>>, %arg2: memref<36x64xf32, #tpu.memory_space<vmem>>, %arg3: memref<1x64xf32, #tpu.memory_space<vmem>>, %arg4: memref<192x128xf32, #tpu.memory_space<vmem>>, %arg5: memref<1x128xf32, #tpu.memory_space<vmem>>, %arg6: memref<384x256xf32, #tpu.memory_space<vmem>>, %arg7: memref<1x256xf32, #tpu.memory_space<vmem>>, %arg8: memref<256x128xf32, #tpu.memory_space<vmem>>, %arg9: memref<1x128xf32, #tpu.memory_space<vmem>>, %arg10: memref<128x128xf32, #tpu.memory_space<vmem>>, %arg11: memref<1x128xf32, #tpu.memory_space<vmem>>, %arg12: memref<256x128xf32, #tpu.memory_space<vmem>>) attributes {dimension_semantics = [#tpu.dimension_semantics<parallel>], iteration_bounds = array<i64: 2>, scalar_prefetch = 0 : i64, scratch_operands = 0 : i64, tpu.core_type = #tpu.core_type<tc>, window_params = [{transform_indices = @transform_0, window_bounds = array<i64: 256, 12>}, {pipeline_mode = #tpu.pipeline_mode<synchronous>, transform_indices = @transform_1, window_bounds = array<i64: 36, 64>}, {pipeline_mode = #tpu.pipeline_mode<synchronous>, transform_indices = @transform_2, window_bounds = array<i64: 1, 64>}, {pipeline_mode = #tpu.pipeline_mode<synchronous>, transform_indices = @transform_3, window_bounds = array<i64: 192, 128>}, {pipeline_mode = #tpu.pipeline_mode<synchronous>, transform_indices = @transform_4, window_bounds = array<i64: 1, 128>}, {pipeline_mode = #tpu.pipeline_mode<synchronous>, transform_indices = @transform_5, window_bounds = array<i64: 384, 256>}, {pipeline_mode = #tpu.pipeline_mode<synchronous>, transform_indices = @transform_6, window_bounds = array<i64: 1, 256>}, {pipeline_mode = #tpu.pipeline_mode<synchronous>, transform_indices = @transform_7, window_bounds = array<i64: 256, 128>}, {pipeline_mode = #tpu.pipeline_mode<synchronous>, transform_indices = @transform_8, window_bounds = array<i64: 1, 128>}, {pipeline_mode = #tpu.pipeline_mode<synchronous>, transform_indices = @transform_9, window_bounds = array<i64: 128, 128>}, {pipeline_mode = #tpu.pipeline_mode<synchronous>, transform_indices = @transform_10, window_bounds = array<i64: 1, 128>}, {transform_indices = @transform_11, window_bounds = array<i64: 256, 128>}]} {
    %c0 = arith.constant 0 : index
    %c0_0 = arith.constant 0 : index
    %0 = vector.load %arg1[%c0, %c0_0] : memref<256x12xf32, #tpu.memory_space<vmem>>, vector<256x12xf32>
    %1 = tpu.iota {dimensions = array<i32: 0>} : vector<256x1xi32>
    %c16_i32 = arith.constant 16 : i32
    %c0_i32 = arith.constant 0 : i32
    %2 = arith.cmpi eq, %c16_i32, %c0_i32 : i32
    %c1_i32 = arith.constant 1 : i32
    %3 = arith.select %2, %c1_i32, %c16_i32 : i32
    %4 = vector.broadcast %3 : i32 to vector<256x1xi32>
    %5 = arith.remsi %1, %4 : vector<256x1xi32>
    %c0_i32_1 = arith.constant 0 : i32
    %6 = vector.broadcast %c0_i32_1 : i32 to vector<256x1xi32>
    %7 = arith.cmpi ne, %5, %6 : vector<256x1xi32>
    %c0_i32_2 = arith.constant 0 : i32
    %8 = vector.broadcast %c0_i32_2 : i32 to vector<256x1xi32>
    %9 = arith.cmpi slt, %5, %8 : vector<256x1xi32>
    %c0_i32_3 = arith.constant 0 : i32
    %10 = arith.cmpi slt, %3, %c0_i32_3 : i32
    %11 = vector.broadcast %10 : i1 to vector<256x1xi1>
    %12 = vector.broadcast %11 : vector<256x1xi1> to vector<256x1xi1>
    %13 = arith.xori %9, %12 : vector<256x1xi1>
    %14 = arith.andi %13, %7 : vector<256x1xi1>
    %15 = vector.broadcast %3 : i32 to vector<256x1xi32>
    %16 = arith.addi %5, %15 : vector<256x1xi32>
    %17 = arith.select %14, %16, %5 : vector<256x1xi1>, vector<256x1xi32>
    %c0_i32_4 = arith.constant 0 : i32
    %18 = vector.broadcast %c0_i32_4 : i32 to vector<256x1xi32>
    %19 = arith.cmpi sgt, %17, %18 : vector<256x1xi32>
    %c15_i32 = arith.constant 15 : i32
    %20 = vector.broadcast %c15_i32 : i32 to vector<256x1xi32>
    %21 = arith.cmpi slt, %17, %20 : vector<256x1xi32>
    %c1_i32_5 = arith.constant 1 : i32
    %22 = tpu.dynamic_rotate %0 by %c1_i32_5 dim 0 : vector<256x12xf32>, i32 -> vector<256x12xf32>
    %cst = arith.constant 0.000000e+00 : f32
    %23 = vector.shape_cast %19 : vector<256x1xi1> to vector<256x1xi1>
    %24 = vector.broadcast %23 : vector<256x1xi1> to vector<256x12xi1>
    %25 = vector.broadcast %cst : f32 to vector<256x12xf32>
    %26 = arith.select %24, %22, %25 : vector<256x12xi1>, vector<256x12xf32>
    %c255_i32 = arith.constant 255 : i32
    %27 = tpu.dynamic_rotate %0 by %c255_i32 dim 0 : vector<256x12xf32>, i32 -> vector<256x12xf32>
    %cst_6 = arith.constant 0.000000e+00 : f32
    %28 = vector.shape_cast %21 : vector<256x1xi1> to vector<256x1xi1>
    %29 = vector.broadcast %28 : vector<256x1xi1> to vector<256x12xi1>
    %30 = vector.broadcast %cst_6 : f32 to vector<256x12xf32>
    %31 = arith.select %29, %27, %30 : vector<256x12xi1>, vector<256x12xf32>
    %32 = tpu.concatenate %26, %0, %31 in 1 : vector<256x12xf32>, vector<256x12xf32>, vector<256x12xf32> -> vector<256x36xf32>
    %c0_7 = arith.constant 0 : index
    %c0_8 = arith.constant 0 : index
    %33 = vector.load %arg2[%c0_7, %c0_8] : memref<36x64xf32, #tpu.memory_space<vmem>>, vector<36x64xf32>
    %cst_9 = arith.constant dense<0.000000e+00> : vector<256x64xf32>
    %34 = tpu.matmul %32, %33, %cst_9 {dimension_numbers = #tpu.dot_dimension_numbers<[1], [0], [0], [1], [0, 0, 1, 1], [], []>} : vector<256x36xf32>, vector<36x64xf32>, vector<256x64xf32> -> vector<256x64xf32>
    %c0_10 = arith.constant 0 : index
    %c0_11 = arith.constant 0 : index
    %35 = vector.load %arg3[%c0_10, %c0_11] : memref<1x64xf32, #tpu.memory_space<vmem>>, vector<1x64xf32>
    %36 = vector.broadcast %35 : vector<1x64xf32> to vector<256x64xf32>
    %37 = arith.addf %34, %36 : vector<256x64xf32>
    %cst_12 = arith.constant 0.000000e+00 : f32
    %38 = vector.broadcast %cst_12 : f32 to vector<256x64xf32>
    %39 = arith.maximumf %37, %38 : vector<256x64xf32>
    %c1_i32_13 = arith.constant 1 : i32
    %40 = tpu.dynamic_rotate %39 by %c1_i32_13 dim 0 : vector<256x64xf32>, i32 -> vector<256x64xf32>
    %cst_14 = arith.constant 0.000000e+00 : f32
    %41 = vector.shape_cast %19 : vector<256x1xi1> to vector<256x1xi1>
    %42 = vector.broadcast %41 : vector<256x1xi1> to vector<256x64xi1>
    %43 = vector.broadcast %cst_14 : f32 to vector<256x64xf32>
    %44 = arith.select %42, %40, %43 : vector<256x64xi1>, vector<256x64xf32>
    %c255_i32_15 = arith.constant 255 : i32
    %45 = tpu.dynamic_rotate %39 by %c255_i32_15 dim 0 : vector<256x64xf32>, i32 -> vector<256x64xf32>
    %cst_16 = arith.constant 0.000000e+00 : f32
    %46 = vector.shape_cast %21 : vector<256x1xi1> to vector<256x1xi1>
    %47 = vector.broadcast %46 : vector<256x1xi1> to vector<256x64xi1>
    %48 = vector.broadcast %cst_16 : f32 to vector<256x64xf32>
    %49 = arith.select %47, %45, %48 : vector<256x64xi1>, vector<256x64xf32>
    %50 = tpu.concatenate %44, %39, %49 in 1 : vector<256x64xf32>, vector<256x64xf32>, vector<256x64xf32> -> vector<256x192xf32>
    %c0_17 = arith.constant 0 : index
    %c0_18 = arith.constant 0 : index
    %51 = vector.load %arg4[%c0_17, %c0_18] : memref<192x128xf32, #tpu.memory_space<vmem>>, vector<192x128xf32>
    %cst_19 = arith.constant dense<0.000000e+00> : vector<256x128xf32>
    %52 = tpu.matmul %50, %51, %cst_19 {dimension_numbers = #tpu.dot_dimension_numbers<[1], [0], [0], [1], [0, 0, 1, 1], [], []>} : vector<256x192xf32>, vector<192x128xf32>, vector<256x128xf32> -> vector<256x128xf32>
    %c0_20 = arith.constant 0 : index
    %c0_21 = arith.constant 0 : index
    %53 = vector.load %arg5[%c0_20, %c0_21] : memref<1x128xf32, #tpu.memory_space<vmem>>, vector<1x128xf32>
    %54 = vector.broadcast %53 : vector<1x128xf32> to vector<256x128xf32>
    %55 = arith.addf %52, %54 : vector<256x128xf32>
    %cst_22 = arith.constant 0.000000e+00 : f32
    %56 = vector.broadcast %cst_22 : f32 to vector<256x128xf32>
    %57 = arith.maximumf %55, %56 : vector<256x128xf32>
    %c1_i32_23 = arith.constant 1 : i32
    %58 = tpu.dynamic_rotate %57 by %c1_i32_23 dim 0 : vector<256x128xf32>, i32 -> vector<256x128xf32>
    %cst_24 = arith.constant 0.000000e+00 : f32
    %59 = vector.shape_cast %19 : vector<256x1xi1> to vector<256x1xi1>
    %60 = vector.broadcast %59 : vector<256x1xi1> to vector<256x128xi1>
    %61 = vector.broadcast %cst_24 : f32 to vector<256x128xf32>
    %62 = arith.select %60, %58, %61 : vector<256x128xi1>, vector<256x128xf32>
    %c255_i32_25 = arith.constant 255 : i32
    %63 = tpu.dynamic_rotate %57 by %c255_i32_25 dim 0 : vector<256x128xf32>, i32 -> vector<256x128xf32>
    %cst_26 = arith.constant 0.000000e+00 : f32
    %64 = vector.shape_cast %21 : vector<256x1xi1> to vector<256x1xi1>
    %65 = vector.broadcast %64 : vector<256x1xi1> to vector<256x128xi1>
    %66 = vector.broadcast %cst_26 : f32 to vector<256x128xf32>
    %67 = arith.select %65, %63, %66 : vector<256x128xi1>, vector<256x128xf32>
    %68 = tpu.concatenate %62, %57, %67 in 1 : vector<256x128xf32>, vector<256x128xf32>, vector<256x128xf32> -> vector<256x384xf32>
    %c0_27 = arith.constant 0 : index
    %c0_28 = arith.constant 0 : index
    %69 = vector.load %arg6[%c0_27, %c0_28] : memref<384x256xf32, #tpu.memory_space<vmem>>, vector<384x256xf32>
    %cst_29 = arith.constant dense<0.000000e+00> : vector<256x256xf32>
    %70 = tpu.matmul %68, %69, %cst_29 {dimension_numbers = #tpu.dot_dimension_numbers<[1], [0], [0], [1], [0, 0, 1, 1], [], []>} : vector<256x384xf32>, vector<384x256xf32>, vector<256x256xf32> -> vector<256x256xf32>
    %c0_30 = arith.constant 0 : index
    %c0_31 = arith.constant 0 : index
    %71 = vector.load %arg7[%c0_30, %c0_31] : memref<1x256xf32, #tpu.memory_space<vmem>>, vector<1x256xf32>
    %72 = vector.broadcast %71 : vector<1x256xf32> to vector<256x256xf32>
    %73 = arith.addf %70, %72 : vector<256x256xf32>
    %cst_32 = arith.constant 0.000000e+00 : f32
    %74 = vector.broadcast %cst_32 : f32 to vector<256x256xf32>
    %75 = arith.maximumf %73, %74 : vector<256x256xf32>
    %c0_33 = arith.constant 0 : index
    %c0_34 = arith.constant 0 : index
    %76 = vector.load %arg8[%c0_33, %c0_34] : memref<256x128xf32, #tpu.memory_space<vmem>>, vector<256x128xf32>
    %cst_35 = arith.constant dense<0.000000e+00> : vector<256x128xf32>
    %77 = tpu.matmul %75, %76, %cst_35 {dimension_numbers = #tpu.dot_dimension_numbers<[1], [0], [0], [1], [0, 0, 1, 1], [], []>} : vector<256x256xf32>, vector<256x128xf32>, vector<256x128xf32> -> vector<256x128xf32>
    %c0_36 = arith.constant 0 : index
    %c0_37 = arith.constant 0 : index
    %78 = vector.load %arg9[%c0_36, %c0_37] : memref<1x128xf32, #tpu.memory_space<vmem>>, vector<1x128xf32>
    %79 = vector.broadcast %78 : vector<1x128xf32> to vector<256x128xf32>
    %80 = arith.addf %77, %79 : vector<256x128xf32>
    %cst_38 = arith.constant 0.000000e+00 : f32
    %81 = vector.broadcast %cst_38 : f32 to vector<256x128xf32>
    %82 = arith.maximumf %80, %81 : vector<256x128xf32>
    %c0_39 = arith.constant 0 : index
    %c0_40 = arith.constant 0 : index
    %83 = vector.load %arg10[%c0_39, %c0_40] : memref<128x128xf32, #tpu.memory_space<vmem>>, vector<128x128xf32>
    %cst_41 = arith.constant dense<0.000000e+00> : vector<256x128xf32>
    %84 = tpu.matmul %82, %83, %cst_41 {dimension_numbers = #tpu.dot_dimension_numbers<[1], [0], [0], [1], [0, 0, 1, 1], [], []>} : vector<256x128xf32>, vector<128x128xf32>, vector<256x128xf32> -> vector<256x128xf32>
    %c0_42 = arith.constant 0 : index
    %c0_43 = arith.constant 0 : index
    %85 = vector.load %arg11[%c0_42, %c0_43] : memref<1x128xf32, #tpu.memory_space<vmem>>, vector<1x128xf32>
    %86 = vector.broadcast %85 : vector<1x128xf32> to vector<256x128xf32>
    %87 = arith.addf %84, %86 : vector<256x128xf32>
    %c0_44 = arith.constant 0 : index
    %c0_45 = arith.constant 0 : index
    %88 = vector.load %arg12[%c0_44, %c0_45] : memref<256x128xf32, #tpu.memory_space<vmem>>, vector<256x128xf32>
    tpu.vector_store %arg12[%c0_44, %c0_45], %87 {strides = array<i32>} : memref<256x128xf32, #tpu.memory_space<vmem>>, vector<256x128xf32>,
    return
  }
  func.func @transform_0(%arg0: i32) -> (i32, i32) {
    %c0_i32 = arith.constant 0 : i32
    %c0_i32_0 = arith.constant 0 : i32
    return %arg0, %c0_i32 : i32, i32
  }
  func.func @transform_1(%arg0: i32) -> (i32, i32) {
    %c0_i32 = arith.constant 0 : i32
    %c0_i32_0 = arith.constant 0 : i32
    %c0_i32_1 = arith.constant 0 : i32
    return %c0_i32, %c0_i32_0 : i32, i32
  }
  func.func @transform_2(%arg0: i32) -> (i32, i32) {
    %c0_i32 = arith.constant 0 : i32
    %c0_i32_0 = arith.constant 0 : i32
    %c0_i32_1 = arith.constant 0 : i32
    return %c0_i32, %c0_i32_0 : i32, i32
  }
  func.func @transform_3(%arg0: i32) -> (i32, i32) {
    %c0_i32 = arith.constant 0 : i32
    %c0_i32_0 = arith.constant 0 : i32
    %c0_i32_1 = arith.constant 0 : i32
    return %c0_i32, %c0_i32_0 : i32, i32
  }
  func.func @transform_4(%arg0: i32) -> (i32, i32) {
    %c0_i32 = arith.constant 0 : i32
    %c0_i32_0 = arith.constant 0 : i32
    %c0_i32_1 = arith.constant 0 : i32
    return %c0_i32, %c0_i32_0 : i32, i32
  }
  func.func @transform_5(%arg0: i32) -> (i32, i32) {
    %c0_i32 = arith.constant 0 : i32
    %c0_i32_0 = arith.constant 0 : i32
    %c0_i32_1 = arith.constant 0 : i32
    return %c0_i32, %c0_i32_0 : i32, i32
  }
  func.func @transform_6(%arg0: i32) -> (i32, i32) {
    %c0_i32 = arith.constant 0 : i32
    %c0_i32_0 = arith.constant 0 : i32
    %c0_i32_1 = arith.constant 0 : i32
    return %c0_i32, %c0_i32_0 : i32, i32
  }
  func.func @transform_7(%arg0: i32) -> (i32, i32) {
    %c0_i32 = arith.constant 0 : i32
    %c0_i32_0 = arith.constant 0 : i32
    %c0_i32_1 = arith.constant 0 : i32
    return %c0_i32, %c0_i32_0 : i32, i32
  }
  func.func @transform_8(%arg0: i32) -> (i32, i32) {
    %c0_i32 = arith.constant 0 : i32
    %c0_i32_0 = arith.constant 0 : i32
    %c0_i32_1 = arith.constant 0 : i32
    return %c0_i32, %c0_i32_0 : i32, i32
  }
  func.func @transform_9(%arg0: i32) -> (i32, i32) {
    %c0_i32 = arith.constant 0 : i32
    %c0_i32_0 = arith.constant 0 : i32
    %c0_i32_1 = arith.constant 0 : i32
    return %c0_i32, %c0_i32_0 : i32, i32
  }
  func.func @transform_10(%arg0: i32) -> (i32, i32) {
    %c0_i32 = arith.constant 0 : i32
    %c0_i32_0 = arith.constant 0 : i32
    %c0_i32_1 = arith.constant 0 : i32
    return %c0_i32, %c0_i32_0 : i32, i32
  }
  func.func @transform_11(%arg0: i32) -> (i32, i32) {
    %c0_i32 = arith.constant 0 : i32
    %c0_i32_0 = arith.constant 0 : i32
    return %arg0, %c0_i32 : i32, i32
  }
}

</mosaic_0001>

<bundles_post_ra>
// kernel: tpu_custom_call.1
= control target key start
LH: loop header
LB: loop body
LE: loop exit
PB: predicated region body
PF: predicated region fallthrough
CT: control target
= control target key end

     0   :  { %s7413_s0 = inlined_call_operand.vmem [shape: f32[512,12], index: 0, kind: input, shape index: {}]   ;;  %s7414_s1 = inlined_call_operand.hbm [shape: f32[36,64], index: 1, kind: input, shape index: {}]   ;;  %s7415_s2 = inlined_call_operand.hbm [shape: f32[1,64], index: 2, kind: input, shape index: {}]   ;;  %s7416_s3 = inlined_call_operand.vmem [shape: f32[192,128], index: 3, kind: input, shape index: {}]   ;;  %s7417_s4 = inlined_call_operand.vmem [shape: f32[1,128], index: 4, kind: input, shape index: {}]   ;;  %s7418_s5 = inlined_call_operand.hbm [shape: f32[384,256], index: 5, kind: input, shape index: {}]   ;;  %s7419_s6 = inlined_call_operand.vmem [shape: f32[1,256], index: 6, kind: input, shape index: {}]   ;;  %s7420_s7 = inlined_call_operand.vmem [shape: f32[256,128], index: 7, kind: input, shape index: {}]   ;;  %s7421_s8 = inlined_call_operand.vmem [shape: f32[1,128], index: 8, kind: input, shape index: {}]   ;;  %s7422_s9 = inlined_call_operand.vmem [shape: f32[128,128], index: 9, kind: input, shape index: {}]   ;;  %s7423_s10 = inlined_call_operand.vmem [shape: f32[1,128], index: 10, kind: input, shape index: {}]   ;;  %s7424_s11 = inlined_call_operand.hbm [shape: f32[512,128], index: 11, kind: output, shape index: {}]  }
   0x1   :  { %7521 = sst [smem:[#allocation58_spill]] %s7415_s2 }
   0x2   :  { %16 = vsyncpa [#allocation3], 0 }
   0x3   :  { %17 = vsyncpa [#allocation6], 0 }
   0x4   :  { %18 = vsyncpa [#allocation4], 0 }
   0x5   :  { %20 = vsyncpa [#allocation4 + $0x1], 0  ;;  %s4932_s17 = smov 0   ;;  %s4934_s18 = smov 0  }
   0x6   :  { %s4936_s19 = smov 0   ;;  %s4938_s20 = smov 0  }
   0x7 LB: > { %7522 = sst [smem:[#allocation12_spill]] %s4852_s19  ;;  %s4953_s21 = sadd.s32 4294967295, %s4856_s20   ;;  %s4856_s20 = sphi %s4938_s20, %s7910_s20   ;;  %s4852_s19 = sphi %s4936_s19, %s7907_s19   ;;  %s4848_s18 = sphi %s4934_s18, %s7909_s18   ;;  %s4844_s17 = sphi %s4932_s17, %s7908_s17  }
   0x8   : > { %s4255_s22 = sadd.s32 4294967294, %s4856_s20   ;;  %s4957_s23 = sadd.s32 1, %s4856_s20  }
   0x9   : > { %s269_s24 = sadd.s32 1, %s4852_s19  ;;  %s266_s25 = ssub.s32 %s4856_s20, %s4957_s23 }
   0xa   : > { %p279_p0 = scmp.ne.s32.totalorder %s4852_s19, %s4848_s18  ;;  %p267_p1 = scmp.eq.s32.totalorder %s266_s25, 0 }
   0xb   : > { %p280_p2 = scmp.eq.s32.totalorder %s4953_s21, 1  ;;  %p285_p3 = scmp.ne.s32.totalorder %s4848_s18, %s4844_s17 }
   0xc   : > { %p286_p4 = scmp.eq.s32.totalorder %s4255_s22, 1  ;;  %p4256_p7 = scmp.ge.s32.totalorder %s4856_s20, 1 }
   0xd   : > { %s4968_s26 = scalar_select %p267_p1, %s4852_s19, %s269_s24  }
   0xe   : > { %p4970_p5 = por %p280_p2, %p279_p0  ;;  %p4974_p6 = por %p286_p4, %p285_p3 }
   0xf   : > { %7523 = sst [smem:[#allocation13_spill]] %s4968_s26  ;;  %p293_p8 = scmp.lt.s32.totalorder %s4856_s20, 3 }
  0x10   : > { %p4658_p9 = scmp.eq.s32.totalorder %s4953_s21, 0  ;;  %s4858_s30 = smov [#allocation5]  }
  0x11   : > { %p4981_p10 = pnand %p4256_p7, %p293_p8  ;;  %s319_s12 = sshll.u32 %s4858_s30, 4  ;;  %s320_s12 = int_to_ptr.vmem [resolvable:$true] %s319_s12 }
  0x12   : > { %s4859_s13 = smov [#allocation2]   ;;  %s4860_s16 = smov [#allocation7]  }
  0x13   : > { %p4644_p11 = pneg %p4981_p10  ;;  %s305_s14 = sshll.u32 %s4859_s13, 4  ;;  %s4993_s14 = int_to_ptr.vmem [resolvable:$true] %s305_s14 }
  0x14   : > { %s335_s22 = sshll.u32 %s4860_s16, 4  ;;  %s4721_s24 = scalar_lea.vmem %s320_s12, 16  ;;  %s336_s22 = int_to_ptr.vmem [resolvable:$true] %s335_s22 }
  0x15   : > { %p4989_p12 = pnand %p4658_p9, %p4644_p11  ;;  %p4722_p0 = scmp.ne.s32.totalorder %s320_s12, %s4721_s24 }
  0x16   : > { %s4728_s25 = scalar_lea.vmem %s320_s12, 32  ;;  %p4729_p3 = scmp.lt.s32.totalorder %s320_s12, %s320_s12 }
  0x17   : > { %p4712_p13 = pneg %p4989_p12  ;;  %p4730_p4 = scmp.lt.s32.totalorder %s4728_s25, %s4721_s24 }
  0x19   : > { %p4724_p1 = pnand %p4722_p0, %p4712_p13  ;;  %p4731_p7 = por %p4730_p4, %p4729_p3 }
  0x1b   : > { %p4725_p2 = pneg %p4724_p1 }
  0x1d   : > { %p4732_p8 = pnand %p4731_p7, %p4725_p2 }
  0x1f   : > { %4735 = shalt.err (!%p4732_p8)
}
  0x20   : > { %s7528_s2 = sld [smem:[#allocation58_spill]]  ;;  %s4747_s16 = scalar_lea.vmem %s4993_s14, 640 }
  0x21   : > { %p4748_p11 = scmp.ne.s32.totalorder %s4993_s14, %s4747_s16  ;;  %p4755_p3 = scmp.lt.s32.totalorder %s4993_s14, %s4993_s14 }
  0x22   : > { %p4756_p2 = scmp.lt.s32.totalorder %s4747_s16, %s4747_s16 }
  0x23   : > { %p4750_p0 = pnand %p4748_p11, %p4712_p13 }
  0x24   : > { %p4757_p4 = por %p4756_p2, %p4755_p3 }
  0x25   : > { %p4751_p1 = pneg %p4750_p0 }
  0x26   : > { %4650 = dma.hbm_to_vmem [thread:$0]  (!%p4989_p12), %s7528_s2, 16, %s320_s12, [#allocation6]  }
  0x27   : > { %p4758_p7 = pnand %p4757_p4, %p4751_p1 }
  0x29   : > { %4761 = shalt.err (!%p4758_p7)
}
  0x2a   : > { %s4861_s24 = smov 128   ;;  %s4862_s25 = smov 8  }
  0x2b   : > { %4647 = dma.hbm_to_vmem [thread:$0]  (!%p4989_p12), %s7414_s1, 640, %s4993_s14, [#allocation3], %s4861_s24, %s4861_s24, %s4862_s25  }
  0x2c   : > { %s4773_s13 = scalar_lea.vmem %s336_s22, 12288  ;;  %p4781_p3 = scmp.lt.s32.totalorder %s336_s22, %s336_s22 }
  0x2d   : > { %p4774_p8 = scmp.ne.s32.totalorder %s336_s22, %s4773_s13  ;;  %p4782_p1 = scmp.lt.s32.totalorder %s4773_s13, %s4773_s13 }
  0x2f   : > { %p4776_p11 = pnand %p4774_p8, %p4712_p13  ;;  %p4783_p2 = por %p4782_p1, %p4781_p3 }
  0x31   : > { %p4777_p0 = pneg %p4776_p11 }
  0x33   : > { %p4784_p4 = pnand %p4783_p2, %p4777_p0 }
  0x35   : > { %4787 = shalt.err (!%p4784_p4)
}
  0x36   : > { %s4863_s16 = smov 256   ;;  %s4864_s2 = smov 16  }
  0x37   : > { %4653 = dma.hbm_to_vmem [thread:$0]  (!%p4989_p12), %s7418_s5, 12288, %s336_s22, [#allocation6], %s4863_s16, %s4863_s16, %s4864_s2  }
  0x38   : > { %375 = sbr.rel (%p4981_p10) target bundleno = 1572 (0x624), region = 64 }
  0x3d   : > { %4831 = dma.done.wait (%p4658_p9), [#allocation3], 640  }
  0x3e   : > { %4833 = vsyncadd (%p4658_p9), [#allocation3], 4294966656 }
  0x3f   : > { %4835 = dma.done.wait (%p4658_p9), [#allocation6], 12304  }
  0x40   : > { %4837 = vsyncadd (%p4658_p9), [#allocation6], 4294954992  ;;  %s4266_s14 = sshll.u32 %s4953_s21, 5  ;;  %v462_v0 = vlaneseq  ;;  %s4865_s15 = smov 12   ;;  %vm1696_vm3 = vcmask 1043456   ;;  %v1590_v31 = vld [vmem:[#allocation2 + $0x18] sm:$0xff] }
  0x41   : > { %p424_p13 = scmp.lt.s32.totalorder %s4266_s14, 63  ;;  %s4866_s22 = smov 24   ;;  %v1591_v30 = vld [vmem:[#allocation2 + $0x20] sm:$0xf]  ;;  %v1589_v35 = vld [vmem:[#allocation2 + $0x10] sm:$0xff]  ;;  %v1588_v38 = vld [vmem:[#allocation2 + $0x8] sm:$0xff] }
  0x42   : > { %v5037_v1 = vshrl.u32 %v462_v0, 7  ;;  %4460 = vmatprep.subr.msk.mxu0 %vm1696_vm3, %v1591_v30  ;;  %v1587_v44 = vld [vmem:[#allocation2] sm:$0xff]  ;;  %v7537_v61 = vmov 0  ;;  %s4868_s26 = smov 64   ;;  %s420_s19 = sand.u32 1, %s4848_s18  }
  0x43   : > { %s7912_s14 = smov (!%p424_p13, %s4266_s14), 63  ;;  %4461 = vmatpush3.msk.msra.mxu0 %vm1696_vm3, %v1591_v30  ;;  %s4374_s24 = sshll.u32 %s4953_s21, 12 }
  0x44   : > { %v464_v2 = vadd.s32 8, %v5037_v1  ;;  %s4267_s2 = sshll.u32 %s7912_s14, 3  ;;  %v466_v4 = vadd.s32 24, %v5037_v1  ;;  %vm7440_vm0 = vcmp.lt.s32.totalorder %v5037_v1, 7  ;;  %v468_v22 = vadd.s32 40, %v5037_v1  ;;  %4462 = vmatprep.subr.mxu0 %v1590_v31  ;;  %s7364_s13 = scalar_lea.hbm %s7424_s11, %s4374_s24 }
  0x45   : > { %s5043_s29 = scalar_lea.vmem %s7413_s0, %s4267_s2  ;;  %v470_v34 = vadd.s32 56, %v5037_v1  ;;  %4463 = vmatpush3.msra.mxu0 %v1590_v31  ;;  %v472_v47 = vadd.s32 72, %v5037_v1  ;;  %vm7426_vm6 = vcmp.lt.s32.totalorder %v5037_v1, 1  ;;  %v474_v59 = vadd.s32 88, %v5037_v1  ;;  %s7373_s21 = scalar_lea.sflag [#allocation4], %s420_s19 }
  0x46   : > { %v506_v3 = vand.u32 15, %v464_v2  ;;  %v5047_v5 = vld [vmem:[%s5043_s29 + $0x18] sm:$0xff]  ;;  %v5050_v6 = vld [vmem:[%s5043_s29] sm:$0xff]  ;;  %v5053_v7 = vld [vmem:[%s5043_s29 + $0x8] sm:$0xff]  ;;  %v520_v15 = vand.u32 15, %v466_v4  ;;  %v534_v28 = vand.u32 15, %v468_v22  ;;  %4464 = vmatprep.subr.mxu0 %v1589_v35 }
  0x47   : > { %1303 = vrot.lane.b32.xlu1 %v5047_v5, %s4865_s15  ;;  %1297 = vrot.lane.b32.xlu0 %v5050_v6, %s4865_s15  ;;  %v1104_v8 = vrot.slane %v5050_v6, 1  ;;  %v5062_v9 = vld [vmem:[%s5043_s29 + $0x10] sm:$0xff]  ;;  %v5065_v10 = vld [vmem:[%s5043_s29 + $0x20] sm:$0xff]  ;;  %v1105_v11 = vrot.slane %v5053_v7, 1  ;;  %v1107_v13 = vrot.slane %v5047_v5, 1  ;;  %v548_v42 = vand.u32 15, %v470_v34 }
  0x48   : > { %v1106_v12 = vrot.slane %v5062_v9, 1  ;;  %vm5070_vm1 = vcmp.lt.s32.totalorder %v506_v3, 15  ;;  %v1108_v16 = vrot.slane %v5065_v10, 1  ;;  %vm5086_vm2 = vcmp.lt.s32.totalorder %v520_v15, 15  ;;  %v5094_v23 = vld [vmem:[%s5043_s29 + $0x28] sm:$0xff]  ;;  %v5097_v24 = vld [vmem:[%s5043_s29 + $0x30] sm:$0xff]  ;;  %4465 = vmatpush3.msra.mxu0 %v1589_v35 }
  0x49   : > { %v1167_v17 = vsel %vm7440_vm0, %v1104_v8, %v1105_v11  ;;  %v1109_v27 = vrot.slane %v5094_v23, 1  ;;  %v1110_v29 = vrot.slane %v5097_v24, 1  ;;  %vm5110_vm4 = vcmp.lt.s32.totalorder %v534_v28, 15  ;;  %v5118_v36 = vld [vmem:[%s5043_s29 + $0x38] sm:$0xff]  ;;  %v5121_v37 = vld [vmem:[%s5043_s29 + $0x40] sm:$0xff]  ;;  %4466 = vmatprep.subr.mxu0 %v1588_v38  ;;  %v5143_v48 = vld [vmem:[%s5043_s29 + $0x48] sm:$0xff] }
  0x4a   : > { %v1166_v18 = vsel %vm7440_vm0, %v1105_v11, %v1106_v12  ;;  %v1164_v21 = vsel %vm7440_vm0, %v1107_v13, %v1108_v16  ;;  %v1165_v25 = vsel %vm7440_vm0, %v1106_v12, %v1107_v13  ;;  %v1111_v41 = vrot.slane %v5118_v36, 1  ;;  %4467 = vmatpush3.msra.mxu0 %v1588_v38  ;;  %v5146_v49 = vld [vmem:[%s5043_s29 + $0x50] sm:$0xff]  ;;  %v441_v63 = vld [vmem:[%s5043_s29 + $0x58] sm:$0xff]  ;;  %v5178_v0 = vld [vmem:[%s5043_s29 + $0x60] sm:$0xff]  ;;  %s4869_s14 = smov [#allocation8]  }
  0x4b   : > { %1299 = vrot.lane.b32.xlu0 %v5053_v7, %s4865_s15  ;;  %1425 = vrot.lane.b32.xlu1 %v1167_v17, %s4866_s22  ;;  %v1234_v19 = vsel %vm5070_vm1, %v1166_v18, 0.0  ;;  %v1236_v26 = vsel %vm5086_vm2, %v1164_v21, 0.0  ;;  %v1162_v33 = vsel %vm7440_vm0, %v1109_v27, %v1110_v29  ;;  %v1163_v39 = vsel %vm7440_vm0, %v1108_v16, %v1109_v27  ;;  %v5181_v2 = vld [vmem:[%s5043_s29 + $0xf8] sm:$0xff]  ;;  %v443_v27 = vld [vmem:[%s5043_s29 + $0x68] sm:$0xff]  ;;  %s4792_s2 = sshll.u32 %s4869_s14, 4  ;;  %s4793_s2 = int_to_ptr.vmem [resolvable:$false] %s4792_s2 }
  0x4c   : > { %v1238_v40 = vsel %vm5110_vm4, %v1162_v33, 0.0  ;;  %v1112_v43 = vrot.slane %v5121_v37, 1  ;;  %vm5135_vm5 = vcmp.lt.s32.totalorder %v548_v42, 15  ;;  %4468 = vmatprep.subr.mxu0 %v1587_v44  ;;  %v946_v50 = vrot.slane %v5047_v5, 7  ;;  %v444_v30 = vld [vmem:[%s5043_s29 + $0x70] sm:$0xff]  ;;  %v445_v34 = vld [vmem:[%s5043_s29 + $0x78] sm:$0xff] }
  0x4d   : > { %4469 = vmatpush3.msra.mxu0 %v1587_v44  ;;  %v945_v51 = vrot.slane %v5062_v9, 7  ;;  %v1161_v52 = vsel %vm7440_vm0, %v1110_v29, %v1111_v41  ;;  %v1113_v54 = vrot.slane %v5143_v48, 1  ;;  %v562_v55 = vand.u32 15, %v472_v47 }
  0x4e   : > { %v1160_v46 = vsel %vm7440_vm0, %v1111_v41, %v1112_v43  ;;  %v1114_v56 = vrot.slane %v5146_v49, 1  ;;  %v944_v57 = vrot.slane %v5053_v7, 7  ;;  %v943_v58 = vrot.slane %v5050_v6, 7 }
  0x4f   : > { %1301 = vrot.lane.b32.xlu0 %v5062_v9, %s4865_s15  ;;  %1427 = vrot.lane.b32.xlu1 %v1234_v19, %s4866_s22  ;;  %v1240_v53 = vsel %vm5135_vm5, %v1160_v46, 0.0  ;;  %v5168_v60 = vsel %vm7426_vm6, %v945_v51, %v946_v50  ;;  %vm5170_vm7 = vcmp.lt.s32.totalorder %v562_v55, 15  ;;  %v948_v4 = vrot.slane %v5094_v23, 7  ;;  %v447_v55 = vld [vmem:[%s5043_s29 + $0x88] sm:$0xff] }
  0x50   : > { %v7538_v61 = vsel %vm5170_vm7, 4294967295, %v7537_v61  ;;  %v1158_v62 = vsel %vm7440_vm0, %v1113_v54, %v1114_v56  ;;  %v5187_v3 = vsel %vm7426_vm6, %v943_v58, %v944_v57  ;;  %v5196_v5 = vsel %vm7426_vm6, %v944_v57, %v945_v51 }
  0x51   : > { %v7432_v7 = vrot.slane %v5181_v2, 1  ;;  %v1159_v9 = vsel %vm7440_vm0, %v1112_v43, %v1113_v54  ;;  %v1242_v11 = vsel %vm5170_vm7, %v1158_v62, 0.0  ;;  %v576_v12 = vand.u32 15, %v474_v59 }
  0x52   : > { %v1115_v13 = vrot.slane %v441_v63, 1  ;;  %v1116_v15 = vrot.slane %v5178_v0, 1  ;;  %v947_v17 = vrot.slane %v5065_v10, 7  ;;  %v950_v18 = vrot.slane %v5118_v36, 7 }
  0x53   : > { %1429 = vrot.lane.b32.xlu0 %v1165_v25, %s4866_s22  ;;  %1431 = vrot.lane.b32.xlu1 %v1236_v26, %s4866_s22  ;;  %v5210_v16 = vsel %vm7440_vm0, %v7432_v7, %v1104_v8  ;;  %v952_v19 = vrot.slane %v5143_v48, 7  ;;  %v476_v22 = vadd.s32 104, %v5037_v1  ;;  %vm5227_vm8 = vcmp.lt.s32.totalorder %v576_v12, 15 }
  0x54   : > { %v5219_v21 = vsel %vm7426_vm6, %v946_v50, %v947_v17  ;;  %v5223_v8 = vsel %vm7426_vm6, %v947_v17, %v948_v4  ;;  %v7539_v25 = vmov 0  ;;  %v1156_v26 = vsel %vm7440_vm0, %v1115_v13, %v1116_v15 }
  0x55   : > { %v7540_v25 = vsel %vm5227_vm8, 4294967295, %v7539_v25  ;;  %v951_v28 = vrot.slane %v5121_v37, 7  ;;  %v1157_v29 = vsel %vm7440_vm0, %v1114_v56, %v1115_v13  ;;  %v956_v33 = vrot.slane %v443_v27, 7  ;;  %v446_v56 = vld [vmem:[%s5043_s29 + $0x80] sm:$0xff] }
  0x56   : > { %v1244_v38 = vsel %vm5227_vm8, %v1156_v26, 0.0  ;;  %v958_v41 = vrot.slane %v445_v34, 7  ;;  %v1118_v42 = vrot.slane %v444_v30, 1  ;;  %v955_v46 = vrot.slane %v5178_v0, 7 }
  0x57   : > { %1305 = vrot.lane.b32.xlu0 %v5065_v10, %s4865_s15  ;;  %1307 = vrot.lane.b32.xlu1 %v5094_v23, %s4865_s15  ;;  %v949_v10 = vrot.slane %v5097_v24, 7  ;;  %v954_v23 = vrot.slane %v441_v63, 7  ;;  %v5252_v35 = vsel %vm7426_vm6, %v950_v18, %v951_v28  ;;  %v957_v47 = vrot.slane %v444_v30, 7 }
  0x58   : > { %v478_v54 = vadd.s32 120, %v5037_v1  ;;  %v960_v57 = vrot.slane %v447_v55, 7  ;;  %v959_v59 = vrot.slane %v446_v56, 7  ;;  %v7543_v13 = vmov 0 }
  0x59   : > { %v5240_v31 = vsel %vm7426_vm6, %v948_v4, %v949_v10  ;;  %v5282_v50 = vsel %vm7426_vm6, %v956_v33, %v957_v47  ;;  %v5286_v51 = vsel %vm7426_vm6, %v957_v47, %v958_v41  ;;  %v1119_v4 = vrot.slane %v445_v34, 1 }
  0x5a   : > { %v5306_v12 = vsel %vm7426_vm6, %v958_v41, %v959_v59  ;;  %v480_v17 = vadd.s32 136, %v5037_v1 }
  0x5b   : > { %1433 = vrot.lane.b32.xlu0 %v1163_v39, %s4866_s22  ;;  %1435 = vrot.lane.b32.xlu1 %v1238_v40, %s4866_s22  ;;  %v1117_v39 = vrot.slane %v443_v27, 1  ;;  %v590_v40 = vand.u32 15, %v476_v22 }
  0x5d   : > { %vm5288_vm9 = vcmp.lt.s32.totalorder %v590_v40, 15  ;;  %v1155_v62 = vsel %vm7440_vm0, %v1116_v15, %v1117_v39  ;;  %v450_v40 = vld [vmem:[%s5043_s29 + $0xa0] sm:$0xff] }
  0x5f   : > { %1309 = vrot.lane.b32.xlu0 %v5097_v24, %s4865_s15  ;;  %1311 = vrot.lane.b32.xlu1 %v5118_v36, %s4865_s15  ;;  %v5244_v24 = vsel %vm7426_vm6, %v949_v10, %v950_v18  ;;  %v5256_v36 = vsel %vm7426_vm6, %v951_v28, %v952_v19  ;;  %v449_v18 = vld [vmem:[%s5043_s29 + $0x98] sm:$0xff]  ;;  %v618_v28 = vand.u32 15, %v480_v17 }
  0x60   : > { %v962_v22 = vrot.slane %v449_v18, 7 }
  0x61   : > { %vm5339_vm11 = vcmp.lt.s32.totalorder %v618_v28, 15 }
  0x63   : > { %1437 = vrot.lane.b32.xlu0 %v1161_v52, %s4866_s22  ;;  %1439 = vrot.lane.b32.xlu1 %v1240_v53, %s4866_s22  ;;  %v7541_v52 = vmov 0  ;;  %v1154_v53 = vsel %vm7440_vm0, %v1117_v39, %v1118_v42  ;;  %v5347_v39 = vld [vmem:[%s5043_s29 + $0xa8] sm:$0xff] }
  0x64   : > { %v7542_v52 = vsel %vm5288_vm9, 4294967295, %v7541_v52  ;;  %v7427_v41 = vrot.slane %v5347_v39, 7 }
  0x67   : > { %1313 = vrot.lane.b32.xlu0 %v5121_v37, %s4865_s15  ;;  %1315 = vrot.lane.b32.xlu1 %v5143_v48, %s4865_s15  ;;  %v953_v37 = vrot.slane %v5146_v49, 7  ;;  %v5274_v48 = vsel %vm7426_vm6, %v954_v23, %v955_v46 }
  0x69   : > { %v5263_v43 = vsel %vm7426_vm6, %v952_v19, %v953_v37  ;;  %v5267_v44 = vsel %vm7426_vm6, %v953_v37, %v954_v23  ;;  %v448_v19 = vld [vmem:[%s5043_s29 + $0x90] sm:$0xff]  ;;  %v1153_v23 = vsel %vm7440_vm0, %v1118_v42, %v1119_v4  ;;  %v963_v42 = vrot.slane %v450_v40, 7 }
  0x6a   : > { %v961_v10 = vrot.slane %v448_v19, 7 }
  0x6b   : > { %1441 = vrot.lane.b32.xlu0 %v1159_v9, %s4866_s22  ;;  %1443 = vrot.lane.b32.xlu1 %v1242_v11, %s4866_s22  ;;  %v604_v9 = vand.u32 15, %v478_v54  ;;  %v1120_v11 = vrot.slane %v446_v56, 1 }
  0x6d   : > { %vm5314_vm10 = vcmp.lt.s32.totalorder %v604_v9, 15  ;;  %v1152_v15 = vsel %vm7440_vm0, %v1119_v4, %v1120_v11  ;;  %v5377_v4 = vld [vmem:[%s5043_s29 + $0xb0] sm:$0xff] }
  0x6e   : > { %v7544_v13 = vsel %vm5314_vm10, 4294967295, %v7543_v13  ;;  %v1248_v26 = vsel %vm5314_vm10, %v1152_v15, 0.0  ;;  %v1125_v15 = vrot.slane %v5347_v39, 1 }
  0x6f   : > { %1317 = vrot.lane.b32.xlu0 %v5146_v49, %s4865_s15  ;;  %1319 = vrot.lane.b32.xlu1 %v441_v63, %s4865_s15  ;;  %v5278_v49 = vsel %vm7426_vm6, %v955_v46, %v956_v33  ;;  %v1246_v63 = vsel %vm5288_vm9, %v1154_v53, 0.0  ;;  %v5331_v33 = vsel %vm7426_vm6, %v960_v57, %v961_v10  ;;  %v1123_v53 = vrot.slane %v449_v18, 1 }
  0x73   : > { %1445 = vrot.lane.b32.xlu0 %v1157_v29, %s4866_s22  ;;  %1447 = vrot.lane.b32.xlu1 %v1244_v38, %s4866_s22  ;;  %v1122_v29 = vrot.slane %v448_v19, 1  ;;  %v482_v38 = vadd.s32 152, %v5037_v1 }
  0x75   : > { %v632_v54 = vand.u32 15, %v482_v38  ;;  %v1149_v9 = vsel %vm7440_vm0, %v1122_v29, %v1123_v53 }
  0x77   : > { %1321 = vrot.lane.b32.xlu0 %v5178_v0, %s4865_s15  ;;  %1323 = vrot.lane.b32.xlu1 %v443_v27, %s4865_s15  ;;  %v5310_v0 = vsel %vm7426_vm6, %v959_v59, %v960_v57  ;;  %v1121_v27 = vrot.slane %v447_v55, 1  ;;  %v1124_v57 = vrot.slane %v450_v40, 1  ;;  %v5359_v59 = vsel %vm7426_vm6, %v962_v22, %v963_v42 }
  0x78   : > { %vm5369_vm12 = vcmp.lt.s32.totalorder %v632_v54, 15 }
  0x79   : > { %v1150_v37 = vsel %vm7440_vm0, %v1121_v27, %v1122_v29  ;;  %v1151_v46 = vsel %vm7440_vm0, %v1120_v11, %v1121_v27  ;;  %v1147_v27 = vsel %vm7440_vm0, %v1124_v57, %v1125_v15 }
  0x7a   : > { %v1250_v47 = vsel %vm5339_vm11, %v1150_v37, 0.0 }
  0x7b   : > { %1449 = vrot.lane.b32.xlu0 %v1155_v62, %s4866_s22  ;;  %1451 = vrot.lane.b32.xlu1 %v1246_v63, %s4866_s22  ;;  %v1148_v62 = vsel %vm7440_vm0, %v1123_v53, %v1124_v57  ;;  %v484_v63 = vadd.s32 168, %v5037_v1  ;;  %v5424_v53 = vld [vmem:[%s5043_s29 + $0xd0] sm:$0xff] }
  0x7c   : > { %v1252_v11 = vsel %vm5369_vm12, %v1148_v62, 0.0 }
  0x7d   : > { %v646_v17 = vand.u32 15, %v484_v63 }
  0x7f   : > { %1325 = vrot.lane.b32.xlu0 %v444_v30, %s4865_s15  ;;  %1327 = vrot.lane.b32.xlu1 %v445_v34, %s4865_s15  ;;  %v5335_v30 = vsel %vm7426_vm6, %v961_v10, %v962_v22  ;;  %v7545_v34 = vmov 0  ;;  %v1126_v22 = vrot.slane %v5377_v4, 1  ;;  %vm5389_vm13 = vcmp.lt.s32.totalorder %v646_v17, 15 }
  0x80   : > { %v7546_v34 = vsel %vm5339_vm11, 4294967295, %v7545_v34  ;;  %v7551_v10 = vmov 0  ;;  %v490_v17 = vadd.s32 216, %v5037_v1 }
  0x81   : > { %7547 = vst [vmem:[#allocation14_spill] sm:$0xff] %v7546_v34  ;;  %v7552_v10 = vsel %vm5389_vm13, 4294967295, %v7551_v10 }
  0x82   : > { %7553 = vst [vmem:[#allocation16_spill] sm:$0xff] %v7552_v10 }
  0x83   : > { %1453 = vrot.lane.b32.xlu0 %v1153_v23, %s4866_s22  ;;  %1455 = vrot.lane.b32.xlu1 %v1248_v26, %s4866_s22  ;;  %v5397_v23 = vld [vmem:[%s5043_s29 + $0xb8] sm:$0xff]  ;;  %v5400_v26 = vld [vmem:[%s5043_s29 + $0xc0] sm:$0xff] }
  0x84   : > { %v1127_v29 = vrot.slane %v5397_v23, 1  ;;  %v1128_v38 = vrot.slane %v5400_v26, 1 }
  0x86   : > { %v1145_v54 = vsel %vm7440_vm0, %v1126_v22, %v1127_v29 }
  0x87   : > { %1329 = vrot.lane.b32.xlu0 %v446_v56, %s4865_s15  ;;  %1331 = vrot.lane.b32.xlu1 %v447_v55, %s4865_s15  ;;  %v5365_v56 = vsel %vm7426_vm6, %v963_v42, %v7427_v41  ;;  %v7548_v55 = vmov 0  ;;  %v1144_v42 = vsel %vm7440_vm0, %v1127_v29, %v1128_v38  ;;  %v688_v29 = vand.u32 15, %v490_v17 }
  0x88   : > { %v7549_v55 = vsel %vm5369_vm12, 4294967295, %v7548_v55  ;;  %v7563_v41 = vmov 0  ;;  %vm7578_vm12 = vcmask 195584  }
  0x89   : > { %7550 = vst [vmem:[#allocation15_spill] sm:$0xff] %v7549_v55  ;;  %vm5463_vm3 = vcmp.lt.s32.totalorder %v688_v29, 15  ;;  %v7437_v29 = vrot.slane %v5181_v2, 7  ;;  %vm7582_vm11 = vmmov %vm7578_vm12 }
  0x8b   : > { %1457 = vrot.lane.b32.xlu0 %v1151_v46, %s4866_s22  ;;  %1459 = vrot.lane.b32.xlu1 %v1250_v47, %s4866_s22  ;;  %v488_v46 = vadd.s32 200, %v5037_v1  ;;  %v5421_v47 = vld [vmem:[%s5043_s29 + $0xc8] sm:$0xff] }
  0x8c   : > { %v1129_v62 = vrot.slane %v5421_v47, 1 }
  0x8d   : > { %v674_v63 = vand.u32 15, %v488_v46 }
  0x8f   : > { %1333 = vrot.lane.b32.xlu0 %v448_v19, %s4865_s15  ;;  %1335 = vrot.lane.b32.xlu1 %v449_v18, %s4865_s15  ;;  %v1146_v18 = vsel %vm7440_vm0, %v1125_v15, %v1126_v22  ;;  %v486_v19 = vadd.s32 184, %v5037_v1  ;;  %vm5438_vm15 = vcmp.lt.s32.totalorder %v674_v63, 15  ;;  %v5446_v22 = vld [vmem:[%s5043_s29 + $0xd8] sm:$0xff] }
  0x90   : > { %v1254_v28 = vsel %vm5389_vm13, %v1146_v18, 0.0  ;;  %v5449_v18 = vld [vmem:[%s5043_s29 + $0xe0] sm:$0xff] }
  0x91   : > { %v660_v37 = vand.u32 15, %v486_v19  ;;  %v1143_v19 = vsel %vm7440_vm0, %v1128_v38, %v1129_v62  ;;  %v492_v38 = vadd.s32 232, %v5037_v1 }
  0x93   : > { %1461 = vrot.lane.b32.xlu0 %v1149_v9, %s4866_s22  ;;  %1463 = vrot.lane.b32.xlu1 %v1252_v11, %s4866_s22  ;;  %vm5413_vm14 = vcmp.lt.s32.totalorder %v660_v37, 15  ;;  %v1130_v9 = vrot.slane %v5424_v53, 1  ;;  %v7557_v11 = vmov 0  ;;  %v1132_v37 = vrot.slane %v5449_v18, 1 }
  0x94   : > { %v1256_v57 = vsel %vm5413_vm14, %v1144_v42, 0.0  ;;  %v7558_v11 = vsel %vm5438_vm15, 4294967295, %v7557_v11  ;;  %v7560_v42 = vmov 0  ;;  %v702_v17 = vand.u32 15, %v492_v38 }
  0x95   : > { %7559 = vst [vmem:[#allocation18_spill] sm:$0xff] %v7558_v11  ;;  %v1142_v15 = vsel %vm7440_vm0, %v1129_v62, %v1130_v9  ;;  %v7561_v42 = vsel %vm5463_vm3, 4294967295, %v7560_v42 }
  0x96   : > { %7562 = vst [vmem:[#allocation19_spill] sm:$0xff] %v7561_v42  ;;  %vm5490_vm6 = vcmp.lt.s32.totalorder %v702_v17, 15 }
  0x97   : > { %1337 = vrot.lane.b32.xlu0 %v450_v40, %s4865_s15  ;;  %1339 = vrot.lane.b32.xlu1 %v5347_v39, %s4865_s15  ;;  %v7554_v40 = vmov 0  ;;  %v7564_v41 = vsel %vm5490_vm6, 4294967295, %v7563_v41 }
  0x98   : > { %v7555_v40 = vsel %vm5413_vm14, 4294967295, %v7554_v40  ;;  %7565 = vst [vmem:[#allocation20_spill] sm:$0xff] %v7564_v41  ;;  %vm7445_vm14 = vcmask 97280  }
  0x99   : > { %7556 = vst [vmem:[#allocation17_spill] sm:$0xff] %v7555_v40 }
  0x9b   : > { %1465 = vrot.lane.b32.xlu0 %v1147_v27, %s4866_s22  ;;  %1467 = vrot.lane.b32.xlu1 %v1254_v28, %s4866_s22  ;;  %v1258_v27 = vsel %vm5438_vm15, %v1142_v15, 0.0  ;;  %v1131_v28 = vrot.slane %v5446_v22, 1  ;;  %vm7569_vm15 = vcmp.lt.s32.totalorder %v5037_v1, 1 }
  0x9c   : > { %v1007_v38 = vsel %vm7569_vm15, %v7437_v29, %v943_v58  ;;  %vm7446_vm15 = vcmask 195584  }
  0x9d   : > { %v1140_v46 = vsel %vm7440_vm0, %v1131_v28, %v1132_v37  ;;  %v1141_v62 = vsel %vm7440_vm0, %v1130_v9, %v1131_v28  ;;  %v494_v28 = vadd.s32 248, %v5037_v1 }
  0x9e   : > { %v1260_v63 = vsel %vm5463_vm3, %v1140_v46, 0.0  ;;  %v7566_v46 = vmov 0 }
  0x9f   : > { %1341 = vrot.lane.b32.xlu0 %v5377_v4, %s4865_s15  ;;  %1343 = vrot.lane.b32.xlu1 %v5397_v23, %s4865_s15  ;;  %v716_v42 = vand.u32 15, %v494_v28  ;;  %v7573_v28 = vmov 0 }
  0xa1   : > { %vm5521_vm13 = vcmp.lt.s32.totalorder %v716_v42, 15  ;;  %v7575_v42 = vrot.slane %v5181_v2, 1 }
  0xa3   : > { %1469 = vrot.lane.b32.xlu0 %v1145_v54, %s4866_s22  ;;  %1471 = vrot.lane.b32.xlu1 %v1256_v57, %s4866_s22  ;;  %v5471_v54 = vld [vmem:[%s5043_s29 + $0xe8] sm:$0xff]  ;;  %v5474_v57 = vld [vmem:[%s5043_s29 + $0xf0] sm:$0xff] }
  0xa4   : > { %v1133_v15 = vrot.slane %v5471_v54, 1 }
  0xa7   : > { %1345 = vrot.lane.b32.xlu0 %v5400_v26, %s4865_s15  ;;  %1347 = vrot.lane.b32.xlu1 %v5421_v47, %s4865_s15 }
  0xab   : > { %1473 = vrot.lane.b32.xlu0 %v1143_v19, %s4866_s22  ;;  %1475 = vrot.lane.b32.xlu1 %v1258_v27, %s4866_s22  ;;  %v1134_v19 = vrot.slane %v5474_v57, 1  ;;  %v499_v27 = vand.u32 15, %v5037_v1 }
  0xad   : > { %v1138_v9 = vsel %vm7440_vm0, %v1133_v15, %v1134_v19  ;;  %vm5501_vm3 = vcmp.gt.s32.totalorder %v499_v27, 0 }
  0xae   : > { %v7567_v46 = vsel %vm5501_vm3, 4294967295, %v7566_v46  ;;  %v1262_v17 = vsel %vm5490_vm6, %v1138_v9, 0.0  ;;  %v1072_v6 = vsel %vm5501_vm3, %v1007_v38, 0.0  ;;  %v467_v38 = vadd.s32 32, %v5037_v1 }
  0xaf   : > { %1349 = vrot.lane.b32.xlu0 %v5424_v53, %s4865_s15  ;;  %1351 = vrot.lane.b32.xlu1 %v5446_v22, %s4865_s15  ;;  %7568 = vst [vmem:[#allocation21_spill] sm:$0xff] %v7567_v46 }
  0xb3   : > { %1477 = vrot.lane.b32.xlu0 %v1141_v62, %s4866_s22  ;;  %1479 = vrot.lane.b32.xlu1 %v1260_v63, %s4866_s22  ;;  %v465_v62 = vadd.s32 16, %v5037_v1  ;;  %v1139_v63 = vsel %vm7440_vm0, %v1132_v37, %v1133_v15  ;;  %vm7471_vm0 = vcmask 293888   ;;  %v7570_v15 = vmov 0 }
  0xb4   : > { %v7571_v15 = vsel %vm5521_vm13, 4294967295, %v7570_v15 }
  0xb5   : > { %v513_v58 = vand.u32 15, %v465_v62  ;;  %7572 = vst [vmem:[#allocation22_spill] sm:$0xff] %v7571_v15 }
  0xb7   : > { %1353 = vrot.lane.b32.xlu0 %v5449_v18, %s4865_s15  ;;  %1355 = vrot.lane.b32.xlu1 %v5471_v54, %s4865_s15  ;;  %vm5530_vm6 = vcmp.gt.s32.totalorder %v513_v58, 0 }
  0xb8   : > { %v7574_v28 = vsel %vm5530_vm6, 4294967295, %v7573_v28 }
  0xb9   : > { %v1304_v7 = vpop.permute.xlu1 %1303  ;;  %v1298_v27 = vpop.permute.xlu0 %1297 }
  0xba   : > { %v1522_v29 = vsel %vm7445_vm14, %v1072_v6, %v1298_v27  ;;  %vm7576_vm14 = vcmp.lt.s32.totalorder %v5037_v1, 7  ;;  %v1074_v6 = vsel %vm5530_vm6, %v5196_v5, 0.0 }
  0xbb   : > { %1481 = vrot.lane.b32.xlu0 %v1139_v63, %s4866_s22  ;;  %1483 = vrot.lane.b32.xlu1 %v1262_v17, %s4866_s22  ;;  %v1137_v62 = vsel %vm7576_vm14, %v1134_v19, %v7575_v42  ;;  %v527_v19 = vand.u32 15, %v467_v38  ;;  %v7583_v42 = vmov 0  ;;  %v469_v38 = vadd.s32 48, %v5037_v1 }
  0xbd   : > { %v1300_v11 = vpop.permute.xlu0 %1299  ;;  %v1426_v37 = vpop.permute.xlu1 %1425 }
  0xbe   : > { %v1555_v9 = vsel %vm7446_vm15, %v1522_v29, %v1426_v37  ;;  %v1264_v29 = vsel %vm5521_vm13, %v5210_v16, 0.0  ;;  %vm7577_vm15 = vcmask 97280  }
  0xbf   : > { %1357 = vrot.lane.b32.xlu0 %v5474_v57, %s4865_s15  ;;  %1359 = vrot.lane.b32.xlu1 %v5181_v2, %s4865_s15  ;;  %v1523_v63 = vsel %vm7577_vm15, %v5187_v3, %v1300_v11  ;;  %vm7579_vm14 = vmmov %vm7577_vm15 }
  0xc0   : > { %4470 = vmatprep.mubr.msk.f32.mxu0 %vm7471_vm0, %v1555_v9  ;;  %v1525_v16 = vsel %vm7579_vm14, %v5168_v60, %v1304_v7  ;;  %vm7580_vm13 = vmmov %vm7579_vm14 }
  0xc1   : > { %v1302_v17 = vpop.permute.xlu0 %1301  ;;  %v1428_v27 = vpop.permute.xlu1 %1427  ;;  %vm7581_vm15 = vmmov %vm7578_vm12 }
  0xc2   : > { %v1556_v58 = vsel %vm7578_vm12, %v1523_v63, %v1428_v27  ;;  %v1524_v3 = vsel %vm7580_vm13, %v1074_v6, %v1302_v17  ;;  %vm5558_vm12 = vcmp.gt.s32.totalorder %v527_v19, 0  ;;  %vm7586_vm14 = vmmov %vm7581_vm15 }
  0xc3   : > { %1485 = vrot.lane.b32.xlu0 %v1137_v62, %s4866_s22  ;;  %1487 = vrot.lane.b32.xlu1 %v1264_v29, %s4866_s22  ;;  %v7584_v42 = vsel %vm5558_vm12, 4294967295, %v7583_v42  ;;  %v1076_v7 = vsel %vm5558_vm12, %v5219_v21, 0.0  ;;  %v541_v29 = vand.u32 15, %v469_v38  ;;  %v471_v21 = vadd.s32 64, %v5037_v1 }
  0xc4   : > { %4471 = vmatmul.mubr.msk.f32.vlgmr.msra.gmra.mxu0 %vm7471_vm0, %v1556_v58 }
  0xc5   : > { %v1430_v11 = vpop.permute.xlu0 %1429  ;;  %v1432_v37 = vpop.permute.xlu1 %1431  ;;  %vm5573_vm10 = vcmp.gt.s32.totalorder %v541_v29, 0  ;;  %v7592_v29 = vmov 0 }
  0xc6   : > { %v1557_v9 = vsel %vm7581_vm15, %v1524_v3, %v1430_v11  ;;  %v1558_v5 = vsel %vm7582_vm11, %v1525_v16, %v1432_v37  ;;  %vm7585_vm11 = vmmov %vm7580_vm13  ;;  %v7588_v16 = vmov 0  ;;  %v555_v37 = vand.u32 15, %v471_v21 }
  0xc7   : > { %4473 = vmatprep.mubr.msk.f32.mxu0 %vm7471_vm0, %v1557_v9  ;;  %vm7587_vm15 = vmmov %vm7586_vm14  ;;  %v7589_v16 = vsel %vm5573_vm10, 4294967295, %v7588_v16 }
  0xc8   : > { %4474 = vmatmul.mubr.msk.f32.gmra.mxu0 %vm7471_vm0, %v1558_v5  ;;  %vm5588_vm9 = vcmp.gt.s32.totalorder %v555_v37, 0 }
  0xc9   : > { %v1306_v62 = vpop.permute.xlu0 %1305  ;;  %v1308_v60 = vpop.permute.xlu1 %1307  ;;  %v7593_v29 = vsel %vm5588_vm9, 4294967295, %v7592_v29 }
  0xca   : > { %v1526_v63 = vsel %vm7580_vm13, %v1076_v7, %v1306_v62  ;;  %v1527_v17 = vsel %vm7585_vm11, %v5223_v8, %v1308_v60  ;;  %v1078_v8 = vsel %vm5573_vm10, %v5240_v31, 0.0  ;;  %vm7590_vm13 = vmmov %vm7585_vm11  ;;  %v473_v31 = vadd.s32 80, %v5037_v1 }
  0xcd   : > { %v1434_v27 = vpop.permute.xlu0 %1433  ;;  %v1436_v6 = vpop.permute.xlu1 %1435 }
  0xce   : > { %v1559_v58 = vsel %vm7586_vm14, %v1526_v63, %v1434_v27  ;;  %v1560_v19 = vsel %vm7587_vm15, %v1527_v17, %v1436_v6  ;;  %vm7591_vm15 = vmmov %vm7586_vm14  ;;  %v569_v27 = vand.u32 15, %v473_v31 }
  0xcf   : > { %4476 = vmatprep.mubr.msk.f32.mxu0 %vm7471_vm0, %v1559_v58 }
  0xd0   : > { %4477 = vmatmul.mubr.msk.f32.gmra.mxu0 %vm7471_vm0, %v1560_v19  ;;  %vm5603_vm8 = vcmp.gt.s32.totalorder %v569_v27, 0 }
  0xd1   : > { %v1310_v3 = vpop.permute.xlu0 %1309  ;;  %v1312_v11 = vpop.permute.xlu1 %1311 }
  0xd2   : > { %v1528_v9 = vsel %vm7590_vm13, %v1078_v8, %v1310_v3  ;;  %v1529_v5 = vsel %vm7585_vm11, %v5244_v24, %v1312_v11  ;;  %v1080_v24 = vsel %vm5588_vm9, %v5252_v35, 0.0  ;;  %vm7594_vm13 = vmmov %vm7585_vm11  ;;  %v7596_v8 = vmov 0 }
  0xd3   : > { %v7597_v8 = vsel %vm5603_vm8, 4294967295, %v7596_v8  ;;  %v475_v35 = vadd.s32 96, %v5037_v1 }
  0xd5   : > { %v1438_v38 = vpop.permute.xlu0 %1437  ;;  %v1440_v62 = vpop.permute.xlu1 %1439 }
  0xd6   : > { %v1561_v60 = vsel %vm7586_vm14, %v1528_v9, %v1438_v38  ;;  %v1562_v7 = vsel %vm7591_vm15, %v1529_v5, %v1440_v62  ;;  %vm7595_vm15 = vmmov %vm7586_vm14  ;;  %v583_v5 = vand.u32 15, %v475_v35 }
  0xd7   : > { %4479 = vmatprep.mubr.msk.f32.mxu0 %vm7471_vm0, %v1561_v60 }
  0xd8   : > { %4480 = vmatmul.mubr.msk.f32.gmra.mxu0 %vm7471_vm0, %v1562_v7  ;;  %vm5618_vm7 = vcmp.gt.s32.totalorder %v583_v5, 0 }
  0xd9   : > { %v1314_v63 = vpop.permute.xlu0 %1313  ;;  %v1316_v17 = vpop.permute.xlu1 %1315 }
  0xda   : > { %v1530_v6 = vsel %vm7594_vm13, %v1080_v24, %v1314_v63  ;;  %v1531_v58 = vsel %vm7585_vm11, %v5256_v36, %v1316_v17  ;;  %v1082_v36 = vsel %vm5603_vm8, %v5263_v43, 0.0  ;;  %vm7598_vm13 = vmmov %vm7585_vm11  ;;  %v7600_v17 = vmov 0 }
  0xdb   : > { %v7601_v17 = vsel %vm5618_vm7, 4294967295, %v7600_v17  ;;  %v477_v43 = vadd.s32 112, %v5037_v1 }
  0xdd   : > { %v1442_v19 = vpop.permute.xlu0 %1441  ;;  %v1444_v21 = vpop.permute.xlu1 %1443 }
  0xde   : > { %v1563_v3 = vsel %vm7586_vm14, %v1530_v6, %v1442_v19  ;;  %v1564_v11 = vsel %vm7595_vm15, %v1531_v58, %v1444_v21  ;;  %vm7599_vm15 = vmmov %vm7586_vm14  ;;  %v597_v6 = vand.u32 15, %v477_v43  ;;  %v7608_v43 = vmov 0 }
  0xdf   : > { %4482 = vmatprep.mubr.msk.f32.mxu0 %vm7471_vm0, %v1563_v3 }
  0xe0   : > { %4483 = vmatmul.mubr.msk.f32.gmra.mxu0 %vm7471_vm0, %v1564_v11  ;;  %vm5633_vm8 = vcmp.gt.s32.totalorder %v597_v6, 0 }
  0xe1   : > { %v1318_v37 = vpop.permute.xlu0 %1317  ;;  %v1320_v9 = vpop.permute.xlu1 %1319 }
  0xe2   : > { %v1532_v38 = vsel %vm7598_vm13, %v1082_v36, %v1318_v37  ;;  %v1533_v62 = vsel %vm7585_vm11, %v5267_v44, %v1320_v9  ;;  %v1084_v44 = vsel %vm5618_vm7, %v5274_v48, 0.0  ;;  %vm7602_vm13 = vmmov %vm7585_vm11  ;;  %v7604_v37 = vmov 0 }
  0xe3   : > { %v7605_v37 = vsel %vm5633_vm8, 4294967295, %v7604_v37  ;;  %v479_v48 = vadd.s32 128, %v5037_v1 }
  0xe5   : > { %v1446_v60 = vpop.permute.xlu0 %1445  ;;  %v1448_v7 = vpop.permute.xlu1 %1447  ;;  %v611_v5 = vand.u32 15, %v479_v48 }
  0xe6   : > { %v1565_v31 = vsel %vm7586_vm14, %v1532_v38, %v1446_v60  ;;  %v1566_v63 = vsel %vm7599_vm15, %v1533_v62, %v1448_v7  ;;  %vm7603_vm15 = vmmov %vm7586_vm14 }
  0xe7   : > { %4485 = vmatprep.mubr.msk.f32.mxu0 %vm7471_vm0, %v1565_v31  ;;  %vm5648_vm7 = vcmp.gt.s32.totalorder %v611_v5, 0 }
  0xe8   : > { %4486 = vmatmul.mubr.msk.f32.gmra.mxu0 %vm7471_vm0, %v1566_v63  ;;  %v7609_v43 = vsel %vm5648_vm7, 4294967295, %v7608_v43 }
  0xe9   : > { %v1322_v24 = vpop.permute.xlu0 %1321  ;;  %v1324_v27 = vpop.permute.xlu1 %1323  ;;  %7610 = vst [vmem:[#allocation23_spill] sm:$0xff] %v7609_v43 }
  0xea   : > { %v1534_v58 = vsel %vm7602_vm13, %v1084_v44, %v1322_v24  ;;  %v1535_v19 = vsel %vm7585_vm11, %v5278_v49, %v1324_v27  ;;  %v1086_v49 = vsel %vm5633_vm8, %v5282_v50, 0.0  ;;  %vm7606_vm13 = vmmov %vm7585_vm11  ;;  %v481_v50 = vadd.s32 144, %v5037_v1 }
  0xec   : > { %v625_v44 = vand.u32 15, %v481_v50 }
  0xed   : > { %v1450_v21 = vpop.permute.xlu0 %1449  ;;  %v1452_v3 = vpop.permute.xlu1 %1451 }
  0xee   : > { %v1567_v11 = vsel %vm7586_vm14, %v1534_v58, %v1450_v21  ;;  %v1568_v35 = vsel %vm7603_vm15, %v1535_v19, %v1452_v3  ;;  %vm7607_vm15 = vmmov %vm7586_vm14  ;;  %vm5663_vm8 = vcmp.gt.s32.totalorder %v625_v44, 0 }
  0xef   : > { %4488 = vmatprep.mubr.msk.f32.mxu0 %vm7471_vm0, %v1567_v11 }
  0xf0   : > { %4489 = vmatmul.mubr.msk.f32.gmra.mxu0 %vm7471_vm0, %v1568_v35  ;;  %v7613_v35 = vmov 0 }
  0xf1   : > { %v1326_v9 = vpop.permute.xlu0 %1325  ;;  %v1328_v36 = vpop.permute.xlu1 %1327  ;;  %v7614_v35 = vsel %vm5663_vm8, 4294967295, %v7613_v35 }
  0xf2   : > { %v1536_v38 = vsel %vm7606_vm13, %v1086_v49, %v1326_v9  ;;  %v1537_v62 = vsel %vm7585_vm11, %v5286_v51, %v1328_v36  ;;  %v1088_v51 = vsel %vm5648_vm7, %v5306_v12, 0.0  ;;  %vm7611_vm13 = vmmov %vm7585_vm11  ;;  %7615 = vst [vmem:[#allocation24_spill] sm:$0xff] %v7614_v35  ;;  %v483_v12 = vadd.s32 160, %v5037_v1 }
  0xf4   : > { %v639_v36 = vand.u32 15, %v483_v12 }
  0xf5   : > { %v1454_v60 = vpop.permute.xlu0 %1453  ;;  %v1456_v7 = vpop.permute.xlu1 %1455 }
  0xf6   : > { %v1569_v31 = vsel %vm7586_vm14, %v1536_v38, %v1454_v60  ;;  %v1570_v63 = vsel %vm7607_vm15, %v1537_v62, %v1456_v7  ;;  %vm7612_vm15 = vmmov %vm7586_vm14  ;;  %vm5678_vm7 = vcmp.gt.s32.totalorder %v639_v36, 0  ;;  %v967_v36 = vrot.slane %v5400_v26, 7 }
  0xf7   : > { %4491 = vmatprep.mubr.msk.f32.mxu0 %vm7471_vm0, %v1569_v31  ;;  %v7618_v31 = vmov 0 }
  0xf8   : > { %4492 = vmatmul.mubr.msk.f32.gmra.mxu0 %vm7471_vm0, %v1570_v63  ;;  %v7619_v31 = vsel %vm5678_vm7, 4294967295, %v7618_v31 }
  0xf9   : > { %v1330_v24 = vpop.permute.xlu0 %1329  ;;  %v1332_v27 = vpop.permute.xlu1 %1331  ;;  %7620 = vst [vmem:[#allocation25_spill] sm:$0xff] %v7619_v31 }
  0xfa   : > { %v1538_v6 = vsel %vm7611_vm13, %v1088_v51, %v1330_v24  ;;  %v1539_v58 = vsel %vm7585_vm11, %v5310_v0, %v1332_v27  ;;  %v1090_v0 = vsel %vm5663_vm8, %v5331_v33, 0.0  ;;  %vm7616_vm13 = vmmov %vm7585_vm11  ;;  %v485_v33 = vadd.s32 176, %v5037_v1 }
  0xfb   : > { %v965_v27 = vrot.slane %v5377_v4, 7  ;;  %v7626_v4 = vrot.slane %v5347_v39, 7 }
  0xfc   : > { %v653_v24 = vand.u32 15, %v485_v33  ;;  %v7634_v33 = vmov 0 }
  0xfd   : > { %v1458_v19 = vpop.permute.xlu0 %1457  ;;  %v1460_v21 = vpop.permute.xlu1 %1459 }
  0xfe   : > { %v1571_v3 = vsel %vm7586_vm14, %v1538_v6, %v1458_v19  ;;  %v1572_v11 = vsel %vm7612_vm15, %v1539_v58, %v1460_v21  ;;  %vm7617_vm15 = vmmov %vm7586_vm14  ;;  %v966_v19 = vrot.slane %v5397_v23, 7  ;;  %vm5695_vm8 = vcmp.gt.s32.totalorder %v653_v24, 0 }
  0xff   : > { %4494 = vmatprep.mubr.msk.f32.mxu0 %vm7471_vm0, %v1571_v3 }
 0x100   : > { %4495 = vmatmul.mubr.msk.f32.gmra.mxu0 %vm7471_vm0, %v1572_v11 }
 0x101   : > { %v1334_v48 = vpop.permute.xlu0 %1333  ;;  %v1336_v9 = vpop.permute.xlu1 %1335 }
 0x102   : > { %v1540_v49 = vsel %vm7616_vm13, %v1090_v0, %v1334_v48  ;;  %v1541_v5 = vsel %vm7585_vm11, %v5335_v30, %v1336_v9  ;;  %v1092_v30 = vsel %vm5678_vm7, %v5359_v59, 0.0  ;;  %vm7621_vm13 = vmmov %vm7585_vm11  ;;  %v7623_v59 = vmov 0 }
 0x103   : > { %v7624_v59 = vsel %vm5695_vm8, 4294967295, %v7623_v59  ;;  %vm7633_vm7 = vcmask 293888  }
 0x104   : > { %7625 = vst [vmem:[#allocation26_spill] sm:$0xff] %v7624_v59 }
 0x105   : > { %v1462_v38 = vpop.permute.xlu0 %1461  ;;  %v1464_v62 = vpop.permute.xlu1 %1463 }
 0x106   : > { %v1573_v60 = vsel %vm7586_vm14, %v1540_v49, %v1462_v38  ;;  %v1574_v7 = vsel %vm7617_vm15, %v1541_v5, %v1464_v62  ;;  %vm7622_vm15 = vmmov %vm7586_vm14  ;;  %v968_v62 = vrot.slane %v5421_v47, 7 }
 0x107   : > { %4497 = vmatprep.mubr.msk.f32.mxu0 %vm7471_vm0, %v1573_v60 }
 0x108   : > { %4498 = vmatmul.mubr.msk.f32.gmra.mxu0 %vm7471_vm0, %v1574_v7 }
 0x109   : > { %v1338_v63 = vpop.permute.xlu0 %1337  ;;  %v1340_v50 = vpop.permute.xlu1 %1339 }
 0x10a   : > { %v1542_v51 = vsel %vm7621_vm13, %v1092_v30, %v1338_v63  ;;  %v1543_v44 = vsel %vm7585_vm11, %v5365_v56, %v1340_v50  ;;  %vm7627_vm13 = vcmp.lt.s32.totalorder %v5037_v1, 1  ;;  %v487_v56 = vadd.s32 192, %v5037_v1 }
 0x10b   : > { %v985_v11 = vsel %vm7627_vm13, %v7626_v4, %v965_v27  ;;  %vm7628_vm11 = vmmov %vm7627_vm13  ;;  %vm7631_vm13 = vcmask 195584   ;;  %v489_v63 = vadd.s32 208, %v5037_v1 }
 0x10c   : > { %v1094_v48 = vsel %vm5695_vm8, %v985_v11, 0.0  ;;  %v984_v9 = vsel %vm7628_vm11, %v965_v27, %v966_v19  ;;  %v667_v0 = vand.u32 15, %v487_v56  ;;  %v983_v26 = vsel %vm7628_vm11, %v966_v19, %v967_v36 }
 0x10d   : > { %v1466_v6 = vpop.permute.xlu0 %1465  ;;  %v1468_v58 = vpop.permute.xlu1 %1467  ;;  %v681_v27 = vand.u32 15, %v489_v63  ;;  %v7642_v11 = vmov 0  ;;  %v491_v56 = vadd.s32 224, %v5037_v1 }
 0x10e   : > { %v1575_v21 = vsel %vm7586_vm14, %v1542_v51, %v1466_v6  ;;  %v1576_v3 = vsel %vm7622_vm15, %v1543_v44, %v1468_v58  ;;  %vm7629_vm14 = vcmask 97280   ;;  %vm5716_vm8 = vcmp.gt.s32.totalorder %v667_v0, 0 }
 0x10f   : > { %4500 = vmatprep.mubr.msk.f32.mxu0 %vm7471_vm0, %v1575_v21  ;;  %vm7630_vm15 = vmmov %vm7629_vm14  ;;  %v7635_v33 = vsel %vm5716_vm8, 4294967295, %v7634_v33  ;;  %v1096_v47 = vsel %vm5716_vm8, %v983_v26, 0.0  ;;  %v969_v51 = vrot.slane %v5424_v53, 7  ;;  %v970_v21 = vrot.slane %v5446_v22, 7 }
 0x110   : > { %4501 = vmatmul.mubr.msk.f32.gmra.mxu0 %vm7471_vm0, %v1576_v3  ;;  %vm7632_vm0 = vmmov %vm7631_vm13  ;;  %7636 = vst [vmem:[#allocation27_spill] sm:$0xff] %v7635_v33  ;;  %vm5735_vm8 = vcmp.gt.s32.totalorder %v681_v27, 0  ;;  %v971_v0 = vrot.slane %v5449_v18, 7  ;;  %v493_v26 = vadd.s32 240, %v5037_v1 }
 0x111   : > { %v1342_v23 = vpop.permute.xlu0 %1341  ;;  %v1344_v12 = vpop.permute.xlu1 %1343  ;;  %v7643_v11 = vsel %vm5735_vm8, 4294967295, %v7642_v11 }
 0x112   : > { %v1544_v39 = vsel %vm7629_vm14, %v1094_v48, %v1342_v23  ;;  %v1545_v49 = vsel %vm7630_vm15, %v984_v9, %v1344_v12  ;;  %vm7637_vm14 = vmmov %vm7633_vm7  ;;  %7644 = vst [vmem:[#allocation28_spill] sm:$0xff] %v7643_v11  ;;  %v695_v9 = vand.u32 15, %v491_v56  ;;  %v7664_v56 = vrot.slane %v5181_v2, 7  ;;  %v2325_v2 = vld [vmem:[%s7416_s3 + $0x78] sm:$0xff] }
 0x115   : > { %v1470_v5 = vpop.permute.xlu0 %1469  ;;  %v1472_v38 = vpop.permute.xlu1 %1471 }
 0x116   : > { %v1577_v60 = vsel %vm7631_vm13, %v1544_v39, %v1470_v5  ;;  %v1578_v7 = vsel %vm7632_vm0, %v1545_v49, %v1472_v38  ;;  %vm7638_vm0 = vmmov %vm7628_vm11  ;;  %v972_v38 = vrot.slane %v5471_v54, 7 }
 0x117   : > { %4503 = vmatprep.mubr.msk.f32.mxu0 %vm7633_vm7, %v1577_v60  ;;  %v982_v24 = vsel %vm7638_vm0, %v967_v36, %v968_v62  ;;  %vm7639_vm7 = vmmov %vm7630_vm15  ;;  %v981_v53 = vsel %vm7638_vm0, %v968_v62, %v969_v51 }
 0x118   : > { %4504 = vmatmul.mubr.msk.f32.gmra.mxu0 %vm7637_vm14, %v1578_v7  ;;  %vm7640_vm15 = vmmov %vm7639_vm7  ;;  %v1098_v22 = vsel %vm5735_vm8, %v981_v53, 0.0  ;;  %vm5754_vm8 = vcmp.gt.s32.totalorder %v695_v9, 0  ;;  %v7651_v7 = vmov 0 }
 0x119   : > { %v1346_v50 = vpop.permute.xlu0 %1345  ;;  %v1348_v30 = vpop.permute.xlu1 %1347  ;;  %vm7641_vm11 = vmmov %vm7631_vm13  ;;  %v7652_v7 = vsel %vm5754_vm8, 4294967295, %v7651_v7 }
 0x11a   : > { %v1546_v44 = vsel %vm7639_vm7, %v1096_v47, %v1346_v50  ;;  %v1547_v6 = vsel %vm7640_vm15, %v982_v24, %v1348_v30  ;;  %vm7645_vm7 = vmmov %vm7637_vm14  ;;  %7653 = vst [vmem:[#allocation29_spill] sm:$0xff] %v7652_v7  ;;  %v709_v47 = vand.u32 15, %v493_v26  ;;  %v973_v24 = vrot.slane %v5474_v57, 7  ;;  %v2318_v26 = vld [vmem:[%s7416_s3 + $0x40] sm:$0xff] }
 0x11b   : > { %vm7646_vm15 = vmmov %vm7638_vm0 }
 0x11c   : > { %v980_v48 = vsel %vm7646_vm15, %v969_v51, %v970_v21  ;;  %v979_v18 = vsel %vm7646_vm15, %v970_v21, %v971_v0  ;;  %vm5772_vm9 = vcmp.gt.s32.totalorder %v709_v47, 0  ;;  %v7660_v21 = vmov 0  ;;  %v2313_v47 = vld [vmem:[%s7416_s3 + $0x18] sm:$0xff] }
 0x11d   : > { %v1474_v58 = vpop.permute.xlu0 %1473  ;;  %v1476_v19 = vpop.permute.xlu1 %1475  ;;  %v1100_v54 = vsel %vm5754_vm8, %v979_v18, 0.0  ;;  %v7661_v21 = vsel %vm5772_vm9, 4294967295, %v7660_v21  ;;  %v2319_v18 = vld [vmem:[%s7416_s3 + $0x48] sm:$0xff] }
 0x11e   : > { %v1579_v3 = vsel %vm7631_vm13, %v1546_v44, %v1474_v58  ;;  %v1580_v4 = vsel %vm7641_vm11, %v1547_v6, %v1476_v19  ;;  %vm7647_vm13 = vcmask 97280   ;;  %7662 = vst [vmem:[#allocation30_spill] sm:$0xff] %v7661_v21 }
 0x11f   : > { %4506 = vmatprep.mubr.msk.f32.mxu0 %vm7637_vm14, %v1579_v3  ;;  %vm7648_vm11 = vmmov %vm7647_vm13  ;;  %vm7649_vm14 = vcmask 195584  }
 0x120   : > { %4507 = vmatmul.mubr.msk.f32.gmra.mxu0 %vm7645_vm7, %v1580_v4  ;;  %vm7650_vm0 = vmmov %vm7649_vm14 }
 0x121   : > { %v1350_v23 = vpop.permute.xlu0 %1349  ;;  %v1352_v12 = vpop.permute.xlu1 %1351 }
 0x122   : > { %v1548_v36 = vsel %vm7647_vm13, %v1098_v22, %v1350_v23  ;;  %v1549_v39 = vsel %vm7648_vm11, %v980_v48, %v1352_v12  ;;  %vm7654_vm13 = vmmov %vm7645_vm7 }
 0x123   : > { %vm7655_vm11 = vmmov %vm7646_vm15 }
 0x124   : > { %v978_v30 = vsel %vm7655_vm11, %v971_v0, %v972_v38  ;;  %v977_v3 = vsel %vm7655_vm11, %v972_v38, %v973_v24  ;;  %vm7663_vm8 = vmmov %vm7654_vm13  ;;  %v2322_v38 = vld [vmem:[%s7416_s3 + $0x60] sm:$0xff] }
 0x125   : > { %v1478_v49 = vpop.permute.xlu0 %1477  ;;  %v1480_v5 = vpop.permute.xlu1 %1479  ;;  %v1102_v53 = vsel %vm5772_vm9, %v977_v3, 0.0  ;;  %v2329_v3 = vld [vmem:[%s7416_s3 + $0x98] sm:$0xff] }
 0x126   : > { %v1581_v62 = vsel %vm7649_vm14, %v1548_v36, %v1478_v49  ;;  %v1582_v60 = vsel %vm7650_vm0, %v1549_v39, %v1480_v5  ;;  %vm7656_vm14 = vcmask 97280   ;;  %v7484_v39 = vmov 0.0   ;;  %v2324_v49 = vld [vmem:[%s7416_s3 + $0x70] sm:$0xff]  ;;  %v2323_v5 = vld [vmem:[%s7416_s3 + $0x68] sm:$0xff] }
 0x127   : > { %4509 = vmatprep.mubr.msk.f32.mxu0 %vm7645_vm7, %v1581_v62  ;;  %vm7657_vm0 = vmmov %vm7656_vm14  ;;  %vm7658_vm7 = vcmask 195584   ;;  %2437 = vmatprep.subr.mxu1 %v7484_v39  ;;  %v2321_v62 = vld [vmem:[%s7416_s3 + $0x58] sm:$0xff] }
 0x128   : > { %4510 = vmatmul.mubr.msk.f32.gmra.mxu0 %vm7654_vm13, %v1582_v60  ;;  %vm7659_vm15 = vmmov %vm7658_vm7  ;;  %2438 = vmatpush1.msra.mxu1 %v2325_v2  ;;  %v2320_v60 = vld [vmem:[%s7416_s3 + $0x50] sm:$0xff] }
 0x129   : > { %v1354_v63 = vpop.permute.xlu0 %1353  ;;  %v1356_v50 = vpop.permute.xlu1 %1355  ;;  %2439 = vmatprep.subr.mxu1 %v7484_v39 }
 0x12a   : > { %v1550_v27 = vsel %vm7656_vm14, %v1100_v54, %v1354_v63  ;;  %v1551_v51 = vsel %vm7657_vm0, %v978_v30, %v1356_v50  ;;  %vm7665_vm14 = vmmov %vm7655_vm11  ;;  %2440 = vmatpush1.msra.mxu1 %v2324_v49  ;;  %v2317_v63 = vld [vmem:[%s7416_s3 + $0x38] sm:$0xff]  ;;  %v2316_v50 = vld [vmem:[%s7416_s3 + $0x30] sm:$0xff] }
 0x12b   : > { %v976_v23 = vsel %vm7665_vm14, %v973_v24, %v7664_v56  ;;  %vm7668_vm11 = vmmov %vm7663_vm8  ;;  %2441 = vmatprep.subr.mxu1 %v7484_v39  ;;  %v2315_v54 = vld [vmem:[%s7416_s3 + $0x28] sm:$0xff]  ;;  %v2314_v30 = vld [vmem:[%s7416_s3 + $0x20] sm:$0xff]  ;;  %vm2277_vm14 = vcmask 523264  }
 0x12c   : > { %2442 = vmatpush1.msra.mxu1 %v2323_v5  ;;  %v2312_v24 = vld [vmem:[%s7416_s3 + $0x10] sm:$0xff]  ;;  %v5887_v56 = vld [vmem:[#allocation5] ss:$0 sm:$0xff] }
 0x12d   : > { %v1482_v44 = vpop.permute.xlu0 %1481  ;;  %v1484_v6 = vpop.permute.xlu1 %1483  ;;  %2443 = vmatprep.subr.mxu1 %v7484_v39 }
 0x12e   : > { %v1583_v58 = vsel %vm7658_vm7, %v1550_v27, %v1482_v44  ;;  %v1584_v19 = vsel %vm7659_vm15, %v1551_v51, %v1484_v6  ;;  %vm7666_vm7 = vmmov %vm7657_vm0  ;;  %2444 = vmatpush1.msra.mxu1 %v2322_v38  ;;  %v2311_v27 = vld [vmem:[%s7416_s3 + $0x8] sm:$0xff]  ;;  %v2310_v51 = vld [vmem:[%s7416_s3] sm:$0xff] }
 0x12f   : > { %4512 = vmatprep.mubr.msk.f32.mxu0 %vm7654_vm13, %v1583_v58  ;;  %vm7667_vm13 = vmmov %vm7659_vm15  ;;  %2445 = vmatprep.subr.mxu1 %v7484_v39  ;;  %v2333_v44 = vld [vmem:[%s7416_s3 + $0xb8] sm:$0xff]  ;;  %v2332_v6 = vld [vmem:[%s7416_s3 + $0xb0] sm:$0xff] }
 0x130   : > { %4513 = vmatmul.mubr.msk.f32.gmra.mxu0 %vm7663_vm8, %v1584_v19  ;;  %2446 = vmatpush1.msra.mxu1 %v2321_v62  ;;  %v2331_v58 = vld [vmem:[%s7416_s3 + $0xa8] sm:$0xff]  ;;  %v2330_v19 = vld [vmem:[%s7416_s3 + $0xa0] sm:$0xff] }
 0x131   : > { %v1358_v57 = vpop.permute.xlu0 %1357  ;;  %v1360_v4 = vpop.permute.xlu1 %1359  ;;  %2447 = vmatprep.subr.mxu1 %v7484_v39 }
 0x132   : > { %v1552_v12 = vsel %vm7657_vm0, %v1102_v53, %v1358_v57  ;;  %v1553_v22 = vsel %vm7666_vm7, %v976_v23, %v1360_v4  ;;  %2448 = vmatpush1.msra.mxu1 %v2320_v60  ;;  %v2328_v57 = vld [vmem:[%s7416_s3 + $0x90] sm:$0xff]  ;;  %v2327_v4 = vld [vmem:[%s7416_s3 + $0x88] sm:$0xff]  ;;  %v2326_v53 = vld [vmem:[%s7416_s3 + $0x80] sm:$0xff]  ;;  %vm7669_vm0 = vcmp.lt.s32.totalorder %v5037_v1, 7  ;;  %vm7670_vm7 = vcmp.lt.s32.totalorder %v5037_v1, 1 }
 0x133   : > { %2449 = vmatprep.subr.mxu1 %v7484_v39 }
 0x134   : > { %2450 = vmatpush1.msra.mxu1 %v2319_v18 }
 0x135   : > { %v1486_v48 = vpop.permute.xlu0 %1485  ;;  %v1488_v9 = vpop.permute.xlu1 %1487  ;;  %2451 = vmatprep.subr.mxu1 %v7484_v39 }
 0x136   : > { %v1585_v0 = vsel %vm7659_vm15, %v1552_v12, %v1486_v48  ;;  %v1586_v36 = vsel %vm7667_vm13, %v1553_v22, %v1488_v9  ;;  %2452 = vmatpush1.msra.mxu1 %v2318_v26  ;;  %vm7671_vm15 = vmmov %vm7669_vm0 }
 0x137   : > { %4515 = vmatprep.mubr.msk.f32.mxu0 %vm7663_vm8, %v1585_v0  ;;  %2453 = vmatprep.subr.mxu1 %v7484_v39  ;;  %vm7672_vm13 = vmmov %vm7669_vm0 }
 0x138   : > { %4516 = vmatmul.mubr.msk.f32.gmra.mxu0 %vm7668_vm11, %v1586_v36  ;;  %2454 = vmatpush1.msra.mxu1 %v2317_v63  ;;  %vm7673_vm8 = vmmov %vm7670_vm7 }
 0x139   : > { %2455 = vmatprep.subr.mxu1 %v7484_v39  ;;  %vm7674_vm11 = vmmov %vm7670_vm7 }
 0x13a   : > { %2456 = vmatpush1.msra.mxu1 %v2316_v50 }
 0x13b   : > { %2457 = vmatprep.subr.mxu1 %v7484_v39 }
 0x13c   : > { %2458 = vmatpush1.msra.mxu1 %v2315_v54 }
 0x13d   : > { %2459 = vmatprep.subr.mxu1 %v7484_v39 }
 0x13e   : > { %2460 = vmatpush1.msra.mxu1 %v2314_v30 }
 0x13f   : > { %2461 = vmatprep.subr.mxu1 %v7484_v39 }
 0x140   : > { %2462 = vmatpush1.msra.mxu1 %v2313_v47 }
 0x141   : > { %2463 = vmatprep.subr.mxu1 %v7484_v39 }
 0x142   : > { %2464 = vmatpush1.msra.mxu1 %v2312_v24 }
 0x143   : > { %2465 = vmatprep.subr.mxu1 %v7484_v39 }
 0x144   : > { %2466 = vmatpush1.msra.mxu1 %v2311_v27 }
 0x145   : > { %2467 = vmatprep.subr.mxu1 %v7484_v39 }
 0x146   : > { %2468 = vmatpush1.msra.mxu1 %v2310_v51 }
 0x147   : > { %2485 = vmatprep.subr.mxu1 %v7484_v39 }
 0x148   : > { %2486 = vmatpush2.msra.mxu1 %v2333_v44 }
 0x149   : > { %2487 = vmatprep.subr.mxu1 %v7484_v39 }
 0x14a   : > { %2488 = vmatpush2.msra.mxu1 %v2332_v6 }
 0x14b   : > { %2489 = vmatprep.subr.mxu1 %v7484_v39 }
 0x14c   : > { %2490 = vmatpush2.msra.mxu1 %v2331_v58 }
 0x14d   : > { %2491 = vmatprep.subr.mxu1 %v7484_v39 }
 0x14e   : > { %2492 = vmatpush2.msra.mxu1 %v2330_v19 }
 0x14f   : > { %2493 = vmatprep.subr.mxu1 %v7484_v39 }
 0x150   : > { %2494 = vmatpush2.msra.mxu1 %v2329_v3 }
 0x151   : > { %2495 = vmatprep.subr.mxu1 %v7484_v39 }
 0x152   : > { %2496 = vmatpush2.msra.mxu1 %v2328_v57 }
 0x153   : > { %2497 = vmatprep.subr.mxu1 %v7484_v39 }
 0x154   : > { %2498 = vmatpush2.msra.mxu1 %v2327_v4 }
 0x155   : > { %2499 = vmatprep.subr.mxu1 %v7484_v39 }
 0x156   : > { %2500 = vmatpush2.msra.mxu1 %v2326_v53 }
 0x184   : > { %v4472_v23 = vpop.f32.mrf.mxu0 }
 0x185   : > { %v1772_v12 = vadd.f32 %v4472_v23, %v5887_v56 }
 0x186   : > { %v1766_v22 = vpop.f32.mrf.mxu0 }
 0x187   : > { %v1926_v48 = vmax.f32 %v1772_v12, 0.0  ;;  %v1767_v9 = vadd.f32 %v5887_v56, %v1766_v22 }
 0x188   : > { %v4475_v0 = vpop.f32.mrf.mxu0 }
 0x189   : > { %v5891_v36 = vmax.f32 %v1767_v9, 0.0  ;;  %2183 = vrot.lane.b32.xlu1 %v1926_v48, %s4868_s26  ;;  %v1782_v2 = vadd.f32 %v4475_v0, %v5887_v56  ;;  %v2054_v5 = vrot.slane %v1926_v48, 1  ;;  %v1958_v26 = vrot.slane %v1926_v48, 7 }
 0x18a   : > { %v1776_v49 = vpop.f32.mrf.mxu0 }
 0x18b   : > { %v7487_v38 = vrot.slane %v5891_v36, 7  ;;  %v1928_v62 = vmax.f32 %v1782_v2, 0.0  ;;  %v1777_v60 = vadd.f32 %v5887_v56, %v1776_v49  ;;  %2181 = vrot.lane.b32.xlu0 %v5891_v36, %s4868_s26  ;;  %v7486_v18 = vrot.slane %v5891_v36, 1 }
 0x18d   : > { %v1927_v63 = vmax.f32 %v1777_v60, 0.0  ;;  %2187 = vrot.lane.b32.xlu1 %v1928_v62, %s4868_s26  ;;  %v2115_v50 = vsel %vm7669_vm0, %v7486_v18, %v2054_v5  ;;  %v5910_v54 = vsel %vm7670_vm7, %v7487_v38, %v1958_v26  ;;  %v2056_v30 = vrot.slane %v1928_v62, 1  ;;  %vm7675_vm7 = vmmov %vm7669_vm0 }
 0x18e   : > { %4303 = vmatprep.mubr.msk.f32.mxu1 %vm2277_vm14, %v2115_v50  ;;  %v1960_v27 = vrot.slane %v1928_v62, 7 }
 0x18f   : > { %v1959_v47 = vrot.slane %v1927_v63, 7  ;;  %v2055_v24 = vrot.slane %v1927_v63, 1  ;;  %2185 = vrot.lane.b32.xlu0 %v1927_v63, %s4868_s26 }
 0x190   : > { %v4478_v51 = vpop.f32.mrf.mxu0 }
 0x191   : > { %v1792_v44 = vadd.f32 %v4478_v51, %v5887_v56  ;;  %v5916_v6 = vsel %vm7671_vm15, %v2054_v5, %v2055_v24  ;;  %v5920_v58 = vsel %vm7672_vm13, %v2055_v24, %v2056_v30  ;;  %v5924_v19 = vsel %vm7673_vm8, %v1958_v26, %v1959_v47  ;;  %vm7676_vm15 = vmmov %vm7673_vm8 }
 0x192   : > { %v1786_v3 = vpop.f32.mrf.mxu0  ;;  %v5928_v57 = vsel %vm7674_vm11, %v1959_v47, %v1960_v27  ;;  %vm7677_vm13 = vmmov %vm7673_vm8 }
 0x193   : > { %v1930_v4 = vmax.f32 %v1792_v44, 0.0  ;;  %v1787_v53 = vadd.f32 %v5887_v56, %v1786_v3  ;;  %vm7678_vm8 = vmmov %vm7669_vm0 }
 0x194   : > { %vm7679_vm11 = vmmov %vm7669_vm0 }
 0x195   : > { %v1929_v23 = vmax.f32 %v1787_v53, 0.0  ;;  %2191 = vrot.lane.b32.xlu1 %v1930_v4, %s4868_s26  ;;  %v2058_v12 = vrot.slane %v1930_v4, 1  ;;  %v1962_v9 = vrot.slane %v1930_v4, 7 }
 0x197   : > { %v1961_v22 = vrot.slane %v1929_v23, 7  ;;  %v2057_v48 = vrot.slane %v1929_v23, 1  ;;  %2189 = vrot.lane.b32.xlu0 %v1929_v23, %s4868_s26 }
 0x198   : > { %v4481_v0 = vpop.f32.mrf.mxu0 }
 0x199   : > { %v1802_v2 = vadd.f32 %v4481_v0, %v5887_v56  ;;  %v5936_v49 = vsel %vm7669_vm0, %v2056_v30, %v2057_v48  ;;  %v5940_v5 = vsel %vm7675_vm7, %v2057_v48, %v2058_v12  ;;  %v5944_v62 = vsel %vm7676_vm15, %v1960_v27, %v1961_v22  ;;  %vm7680_vm0 = vmmov %vm7677_vm13 }
 0x19a   : > { %v1796_v60 = vpop.f32.mrf.mxu0  ;;  %v5948_v26 = vsel %vm7677_vm13, %v1961_v22, %v1962_v9  ;;  %vm7681_vm7 = vmmov %vm7680_vm0 }
 0x19b   : > { %v1932_v63 = vmax.f32 %v1802_v2, 0.0  ;;  %v1797_v50 = vadd.f32 %v5887_v56, %v1796_v60  ;;  %vm7682_vm15 = vmmov %vm7678_vm8 }
 0x19c   : > { %vm7683_vm13 = vmmov %vm7678_vm8 }
 0x19d   : > { %v1931_v47 = vmax.f32 %v1797_v50, 0.0  ;;  %2195 = vrot.lane.b32.xlu1 %v1932_v63, %s4868_s26  ;;  %v2060_v30 = vrot.slane %v1932_v63, 1  ;;  %v1964_v44 = vrot.slane %v1932_v63, 7 }
 0x19f   : > { %v1963_v24 = vrot.slane %v1931_v47, 7  ;;  %v2059_v51 = vrot.slane %v1931_v47, 1  ;;  %2193 = vrot.lane.b32.xlu0 %v1931_v47, %s4868_s26 }
 0x1a0   : > { %v4484_v3 = vpop.f32.mrf.mxu0 }
 0x1a1   : > { %v1812_v27 = vadd.f32 %v4484_v3, %v5887_v56  ;;  %v5956_v4 = vsel %vm7678_vm8, %v2058_v12, %v2059_v51  ;;  %v5960_v53 = vsel %vm7679_vm11, %v2059_v51, %v2060_v30  ;;  %v5964_v23 = vsel %vm7680_vm0, %v1962_v9, %v1963_v24  ;;  %vm7684_vm8 = vmmov %vm7680_vm0 }
 0x1a2   : > { %v1806_v22 = vpop.f32.mrf.mxu0  ;;  %v5968_v48 = vsel %vm7681_vm7, %v1963_v24, %v1964_v44  ;;  %vm7685_vm11 = vmmov %vm7680_vm0 }
 0x1a3   : > { %v1934_v0 = vmax.f32 %v1812_v27, 0.0  ;;  %v1807_v2 = vadd.f32 %v5887_v56, %v1806_v22  ;;  %vm7686_vm0 = vmmov %vm7683_vm13 }
 0x1a4   : > { %vm7687_vm7 = vmmov %vm7686_vm0 }
 0x1a5   : > { %v1933_v60 = vmax.f32 %v1807_v2, 0.0  ;;  %2199 = vrot.lane.b32.xlu1 %v1934_v0, %s4868_s26  ;;  %v2062_v12 = vrot.slane %v1934_v0, 1  ;;  %v1966_v47 = vrot.slane %v1934_v0, 7 }
 0x1a7   : > { %v1965_v63 = vrot.slane %v1933_v60, 7  ;;  %v2061_v50 = vrot.slane %v1933_v60, 1  ;;  %2197 = vrot.lane.b32.xlu0 %v1933_v60, %s4868_s26 }
 0x1a8   : > { %v4487_v51 = vpop.f32.mrf.mxu0 }
 0x1a9   : > { %v1822_v9 = vadd.f32 %v4487_v51, %v5887_v56  ;;  %v5976_v3 = vsel %vm7682_vm15, %v2060_v30, %v2061_v50  ;;  %v5980_v24 = vsel %vm7683_vm13, %v2061_v50, %v2062_v12  ;;  %v5984_v27 = vsel %vm7684_vm8, %v1964_v44, %v1965_v63  ;;  %vm7688_vm15 = vmmov %vm7684_vm8 }
 0x1aa   : > { %v1816_v22 = vpop.f32.mrf.mxu0  ;;  %v5988_v2 = vsel %vm7685_vm11, %v1965_v63, %v1966_v47  ;;  %vm7689_vm13 = vmmov %vm7684_vm8 }
 0x1ab   : > { %v1936_v0 = vmax.f32 %v1822_v9, 0.0  ;;  %v1817_v60 = vadd.f32 %v5887_v56, %v1816_v22  ;;  %vm7690_vm8 = vmmov %vm7686_vm0 }
 0x1ac   : > { %vm7691_vm11 = vmmov %vm7686_vm0 }
 0x1ad   : > { %v1935_v51 = vmax.f32 %v1817_v60, 0.0  ;;  %2203 = vrot.lane.b32.xlu1 %v1936_v0, %s4868_s26  ;;  %v2064_v30 = vrot.slane %v1936_v0, 1  ;;  %v1968_v50 = vrot.slane %v1936_v0, 7 }
 0x1af   : > { %v1967_v39 = vrot.slane %v1935_v51, 7  ;;  %v2063_v18 = vrot.slane %v1935_v51, 1  ;;  %2201 = vrot.lane.b32.xlu0 %v1935_v51, %s4868_s26 }
 0x1b0   : > { %v4490_v38 = vpop.f32.mrf.mxu0 }
 0x1b1   : > { %v1832_v44 = vadd.f32 %v4490_v38, %v5887_v56  ;;  %v5996_v15 = vsel %vm7686_vm0, %v2062_v12, %v2063_v18  ;;  %v6000_v63 = vsel %vm7687_vm7, %v2063_v18, %v2064_v30  ;;  %v6004_v9 = vsel %vm7688_vm15, %v1966_v47, %v1967_v39  ;;  %vm7692_vm0 = vmmov %vm7689_vm13 }
 0x1b2   : > { %v1826_v22 = vpop.f32.mrf.mxu0  ;;  %v6008_v60 = vsel %vm7689_vm13, %v1967_v39, %v1968_v50  ;;  %vm7693_vm7 = vmmov %vm7692_vm0 }
 0x1b3   : > { %v1938_v0 = vmax.f32 %v1832_v44, 0.0  ;;  %v1827_v38 = vadd.f32 %v5887_v56, %v1826_v22  ;;  %vm7694_vm15 = vmmov %vm7690_vm8 }
 0x1b4   : > { %vm7695_vm13 = vmmov %vm7690_vm8 }
 0x1b5   : > { %v1937_v51 = vmax.f32 %v1827_v38, 0.0  ;;  %2207 = vrot.lane.b32.xlu1 %v1938_v0, %s4868_s26  ;;  %v2066_v12 = vrot.slane %v1938_v0, 1  ;;  %v1970_v18 = vrot.slane %v1938_v0, 7 }
 0x1b7   : > { %v1969_v21 = vrot.slane %v1937_v51, 7  ;;  %v2065_v41 = vrot.slane %v1937_v51, 1  ;;  %2205 = vrot.lane.b32.xlu0 %v1937_v51, %s4868_s26 }
 0x1b8   : > { %v4493_v7 = vpop.f32.mrf.mxu0 }
 0x1b9   : > { %v1842_v47 = vadd.f32 %v4493_v7, %v5887_v56  ;;  %v6016_v11 = vsel %vm7690_vm8, %v2064_v30, %v2065_v41  ;;  %v6020_v39 = vsel %vm7691_vm11, %v2065_v41, %v2066_v12  ;;  %v6024_v44 = vsel %vm7692_vm0, %v1968_v50, %v1969_v21  ;;  %vm7696_vm8 = vmmov %vm7692_vm0 }
 0x1ba   : > { %v1836_v22 = vpop.f32.mrf.mxu0  ;;  %v6028_v38 = vsel %vm7693_vm7, %v1969_v21, %v1970_v18  ;;  %vm7697_vm11 = vmmov %vm7692_vm0 }
 0x1bb   : > { %v1940_v0 = vmax.f32 %v1842_v47, 0.0  ;;  %v1837_v7 = vadd.f32 %v5887_v56, %v1836_v22  ;;  %vm7699_vm0 = vmmov %vm7695_vm13 }
 0x1bc   : > { %vm7700_vm7 = vmmov %vm7699_vm0 }
 0x1bd   : > { %v1939_v51 = vmax.f32 %v1837_v7, 0.0  ;;  %2211 = vrot.lane.b32.xlu1 %v1940_v0, %s4868_s26  ;;  %v2068_v30 = vrot.slane %v1940_v0, 1  ;;  %v1972_v41 = vrot.slane %v1940_v0, 7 }
 0x1bf   : > { %v1971_v33 = vrot.slane %v1939_v51, 7  ;;  %v2067_v40 = vrot.slane %v1939_v51, 1  ;;  %2209 = vrot.lane.b32.xlu0 %v1939_v51, %s4868_s26 }
 0x1c0   : > { %v4496_v59 = vpop.f32.mrf.mxu0 }
 0x1c1   : > { %v1852_v50 = vadd.f32 %v4496_v59, %v5887_v56  ;;  %v6036_v10 = vsel %vm7694_vm15, %v2066_v12, %v2067_v40  ;;  %v6040_v21 = vsel %vm7695_vm13, %v2067_v40, %v2068_v30  ;;  %v6044_v47 = vsel %vm7696_vm8, %v1970_v18, %v1971_v33  ;;  %vm7702_vm15 = vmmov %vm7696_vm8 }
 0x1c2   : > { %v1846_v22 = vpop.f32.mrf.mxu0  ;;  %v6048_v7 = vsel %vm7697_vm11, %v1971_v33, %v1972_v41  ;;  %vm7704_vm13 = vmmov %vm7696_vm8 }
 0x1c3   : > { %7698 = vst [vmem:[#allocation31_spill] sm:$0xff] %v6048_v7  ;;  %v1942_v0 = vmax.f32 %v1852_v50, 0.0  ;;  %v1847_v59 = vadd.f32 %v5887_v56, %v1846_v22  ;;  %vm7706_vm8 = vmmov %vm7699_vm0 }
 0x1c4   : > { %vm7708_vm11 = vmmov %vm7699_vm0 }
 0x1c5   : > { %v1941_v51 = vmax.f32 %v1847_v59, 0.0  ;;  %2215 = vrot.lane.b32.xlu1 %v1942_v0, %s4868_s26  ;;  %v2070_v12 = vrot.slane %v1942_v0, 1  ;;  %v1974_v40 = vrot.slane %v1942_v0, 7 }
 0x1c7   : > { %v1973_v31 = vrot.slane %v1941_v51, 7  ;;  %v2069_v55 = vrot.slane %v1941_v51, 1  ;;  %2213 = vrot.lane.b32.xlu0 %v1941_v51, %s4868_s26 }
 0x1c8   : > { %v4499_v35 = vpop.f32.mrf.mxu0 }
 0x1c9   : > { %v1862_v18 = vadd.f32 %v4499_v35, %v5887_v56  ;;  %v6056_v34 = vsel %vm7699_vm0, %v2068_v30, %v2069_v55  ;;  %v6060_v33 = vsel %vm7700_vm7, %v2069_v55, %v2070_v12  ;;  %v6064_v50 = vsel %vm7702_vm15, %v1972_v41, %v1973_v31  ;;  %vm7710_vm0 = vmmov %vm7704_vm13 }
 0x1ca   : > { %7701 = vst [vmem:[#allocation32_spill] sm:$0xff] %v6060_v33  ;;  %7703 = vst [vmem:[#allocation33_spill] sm:$0xff] %v6064_v50  ;;  %v1856_v22 = vpop.f32.mrf.mxu0  ;;  %v6068_v59 = vsel %vm7704_vm13, %v1973_v31, %v1974_v40 }
 0x1cb   : > { %7705 = vst [vmem:[#allocation34_spill] sm:$0xff] %v6068_v59  ;;  %v1944_v0 = vmax.f32 %v1862_v18, 0.0  ;;  %v1857_v35 = vadd.f32 %v5887_v56, %v1856_v22  ;;  %vm7712_vm7 = vmmov %vm7710_vm0 }
 0x1cc   : > { %vm7714_vm15 = vmmov %vm7706_vm8 }
 0x1cd   : > { %v1943_v51 = vmax.f32 %v1857_v35, 0.0  ;;  %2219 = vrot.lane.b32.xlu1 %v1944_v0, %s4868_s26  ;;  %v2072_v30 = vrot.slane %v1944_v0, 1  ;;  %v1976_v55 = vrot.slane %v1944_v0, 7  ;;  %vm7716_vm13 = vmmov %vm7706_vm8 }
 0x1cf   : > { %v1975_v43 = vrot.slane %v1943_v51, 7  ;;  %v2071_v7 = vrot.slane %v1943_v51, 1  ;;  %2217 = vrot.lane.b32.xlu0 %v1943_v51, %s4868_s26 }
 0x1d0   : > { %v4502_v33 = vpop.f32.mrf.mxu0 }
 0x1d1   : > { %v1872_v41 = vadd.f32 %v4502_v33, %v5887_v56  ;;  %v6076_v50 = vsel %vm7706_vm8, %v2070_v12, %v2071_v7  ;;  %v6080_v31 = vsel %vm7708_vm11, %v2071_v7, %v2072_v30  ;;  %v6084_v18 = vsel %vm7710_vm0, %v1974_v40, %v1975_v43  ;;  %vm7718_vm8 = vmmov %vm7710_vm0 }
 0x1d2   : > { %7707 = vst [vmem:[#allocation35_spill] sm:$0xff] %v6076_v50  ;;  %7709 = vst [vmem:[#allocation36_spill] sm:$0xff] %v6080_v31  ;;  %v1866_v22 = vpop.f32.mrf.mxu0  ;;  %v6088_v35 = vsel %vm7712_vm7, %v1975_v43, %v1976_v55 }
 0x1d3   : > { %7711 = vst [vmem:[#allocation37_spill] sm:$0xff] %v6084_v18  ;;  %7713 = vst [vmem:[#allocation38_spill] sm:$0xff] %v6088_v35  ;;  %v1946_v0 = vmax.f32 %v1872_v41, 0.0  ;;  %v1867_v33 = vadd.f32 %v5887_v56, %v1866_v22 }
 0x1d4   : > { %vm7720_vm11 = vmmov %vm7710_vm0 }
 0x1d5   : > { %v1945_v51 = vmax.f32 %v1867_v33, 0.0  ;;  %2223 = vrot.lane.b32.xlu1 %v1946_v0, %s4868_s26  ;;  %v2074_v12 = vrot.slane %v1946_v0, 1  ;;  %v1978_v7 = vrot.slane %v1946_v0, 7  ;;  %vm7722_vm0 = vmmov %vm7716_vm13 }
 0x1d6   : > { %vm7724_vm7 = vmmov %vm7722_vm0 }
 0x1d7   : > { %v1977_v59 = vrot.slane %v1945_v51, 7  ;;  %v2073_v50 = vrot.slane %v1945_v51, 1  ;;  %2221 = vrot.lane.b32.xlu0 %v1945_v51, %s4868_s26 }
 0x1d8   : > { %v4505_v31 = vpop.f32.mrf.mxu0 }
 0x1d9   : > { %v1882_v40 = vadd.f32 %v4505_v31, %v5887_v56  ;;  %v6096_v18 = vsel %vm7714_vm15, %v2072_v30, %v2073_v50  ;;  %v6100_v43 = vsel %vm7716_vm13, %v2073_v50, %v2074_v12  ;;  %v6104_v41 = vsel %vm7718_vm8, %v1976_v55, %v1977_v59  ;;  %vm7726_vm15 = vmmov %vm7718_vm8 }
 0x1da   : > { %7715 = vst [vmem:[#allocation39_spill] sm:$0xff] %v6096_v18  ;;  %7717 = vst [vmem:[#allocation40_spill] sm:$0xff] %v6100_v43  ;;  %v1876_v22 = vpop.f32.mrf.mxu0  ;;  %v6108_v33 = vsel %vm7720_vm11, %v1977_v59, %v1978_v7 }
 0x1db   : > { %7719 = vst [vmem:[#allocation41_spill] sm:$0xff] %v6104_v41  ;;  %7721 = vst [vmem:[#allocation42_spill] sm:$0xff] %v6108_v33  ;;  %v1948_v0 = vmax.f32 %v1882_v40, 0.0  ;;  %v1877_v31 = vadd.f32 %v5887_v56, %v1876_v22 }
 0x1dc   : > { %vm7728_vm13 = vmmov %vm7718_vm8 }
 0x1dd   : > { %v1947_v51 = vmax.f32 %v1877_v31, 0.0  ;;  %2227 = vrot.lane.b32.xlu1 %v1948_v0, %s4868_s26  ;;  %v2076_v30 = vrot.slane %v1948_v0, 1  ;;  %v1980_v50 = vrot.slane %v1948_v0, 7  ;;  %vm7730_vm8 = vmmov %vm7722_vm0 }
 0x1de   : > { %vm7732_vm11 = vmmov %vm7722_vm0 }
 0x1df   : > { %v1979_v35 = vrot.slane %v1947_v51, 7  ;;  %v2075_v18 = vrot.slane %v1947_v51, 1  ;;  %2225 = vrot.lane.b32.xlu0 %v1947_v51, %s4868_s26 }
 0x1e0   : > { %v4508_v43 = vpop.f32.mrf.mxu0 }
 0x1e1   : > { %v1892_v55 = vadd.f32 %v4508_v43, %v5887_v56  ;;  %v6116_v41 = vsel %vm7722_vm0, %v2074_v12, %v2075_v18  ;;  %v6120_v59 = vsel %vm7724_vm7, %v2075_v18, %v2076_v30  ;;  %v6124_v40 = vsel %vm7726_vm15, %v1978_v7, %v1979_v35  ;;  %vm7734_vm0 = vmmov %vm7728_vm13 }
 0x1e2   : > { %7723 = vst [vmem:[#allocation43_spill] sm:$0xff] %v6116_v41  ;;  %7725 = vst [vmem:[#allocation44_spill] sm:$0xff] %v6120_v59  ;;  %v1886_v22 = vpop.f32.mrf.mxu0  ;;  %v6128_v31 = vsel %vm7728_vm13, %v1979_v35, %v1980_v50 }
 0x1e3   : > { %7727 = vst [vmem:[#allocation45_spill] sm:$0xff] %v6124_v40  ;;  %7729 = vst [vmem:[#allocation46_spill] sm:$0xff] %v6128_v31  ;;  %v1950_v0 = vmax.f32 %v1892_v55, 0.0  ;;  %v1887_v43 = vadd.f32 %v5887_v56, %v1886_v22 }
 0x1e4   : > { %vm7736_vm7 = vmmov %vm7734_vm0 }
 0x1e5   : > { %v1949_v51 = vmax.f32 %v1887_v43, 0.0  ;;  %2231 = vrot.lane.b32.xlu1 %v1950_v0, %s4868_s26  ;;  %v2078_v12 = vrot.slane %v1950_v0, 1  ;;  %v1982_v18 = vrot.slane %v1950_v0, 7  ;;  %vm7738_vm15 = vmmov %vm7730_vm8 }
 0x1e6   : > { %vm7740_vm13 = vmmov %vm7730_vm8 }
 0x1e7   : > { %v1981_v33 = vrot.slane %v1949_v51, 7  ;;  %v2077_v41 = vrot.slane %v1949_v51, 1  ;;  %2229 = vrot.lane.b32.xlu0 %v1949_v51, %s4868_s26 }
 0x1e8   : > { %v4511_v59 = vpop.f32.mrf.mxu0 }
 0x1e9   : > { %v1902_v7 = vadd.f32 %v4511_v59, %v5887_v56  ;;  %v6136_v40 = vsel %vm7730_vm8, %v2076_v30, %v2077_v41  ;;  %v6140_v35 = vsel %vm7732_vm11, %v2077_v41, %v2078_v12  ;;  %v6144_v55 = vsel %vm7734_vm0, %v1980_v50, %v1981_v33  ;;  %vm7742_vm8 = vmmov %vm7734_vm0 }
 0x1ea   : > { %7731 = vst [vmem:[#allocation47_spill] sm:$0xff] %v6136_v40  ;;  %7733 = vst [vmem:[#allocation48_spill] sm:$0xff] %v6140_v35  ;;  %v1896_v22 = vpop.f32.mrf.mxu0  ;;  %v6148_v43 = vsel %vm7736_vm7, %v1981_v33, %v1982_v18 }
 0x1eb   : > { %7735 = vst [vmem:[#allocation49_spill] sm:$0xff] %v6144_v55  ;;  %7737 = vst [vmem:[#allocation50_spill] sm:$0xff] %v6148_v43  ;;  %v1952_v0 = vmax.f32 %v1902_v7, 0.0  ;;  %v1897_v59 = vadd.f32 %v5887_v56, %v1896_v22 }
 0x1ec   : > { %vm7744_vm11 = vmmov %vm7734_vm0 }
 0x1ed   : > { %v1951_v51 = vmax.f32 %v1897_v59, 0.0  ;;  %2235 = vrot.lane.b32.xlu1 %v1952_v0, %s4868_s26  ;;  %v2080_v30 = vrot.slane %v1952_v0, 1  ;;  %v1984_v41 = vrot.slane %v1952_v0, 7  ;;  %vm7746_vm0 = vmmov %vm7740_vm13 }
 0x1ee   : > { %vm7747_vm7 = vmmov %vm7746_vm0 }
 0x1ef   : > { %v1983_v31 = vrot.slane %v1951_v51, 7  ;;  %v2079_v40 = vrot.slane %v1951_v51, 1  ;;  %2233 = vrot.lane.b32.xlu0 %v1951_v51, %s4868_s26 }
 0x1f0   : > { %v4514_v35 = vpop.f32.mrf.mxu0 }
 0x1f1   : > { %v1912_v50 = vadd.f32 %v4514_v35, %v5887_v56  ;;  %v6156_v55 = vsel %vm7738_vm15, %v2078_v12, %v2079_v40  ;;  %v6160_v33 = vsel %vm7740_vm13, %v2079_v40, %v2080_v30  ;;  %v6164_v7 = vsel %vm7742_vm8, %v1982_v18, %v1983_v31  ;;  %vm7749_vm15 = vmmov %vm7742_vm8 }
 0x1f2   : > { %7739 = vst [vmem:[#allocation51_spill] sm:$0xff] %v6156_v55  ;;  %7741 = vst [vmem:[#allocation52_spill] sm:$0xff] %v6160_v33  ;;  %v1906_v22 = vpop.f32.mrf.mxu0  ;;  %v6168_v59 = vsel %vm7744_vm11, %v1983_v31, %v1984_v41 }
 0x1f3   : > { %7743 = vst [vmem:[#allocation53_spill] sm:$0xff] %v6164_v7  ;;  %7745 = vst [vmem:[#allocation54_spill] sm:$0xff] %v6168_v59  ;;  %v1954_v0 = vmax.f32 %v1912_v50, 0.0  ;;  %v1907_v35 = vadd.f32 %v5887_v56, %v1906_v22 }
 0x1f4   : > { %vm7751_vm13 = vmmov %vm7742_vm8 }
 0x1f5   : > { %v1953_v51 = vmax.f32 %v1907_v35, 0.0  ;;  %2239 = vrot.lane.b32.xlu1 %v1954_v0, %s4868_s26  ;;  %v2082_v12 = vrot.slane %v1954_v0, 1  ;;  %v1986_v40 = vrot.slane %v1954_v0, 7  ;;  %vm7754_vm11 = vmmov %vm7746_vm0 }
 0x1f7   : > { %v1985_v43 = vrot.slane %v1953_v51, 7  ;;  %v2081_v55 = vrot.slane %v1953_v51, 1  ;;  %2237 = vrot.lane.b32.xlu0 %v1953_v51, %s4868_s26 }
 0x1f8   : > { %v4517_v33 = vpop.f32.mrf.mxu0 }
 0x1f9   : > { %v1922_v18 = vadd.f32 %v4517_v33, %v5887_v56  ;;  %v6176_v7 = vsel %vm7746_vm0, %v2080_v30, %v2081_v55  ;;  %v6180_v31 = vsel %vm7747_vm7, %v2081_v55, %v2082_v12  ;;  %v6184_v50 = vsel %vm7749_vm15, %v1984_v41, %v1985_v43  ;;  %v2981_v55 = vld [vmem:[#allocation7 + $0x2f8] sm:$0xff]  ;;  %vm7756_vm7 = vmmov %vm7742_vm8 }
 0x1fa   : > { %7748 = vst [vmem:[#allocation55_spill] sm:$0xff] %v6180_v31  ;;  %7750 = vst [vmem:[#allocation56_spill] sm:$0xff] %v6184_v50  ;;  %v1916_v22 = vpop.f32.mrf.mxu0  ;;  %v6188_v35 = vsel %vm7751_vm13, %v1985_v43, %v1986_v40  ;;  %v7753_v43 = vrot.slane %v5891_v36, 7  ;;  %3251 = vmatprep.subr.mxu1 %v2981_v55  ;;  %vm7758_vm13 = vnez %v7593_v29 }
 0x1fb   : > { %7752 = vst [vmem:[#allocation57_spill] sm:$0xff] %v6188_v35  ;;  %v6190_v0 = vmax.f32 %v1922_v18, 0.0  ;;  %v1917_v33 = vadd.f32 %v5887_v56, %v1916_v22  ;;  %v2184_v46 = vpop.permute.xlu1 %2183  ;;  %vm7757_vm15 = vmmov %vm7756_vm7 }
 0x1fd   : > { %v1988_v30 = vrot.slane %v6190_v0, 7  ;;  %v1955_v51 = vmax.f32 %v1917_v33, 0.0  ;;  %2243 = vrot.lane.b32.xlu1 %v6190_v0, %s4868_s26  ;;  %v2182_v56 = vpop.permute.xlu0 %2181  ;;  %v2980_v33 = vld [vmem:[#allocation7 + $0x2f0] sm:$0xff]  ;;  %v7755_v59 = vrot.slane %v6190_v0, 1 }
 0x1ff   : > { %v1987_v41 = vrot.slane %v1955_v51, 7  ;;  %v2083_v50 = vrot.slane %v1955_v51, 1  ;;  %2241 = vrot.lane.b32.xlu0 %v1955_v51, %s4868_s26  ;;  %v2020_v18 = vsel %vm7742_vm8, %v1988_v30, %v7753_v43  ;;  %v2979_v43 = vld [vmem:[#allocation7 + $0x2e8] sm:$0xff]  ;;  %vm7759_vm8 = vnez %v7538_v61  ;;  %s4265_s26 = sshll.u32 %s420_s19, 8 }
 0x200   : > { %v2021_v22 = vsel %vm5501_vm3, %v2020_v18, 0.0  ;;  %v2118_v18 = vsel %vm5070_vm1, %v5916_v6, 0.0  ;;  %v2974_v6 = vld [vmem:[#allocation7 + $0x2c0] sm:$0xff]  ;;  %s7297_s22 = scalar_lea.vmem [#allocation8], %s4265_s26  ;;  %s4794_s26 = scalar_lea.vmem %s4793_s2, 8192 }
 0x201   : > { %v2278_v35 = vsel %vm2277_vm14, %v2021_v22, %v2182_v56  ;;  %v6207_v31 = vsel %vm7754_vm11, %v2082_v12, %v2083_v50  ;;  %v6213_v51 = vsel %vm7746_vm0, %v2083_v50, %v7755_v59  ;;  %v6217_v55 = vsel %vm7756_vm7, %v1986_v40, %v1987_v41  ;;  %v2978_v56 = vld [vmem:[#allocation7 + $0x2e0] sm:$0xff]  ;;  %v2977_v59 = vld [vmem:[#allocation7 + $0x2d8] sm:$0xff]  ;;  %v2976_v50 = vld [vmem:[#allocation7 + $0x2d0] sm:$0xff]  ;;  %v2186_v22 = vpop.permute.xlu0 %2185  ;;  %s4162_s25 = sshll.u32 %s7297_s22, 4  ;;  %s7366_s25 = int_to_ptr.vmem [resolvable:$true] %s4162_s25 }
 0x202   : > { %2502 = vmatmul.mubr.f32.vlgmr.msra.gmra.mxu1 %v2278_v35  ;;  %v6224_v12 = vsel %vm7757_vm15, %v1987_v41, %v1988_v30  ;;  %v2279_v40 = vsel %vm2277_vm14, %v5910_v54, %v2184_v46  ;;  %v2975_v35 = vld [vmem:[#allocation7 + $0x2c8] sm:$0xff]  ;;  %v2973_v30 = vld [vmem:[#allocation7 + $0x2b8] sm:$0xff]  ;;  %v2023_v41 = vsel %vm5530_vm6, %v5924_v19, 0.0  ;;  %v2188_v54 = vpop.permute.xlu1 %2187  ;;  %v2968_v19 = vld [vmem:[#allocation7 + $0x290] sm:$0xff]  ;;  %vm7760_vm11 = vnez %v7597_v8  ;;  %s4788_s16 = scalar_lea.vmem %s7366_s25, 4096  ;;  %p4795_p7 = scmp.lt.s32.totalorder %s7366_s25, %s4793_s2 }
 0x203   : > { %4304 = vmatprep.mubr.msk.f32.mxu1 %vm2277_vm14, %v2118_v18  ;;  %3252 = vmatpush1.msra.mxu1 %v2980_v33  ;;  %v2972_v33 = vld [vmem:[#allocation7 + $0x2b0] sm:$0xff]  ;;  %v2971_v46 = vld [vmem:[#allocation7 + $0x2a8] sm:$0xff]  ;;  %v2120_v18 = vsel %vm5086_vm2, %v5936_v49, 0.0  ;;  %v2965_v49 = vld [vmem:[#allocation7 + $0x278] sm:$0xff]  ;;  %vm7761_vm0 = vnez %v7540_v25  ;;  %vm7762_vm7 = vnez %v7601_v17  ;;  %vm7763_vm15 = vnez %v7542_v52  ;;  %p4789_p9 = scmp.ne.s32.totalorder %s7366_s25, %s4788_s16  ;;  %p4796_p8 = scmp.lt.s32.totalorder %s4794_s26, %s4788_s16 }
 0x204   : > { %3253 = vmatprep.subr.mxu1 %v2979_v43  ;;  %v2280_v43 = vsel %vm2277_vm14, %v2023_v41, %v2186_v22  ;;  %v2025_v22 = vsel %vm5558_vm12, %v5944_v62, 0.0 }
 0x205   : > { %3254 = vmatpush1.msra.mxu1 %v2978_v56  ;;  %v2969_v56 = vld [vmem:[#allocation7 + $0x298] sm:$0xff]  ;;  %p4790_p10 = pnand %p4789_p9, %p4970_p5  ;;  %p4797_p11 = por %p4796_p8, %p4795_p7 }
 0x206   : > { %2507 = vmatmul.mubr.f32.gmra.mxu1 %v2279_v40  ;;  %3255 = vmatprep.subr.mxu1 %v2977_v59  ;;  %v2281_v59 = vsel %vm2277_vm14, %v5928_v57, %v2188_v54  ;;  %v2963_v57 = vld [vmem:[#allocation7 + $0x268] sm:$0xff] }
 0x207   : > { %4305 = vmatprep.mubr.msk.f32.mxu1 %vm2277_vm14, %v5920_v58  ;;  %3256 = vmatpush1.msra.mxu1 %v2976_v50  ;;  %v2970_v58 = vld [vmem:[#allocation7 + $0x2a0] sm:$0xff]  ;;  %v2967_v50 = vld [vmem:[#allocation7 + $0x288] sm:$0xff]  ;;  %v2192_v41 = vpop.permute.xlu1 %2191  ;;  %p4791_p12 = pneg %p4790_p10 }
 0x208   : > { %3257 = vmatprep.subr.mxu1 %v2975_v35  ;;  %v2966_v35 = vld [vmem:[#allocation7 + $0x280] sm:$0xff]  ;;  %v2283_v62 = vsel %vm2277_vm14, %v5948_v26, %v2192_v41 }
 0x209   : > { %3258 = vmatpush1.msra.mxu1 %v2974_v6  ;;  %v2190_v40 = vpop.permute.xlu0 %2189  ;;  %v2964_v6 = vld [vmem:[#allocation7 + $0x270] sm:$0xff]  ;;  %p4798_p0 = pnand %p4797_p11, %p4791_p12 }
 0x20a   : > { %2512 = vmatmul.mubr.f32.gmra.mxu1 %v2280_v43  ;;  %3259 = vmatprep.subr.mxu1 %v2973_v30  ;;  %v2282_v30 = vsel %vm2277_vm14, %v2025_v22, %v2190_v40 }
 0x20b   : > { %4306 = vmatprep.mubr.msk.f32.mxu1 %vm2277_vm14, %v2120_v18  ;;  %3260 = vmatpush1.msra.mxu1 %v2972_v33  ;;  %v2122_v33 = vsel %vm5110_vm4, %v5956_v4, 0.0  ;;  %v2124_v18 = vsel %vm5135_vm5, %v5976_v3, 0.0  ;;  %v2126_v3 = vsel %vm7759_vm8, %v5996_v15, 0.0  ;;  %v2128_v15 = vsel %vm7761_vm0, %v6016_v11, 0.0 }
 0x20c   : > { %3261 = vmatprep.subr.mxu1 %v2971_v46  ;;  %v2027_v46 = vsel %vm5573_vm10, %v5964_v23, 0.0  ;;  %v2130_v11 = vsel %vm7763_vm15, %v6036_v10, 0.0 }
 0x20d   : > { %3262 = vmatpush1.msra.mxu1 %v2970_v58 }
 0x20e   : > { %2517 = vmatmul.mubr.f32.gmra.mxu1 %v2281_v59  ;;  %3263 = vmatprep.subr.mxu1 %v2969_v56 }
 0x20f   : > { %4307 = vmatprep.mubr.msk.f32.mxu1 %vm2277_vm14, %v5940_v5  ;;  %3264 = vmatpush1.msra.mxu1 %v2968_v19  ;;  %v2962_v5 = vld [vmem:[#allocation7 + $0x260] sm:$0xff]  ;;  %v2196_v54 = vpop.permute.xlu1 %2195 }
 0x210   : > { %3265 = vmatprep.subr.mxu1 %v2967_v50  ;;  %v2285_v26 = vsel %vm2277_vm14, %v5968_v48, %v2196_v54 }
 0x211   : > { %3266 = vmatpush1.msra.mxu1 %v2966_v35  ;;  %v2194_v43 = vpop.permute.xlu0 %2193 }
 0x212   : > { %2522 = vmatmul.mubr.f32.gmra.mxu1 %v2282_v30  ;;  %3267 = vmatprep.subr.mxu1 %v2965_v49  ;;  %v2284_v4 = vsel %vm2277_vm14, %v2027_v46, %v2194_v43  ;;  %v7768_v30 = vld [vmem:[#allocation33_spill] sm:$0xff]  ;;  %v2960_v46 = vld [vmem:[#allocation7 + $0x250] sm:$0xff] }
 0x213   : > { %4308 = vmatprep.mubr.msk.f32.mxu1 %vm2277_vm14, %v2122_v33  ;;  %3268 = vmatpush1.msra.mxu1 %v2964_v6  ;;  %v2961_v43 = vld [vmem:[#allocation7 + $0x258] sm:$0xff] }
 0x214   : > { %3269 = vmatprep.subr.mxu1 %v2963_v57 }
 0x215   : > { %3270 = vmatpush1.msra.mxu1 %v2962_v5  ;;  %v7771_v5 = vld [vmem:[#allocation35_spill] sm:$0xff] }
 0x216   : > { %2527 = vmatmul.mubr.f32.gmra.mxu1 %v2283_v62  ;;  %3271 = vmatprep.subr.mxu1 %v2961_v43  ;;  %v7791_v43 = vld [vmem:[#allocation44_spill] sm:$0xff] }
 0x217   : > { %4309 = vmatprep.mubr.msk.f32.mxu1 %vm2277_vm14, %v5960_v53  ;;  %v2029_v53 = vsel %vm7758_vm13, %v5984_v27, 0.0  ;;  %v2200_v56 = vpop.permute.xlu1 %2199  ;;  %3272 = vmatpush1.msra.mxu1 %v2960_v46  ;;  %v7792_v46 = vld [vmem:[#allocation45_spill] sm:$0xff] }
 0x218   : > { %v2287_v48 = vsel %vm2277_vm14, %v5988_v2, %v2200_v56  ;;  %v7776_v56 = vld [vmem:[#allocation37_spill] sm:$0xff] }
 0x219   : > { %v2198_v58 = vpop.permute.xlu0 %2197 }
 0x21a   : > { %2532 = vmatmul.mubr.f32.gmra.mxu1 %v2284_v4  ;;  %v2286_v23 = vsel %vm2277_vm14, %v2029_v53, %v2198_v58  ;;  %v7774_v4 = vld [vmem:[#allocation34_spill] sm:$0xff]  ;;  %v7775_v53 = vld [vmem:[#allocation36_spill] sm:$0xff] }
 0x21b   : > { %4310 = vmatprep.mubr.msk.f32.mxu1 %vm2277_vm14, %v2124_v18  ;;  %v2959_v18 = vld [vmem:[#allocation7 + $0x248] sm:$0xff]  ;;  %v2958_v58 = vld [vmem:[#allocation7 + $0x240] sm:$0xff] }
 0x21c   : > { %3273 = vmatprep.subr.mxu1 %v2959_v18 }
 0x21d   : > { %3274 = vmatpush1.msra.mxu1 %v2958_v58  ;;  %v7795_v58 = vld [vmem:[#allocation47_spill] sm:$0xff] }
 0x21e   : > { %2537 = vmatmul.mubr.f32.gmra.mxu1 %v2285_v26 }
 0x21f   : > { %4311 = vmatprep.mubr.msk.f32.mxu1 %vm2277_vm14, %v5980_v24  ;;  %v2031_v24 = vsel %vm7760_vm11, %v6004_v9, 0.0  ;;  %v2204_v59 = vpop.permute.xlu1 %2203  ;;  %vm7765_vm11 = vnez %v7544_v13 }
 0x220   : > { %v2289_v2 = vsel %vm2277_vm14, %v6008_v60, %v2204_v59  ;;  %v2132_v10 = vsel %vm7765_vm11, %v6056_v34, 0.0  ;;  %v7772_v34 = vld [vmem:[#allocation14_spill] sm:$0xff] }
 0x221   : > { %v2202_v19 = vpop.permute.xlu0 %2201  ;;  %vm7773_vm13 = vnez %v7772_v34 }
 0x222   : > { %2542 = vmatmul.mubr.f32.gmra.mxu1 %v2286_v23  ;;  %v2288_v27 = vsel %vm2277_vm14, %v2031_v24, %v2202_v19  ;;  %v2134_v62 = vsel %vm7773_vm13, %v7771_v5, 0.0  ;;  %v2957_v23 = vld [vmem:[#allocation7 + $0x238] sm:$0xff]  ;;  %v2956_v19 = vld [vmem:[#allocation7 + $0x230] sm:$0xff] }
 0x223   : > { %4312 = vmatprep.mubr.msk.f32.mxu1 %vm2277_vm14, %v2126_v3  ;;  %v7777_v3 = vld [vmem:[#allocation24_spill] sm:$0xff]  ;;  %3275 = vmatprep.subr.mxu1 %v2957_v23 }
 0x224   : > { %3276 = vmatpush1.msra.mxu1 %v2956_v19 }
 0x226   : > { %2547 = vmatmul.mubr.f32.gmra.mxu1 %v2287_v48 }
 0x227   : > { %4313 = vmatprep.mubr.msk.f32.mxu1 %vm2277_vm14, %v6000_v63  ;;  %v2033_v63 = vsel %vm7762_vm7, %v6024_v44, 0.0  ;;  %v2208_v40 = vpop.permute.xlu1 %2207  ;;  %vm7764_vm7 = vnez %v7605_v37 }
 0x228   : > { %v2291_v60 = vsel %vm2277_vm14, %v6028_v38, %v2208_v40  ;;  %v7766_v38 = vld [vmem:[#allocation31_spill] sm:$0xff]  ;;  %v2952_v40 = vld [vmem:[#allocation7 + $0x210] sm:$0xff] }
 0x229   : > { %v2206_v50 = vpop.permute.xlu0 %2205 }
 0x22a   : > { %2552 = vmatmul.mubr.f32.gmra.mxu1 %v2288_v27  ;;  %v2290_v9 = vsel %vm2277_vm14, %v2033_v63, %v2206_v50  ;;  %v2955_v27 = vld [vmem:[#allocation7 + $0x228] sm:$0xff]  ;;  %v2954_v63 = vld [vmem:[#allocation7 + $0x220] sm:$0xff] }
 0x22b   : > { %4314 = vmatprep.mubr.msk.f32.mxu1 %vm2277_vm14, %v2128_v15  ;;  %v7779_v15 = vld [vmem:[#allocation39_spill] sm:$0xff]  ;;  %3277 = vmatprep.subr.mxu1 %v2955_v27  ;;  %v7800_v27 = vld [vmem:[#allocation49_spill] sm:$0xff] }
 0x22c   : > { %3278 = vmatpush1.msra.mxu1 %v2954_v63 }
 0x22e   : > { %2557 = vmatmul.mubr.f32.gmra.mxu1 %v2289_v2  ;;  %v7780_v2 = vld [vmem:[#allocation15_spill] sm:$0xff] }
 0x22f   : > { %4315 = vmatprep.mubr.msk.f32.mxu1 %vm2277_vm14, %v6020_v39  ;;  %v2035_v39 = vsel %vm7764_vm7, %v6044_v47, 0.0  ;;  %v2212_v49 = vpop.permute.xlu1 %2211  ;;  %v7769_v47 = vld [vmem:[#allocation23_spill] sm:$0xff]  ;;  %vm7781_vm10 = vnez %v7780_v2 }
 0x230   : > { %v2293_v22 = vsel %vm2277_vm14, %v7766_v38, %v2212_v49  ;;  %vm7770_vm7 = vnez %v7769_v47  ;;  %v2136_v50 = vsel %vm7781_vm10, %v7779_v15, 0.0  ;;  %v7783_v49 = vld [vmem:[#allocation40_spill] sm:$0xff]  ;;  %v7785_v38 = vld [vmem:[#allocation25_spill] sm:$0xff] }
 0x231   : > { %v2210_v35 = vpop.permute.xlu0 %2209  ;;  %v2037_v57 = vsel %vm7770_vm7, %v7768_v30, 0.0  ;;  %vm7778_vm7 = vnez %v7777_v3  ;;  %v7787_v30 = vld [vmem:[#allocation43_spill] sm:$0xff] }
 0x232   : > { %2562 = vmatmul.mubr.f32.gmra.mxu1 %v2290_v9  ;;  %v2292_v44 = vsel %vm2277_vm14, %v2035_v39, %v2210_v35  ;;  %v2039_v48 = vsel %vm7778_vm7, %v7776_v56, 0.0  ;;  %v2953_v9 = vld [vmem:[#allocation7 + $0x218] sm:$0xff]  ;;  %v2951_v35 = vld [vmem:[#allocation7 + $0x208] sm:$0xff]  ;;  %vm7786_vm7 = vnez %v7785_v38  ;;  %v7798_v56 = vld [vmem:[#allocation46_spill] sm:$0xff] }
 0x233   : > { %4316 = vmatprep.mubr.msk.f32.mxu1 %vm2277_vm14, %v2130_v11  ;;  %3279 = vmatprep.subr.mxu1 %v2953_v9  ;;  %v7782_v11 = vld [vmem:[#allocation38_spill] sm:$0xff]  ;;  %v7803_v9 = vld [vmem:[#allocation51_spill] sm:$0xff] }
 0x234   : > { %3280 = vmatpush1.msra.mxu1 %v2952_v40  ;;  %v7804_v40 = vld [vmem:[#allocation18_spill] sm:$0xff] }
 0x235   : > { %3281 = vmatprep.subr.mxu1 %v2951_v35  ;;  %vm7805_vm3 = vnez %v7804_v40 }
 0x236   : > { %2567 = vmatmul.mubr.f32.gmra.mxu1 %v2291_v60 }
 0x237   : > { %4317 = vmatprep.mubr.msk.f32.mxu1 %vm2277_vm14, %v6040_v21  ;;  %v7767_v21 = vld [vmem:[#allocation32_spill] sm:$0xff]  ;;  %v2216_v33 = vpop.permute.xlu1 %2215 }
 0x238   : > { %v2295_v54 = vsel %vm2277_vm14, %v7774_v4, %v2216_v33  ;;  %v7790_v33 = vld [vmem:[#allocation42_spill] sm:$0xff] }
 0x239   : > { %v2214_v6 = vpop.permute.xlu0 %2213  ;;  %v7793_v4 = vld [vmem:[#allocation26_spill] sm:$0xff] }
 0x23a   : > { %2572 = vmatmul.mubr.f32.gmra.mxu1 %v2292_v44  ;;  %v2294_v41 = vsel %vm2277_vm14, %v2037_v57, %v2214_v6  ;;  %v2950_v44 = vld [vmem:[#allocation7 + $0x200] sm:$0xff]  ;;  %v7788_v57 = vld [vmem:[#allocation16_spill] sm:$0xff] }
 0x23b   : > { %4318 = vmatprep.mubr.msk.f32.mxu1 %vm2277_vm14, %v2132_v10  ;;  %3282 = vmatpush1.msra.mxu1 %v2950_v44  ;;  %v7784_v10 = vld [vmem:[#allocation41_spill] sm:$0xff]  ;;  %vm7789_vm12 = vnez %v7788_v57  ;;  %v7807_v44 = vld [vmem:[#allocation52_spill] sm:$0xff] }
 0x23e   : > { %2577 = vmatmul.mubr.f32.gmra.mxu1 %v2293_v22  ;;  %v2041_v22 = vsel %vm7786_vm7, %v7784_v10, 0.0  ;;  %vm7794_vm7 = vnez %v7793_v4  ;;  %v7809_v10 = vld [vmem:[#allocation28_spill] sm:$0xff] }
 0x23f   : > { %4319 = vmatprep.mubr.msk.f32.mxu1 %vm2277_vm14, %v7767_v21  ;;  %v2220_v59 = vpop.permute.xlu1 %2219 }
 0x240   : > { %v2297_v60 = vsel %vm2277_vm14, %v7782_v11, %v2220_v59  ;;  %v7801_v59 = vld [vmem:[#allocation27_spill] sm:$0xff]  ;;  %v2142_v11 = vsel %vm7805_vm3, %v7803_v9, 0.0 }
 0x241   : > { %v2218_v26 = vpop.permute.xlu0 %2217 }
 0x242   : > { %2582 = vmatmul.mubr.f32.gmra.mxu1 %v2294_v41  ;;  %v2296_v24 = vsel %vm2277_vm14, %v2039_v48, %v2218_v26  ;;  %v2138_v41 = vsel %vm7789_vm12, %v7787_v30, 0.0  ;;  %v7811_v30 = vld [vmem:[#allocation19_spill] sm:$0xff] }
 0x243   : > { %4320 = vmatprep.mubr.msk.f32.mxu1 %vm2277_vm14, %v2134_v62  ;;  %vm7812_vm3 = vnez %v7811_v30 }
 0x246   : > { %2587 = vmatmul.mubr.f32.gmra.mxu1 %v2295_v54  ;;  %v2043_v54 = vsel %vm7794_vm7, %v7792_v46, 0.0  ;;  %vm7802_vm7 = vnez %v7801_v59  ;;  %v7815_v46 = vld [vmem:[#allocation56_spill] sm:$0xff] }
 0x247   : > { %4321 = vmatprep.mubr.msk.f32.mxu1 %vm2277_vm14, %v7775_v53  ;;  %v2224_v21 = vpop.permute.xlu1 %2223  ;;  %v7796_v53 = vld [vmem:[#allocation17_spill] sm:$0xff]  ;;  %v2045_v15 = vsel %vm7802_vm7, %v7800_v27, 0.0  ;;  %vm7810_vm7 = vnez %v7809_v10  ;;  %v7822_v27 = vrot.slane %v6190_v0, 1  ;;  %v7827_v0 = vmov 0.0  }
 0x248   : > { %v2299_v5 = vsel %vm2277_vm14, %v7790_v33, %v2224_v21  ;;  %vm7797_vm6 = vnez %v7796_v53  ;;  %v7813_v33 = vld [vmem:[#allocation54_spill] sm:$0xff] }
 0x249   : > { %v2222_v39 = vpop.permute.xlu0 %2221  ;;  %v2140_v23 = vsel %vm7797_vm6, %v7795_v58, 0.0 }
 0x24a   : > { %2592 = vmatmul.mubr.f32.gmra.mxu1 %v2296_v24  ;;  %v2298_v6 = vsel %vm2277_vm14, %v2041_v22, %v2222_v39  ;;  %v7799_v24 = vld [vmem:[#allocation48_spill] sm:$0xff] }
 0x24b   : > { %4322 = vmatprep.mubr.msk.f32.mxu1 %vm2277_vm14, %v2136_v50 }
 0x24e   : > { %2597 = vmatmul.mubr.f32.gmra.mxu1 %v2297_v60  ;;  %v7806_v60 = vld [vmem:[#allocation50_spill] sm:$0xff] }
 0x24f   : > { %4323 = vmatprep.mubr.msk.f32.mxu1 %vm2277_vm14, %v7783_v49  ;;  %v2228_v26 = vpop.permute.xlu1 %2227  ;;  %v7808_v49 = vld [vmem:[#allocation53_spill] sm:$0xff] }
 0x250   : > { %v2301_v48 = vsel %vm2277_vm14, %v7798_v56, %v2228_v26  ;;  %v2047_v22 = vsel %vm7810_vm7, %v7808_v49, 0.0  ;;  %v7820_v56 = vld [vmem:[#allocation57_spill] sm:$0xff]  ;;  %v2912_v49 = vld [vmem:[#allocation7 + $0xd0] sm:$0xff] }
 0x251   : > { %v2226_v62 = vpop.permute.xlu0 %2225 }
 0x252   : > { %2602 = vmatmul.mubr.f32.gmra.mxu1 %v2298_v6  ;;  %v2300_v18 = vsel %vm2277_vm14, %v2043_v54, %v2226_v62  ;;  %v7816_v54 = vld [vmem:[#allocation29_spill] sm:$0xff] }
 0x253   : > { %4324 = vmatprep.mubr.msk.f32.mxu1 %vm2277_vm14, %v2138_v41  ;;  %v2144_v41 = vsel %vm7812_vm3, %v6176_v7, 0.0  ;;  %vm7817_vm7 = vnez %v7816_v54  ;;  %v7818_v7 = vld [vmem:[#allocation20_spill] sm:$0xff] }
 0x254   : > { %vm7819_vm3 = vnez %v7818_v7 }
 0x256   : > { %2607 = vmatmul.mubr.f32.gmra.mxu1 %v2299_v5 }
 0x257   : > { %4325 = vmatprep.mubr.msk.f32.mxu1 %vm2277_vm14, %v7791_v43  ;;  %v2232_v63 = vpop.permute.xlu1 %2231  ;;  %v7814_v43 = vld [vmem:[#allocation55_spill] sm:$0xff] }
 0x258   : > { %v2303_v35 = vsel %vm2277_vm14, %v7806_v60, %v2232_v63 }
 0x259   : > { %v2230_v19 = vpop.permute.xlu0 %2229 }
 0x25a   : > { %2612 = vmatmul.mubr.f32.gmra.mxu1 %v2300_v18  ;;  %v2302_v50 = vsel %vm2277_vm14, %v2045_v15, %v2230_v19  ;;  %v2049_v18 = vsel %vm7817_vm7, %v7815_v46, 0.0  ;;  %vm7823_vm7 = vcmp.lt.s32.totalorder %v5037_v1, 7  ;;  %v2902_v46 = vld [vmem:[#allocation7 + $0x80] sm:$0xff] }
 0x25b   : > { %4326 = vmatprep.mubr.msk.f32.mxu1 %vm2277_vm14, %v2140_v23  ;;  %v2146_v23 = vsel %vm7819_vm3, %v6207_v31, 0.0  ;;  %v2051_v31 = vsel %vm5772_vm9, %v6217_v55, 0.0  ;;  %v2915_v55 = vld [vmem:[#allocation7 + $0xe8] sm:$0xff] }
 0x25e   : > { %2617 = vmatmul.mubr.f32.gmra.mxu1 %v2301_v48 }
 0x25f   : > { %4327 = vmatprep.mubr.msk.f32.mxu1 %vm2277_vm14, %v7799_v24  ;;  %v2236_v21 = vpop.permute.xlu1 %2235  ;;  %v7821_v24 = vrot.slane %v5891_v36, 1 }
 0x260   : > { %v2305_v5 = vsel %vm2277_vm14, %v7813_v33, %v2236_v21  ;;  %v2908_v21 = vld [vmem:[#allocation7 + $0xb0] sm:$0xff]  ;;  %v2906_v33 = vld [vmem:[#allocation7 + $0xa0] sm:$0xff] }
 0x261   : > { %v2234_v39 = vpop.permute.xlu0 %2233  ;;  %v2116_v15 = vsel %vm7823_vm7, %v7822_v27, %v7821_v24  ;;  %v2894_v24 = vld [vmem:[#allocation7 + $0x40] sm:$0xff]  ;;  %v2893_v27 = vld [vmem:[#allocation7 + $0x38] sm:$0xff] }
 0x262   : > { %2622 = vmatmul.mubr.f32.gmra.mxu1 %v2302_v50  ;;  %v2304_v6 = vsel %vm2277_vm14, %v2047_v22, %v2234_v39  ;;  %v2914_v39 = vld [vmem:[#allocation7 + $0xe0] sm:$0xff]  ;;  %v2911_v22 = vld [vmem:[#allocation7 + $0xc8] sm:$0xff] }
 0x263   : > { %4328 = vmatprep.mubr.msk.f32.mxu1 %vm2277_vm14, %v2142_v11  ;;  %v7825_v11 = vld [vmem:[#allocation22_spill] sm:$0xff] }
 0x264   : > { %vm7826_vm3 = vnez %v7825_v11  ;;  %v3583_v11 = vld [vmem:[%s7420_s7 + $0x58] sm:$0xff] }
 0x265   : > { %v2148_v60 = vsel %vm7826_vm3, %v2116_v15, 0.0  ;;  %v2892_v15 = vld [vmem:[#allocation7 + $0x30] sm:$0xff] }
 0x266   : > { %2627 = vmatmul.mubr.f32.gmra.mxu1 %v2303_v35  ;;  %v2916_v35 = vld [vmem:[#allocation7 + $0xf0] sm:$0xff] }
 0x267   : > { %4329 = vmatprep.mubr.msk.f32.mxu1 %vm2277_vm14, %v7807_v44  ;;  %v2240_v58 = vpop.permute.xlu1 %2239  ;;  %v2913_v44 = vld [vmem:[#allocation7 + $0xd8] sm:$0xff] }
 0x268   : > { %v2307_v48 = vsel %vm2277_vm14, %v7820_v56, %v2240_v58  ;;  %v2899_v58 = vld [vmem:[#allocation7 + $0x68] sm:$0xff]  ;;  %v2897_v56 = vld [vmem:[#allocation7 + $0x58] sm:$0xff] }
 0x269   : > { %v2238_v62 = vpop.permute.xlu0 %2237 }
 0x26a   : > { %2632 = vmatmul.mubr.f32.gmra.mxu1 %v2304_v6  ;;  %v2306_v26 = vsel %vm2277_vm14, %v2049_v18, %v2238_v62  ;;  %v2910_v6 = vld [vmem:[#allocation7 + $0xc0] sm:$0xff]  ;;  %v2904_v62 = vld [vmem:[#allocation7 + $0x90] sm:$0xff]  ;;  %v2901_v18 = vld [vmem:[#allocation7 + $0x78] sm:$0xff] }
 0x26b   : > { %4330 = vmatprep.mubr.msk.f32.mxu1 %vm2277_vm14, %v2144_v41  ;;  %v2907_v41 = vld [vmem:[#allocation7 + $0xa8] sm:$0xff] }
 0x26e   : > { %2637 = vmatmul.mubr.f32.gmra.mxu1 %v2305_v5  ;;  %v2905_v5 = vld [vmem:[#allocation7 + $0x98] sm:$0xff] }
 0x26f   : > { %4331 = vmatprep.mubr.msk.f32.mxu1 %vm2277_vm14, %v7814_v43  ;;  %v2244_v9 = vpop.permute.xlu1 %2243  ;;  %v2903_v43 = vld [vmem:[#allocation7 + $0x88] sm:$0xff] }
 0x270   : > { %v2309_v36 = vsel %vm2277_vm14, %v6224_v12, %v2244_v9  ;;  %v2909_v12 = vld [vmem:[#allocation7 + $0xb8] sm:$0xff] }
 0x271   : > { %v2242_v19 = vpop.permute.xlu0 %2241  ;;  %v2889_v9 = vld [vmem:[#allocation7 + $0x18] sm:$0xff] }
 0x272   : > { %2642 = vmatmul.mubr.f32.gmra.mxu1 %v2306_v26  ;;  %v2308_v63 = vsel %vm2277_vm14, %v2051_v31, %v2242_v19  ;;  %v2900_v26 = vld [vmem:[#allocation7 + $0x70] sm:$0xff]  ;;  %v2895_v19 = vld [vmem:[#allocation7 + $0x48] sm:$0xff] }
 0x273   : > { %4332 = vmatprep.mubr.msk.f32.mxu1 %vm2277_vm14, %v2146_v23  ;;  %v2898_v23 = vld [vmem:[#allocation7 + $0x60] sm:$0xff]  ;;  %v2891_v31 = vld [vmem:[#allocation7 + $0x28] sm:$0xff] }
 0x276   : > { %2647 = vmatmul.mubr.f32.gmra.mxu1 %v2307_v48  ;;  %v2896_v48 = vld [vmem:[#allocation7 + $0x50] sm:$0xff] }
 0x277   : > { %4333 = vmatprep.mubr.msk.f32.mxu1 %vm2277_vm14, %v6213_v51  ;;  %v2917_v51 = vld [vmem:[#allocation7 + $0xf8] sm:$0xff] }
 0x278   : > { %2994 = vmatprep.subr.mxu0 %v2917_v51  ;;  %v2886_v51 = vld [vmem:[#allocation7] sm:$0xff] }
 0x279   : > { %2995 = vmatpush1.msra.mxu0 %v2916_v35  ;;  %v2949_v35 = vld [vmem:[#allocation7 + $0x1f8] sm:$0xff] }
 0x27a   : > { %2652 = vmatmul.mubr.f32.gmra.mxu1 %v2308_v63  ;;  %2996 = vmatprep.subr.mxu0 %v2915_v55  ;;  %v2890_v63 = vld [vmem:[#allocation7 + $0x20] sm:$0xff]  ;;  %v2948_v55 = vld [vmem:[#allocation7 + $0x1f0] sm:$0xff] }
 0x27b   : > { %4334 = vmatprep.mubr.msk.f32.mxu1 %vm2277_vm14, %v2148_v60  ;;  %2997 = vmatpush1.msra.mxu0 %v2914_v39  ;;  %v2888_v60 = vld [vmem:[#allocation7 + $0x10] sm:$0xff]  ;;  %v2947_v39 = vld [vmem:[#allocation7 + $0x1e8] sm:$0xff]  ;;  %vm7828_vm14 = vmmov %vm7823_vm7 }
 0x27c   : > { %2998 = vmatprep.subr.mxu0 %v2913_v44  ;;  %v2946_v44 = vld [vmem:[#allocation7 + $0x1e0] sm:$0xff] }
 0x27d   : > { %2999 = vmatpush1.msra.mxu0 %v2912_v49  ;;  %v2945_v49 = vld [vmem:[#allocation7 + $0x1d8] sm:$0xff] }
 0x27e   : > { %2657 = vmatmul.mubr.f32.gmra.mxu1 %v2309_v36  ;;  %3000 = vmatprep.subr.mxu0 %v2911_v22  ;;  %v2887_v36 = vld [vmem:[#allocation7 + $0x8] sm:$0xff]  ;;  %v2944_v22 = vld [vmem:[#allocation7 + $0x1d0] sm:$0xff] }
 0x27f   : > { %3315 = vmatprep.mubr.f32.mxu1 %v7827_v0  ;;  %3001 = vmatpush1.msra.mxu0 %v2910_v6  ;;  %v2943_v6 = vld [vmem:[#allocation7 + $0x1c8] sm:$0xff] }
 0x280   : > { %3002 = vmatprep.subr.mxu0 %v2909_v12  ;;  %v2942_v12 = vld [vmem:[#allocation7 + $0x1c0] sm:$0xff] }
 0x281   : > { %3003 = vmatpush1.msra.mxu0 %v2908_v21  ;;  %v2941_v21 = vld [vmem:[#allocation7 + $0x1b8] sm:$0xff] }
 0x282   : > { %3004 = vmatprep.subr.mxu0 %v2907_v41  ;;  %v2940_v41 = vld [vmem:[#allocation7 + $0x1b0] sm:$0xff] }
 0x283   : > { %3005 = vmatpush1.msra.mxu0 %v2906_v33  ;;  %v2939_v33 = vld [vmem:[#allocation7 + $0x1a8] sm:$0xff] }
 0x284   : > { %3006 = vmatprep.subr.mxu0 %v2905_v5  ;;  %v2938_v5 = vld [vmem:[#allocation7 + $0x1a0] sm:$0xff] }
 0x285   : > { %3007 = vmatpush1.msra.mxu0 %v2904_v62  ;;  %v2937_v62 = vld [vmem:[#allocation7 + $0x198] sm:$0xff] }
 0x286   : > { %3008 = vmatprep.subr.mxu0 %v2903_v43  ;;  %v2936_v43 = vld [vmem:[#allocation7 + $0x190] sm:$0xff] }
 0x287   : > { %3009 = vmatpush1.msra.mxu0 %v2902_v46  ;;  %v2935_v46 = vld [vmem:[#allocation7 + $0x188] sm:$0xff] }
 0x288   : > { %3010 = vmatprep.subr.mxu0 %v2901_v18  ;;  %v2934_v18 = vld [vmem:[#allocation7 + $0x180] sm:$0xff] }
 0x289   : > { %3011 = vmatpush1.msra.mxu0 %v2900_v26  ;;  %v2933_v26 = vld [vmem:[#allocation7 + $0x178] sm:$0xff] }
 0x28a   : > { %3012 = vmatprep.subr.mxu0 %v2899_v58  ;;  %v2932_v58 = vld [vmem:[#allocation7 + $0x170] sm:$0xff] }
 0x28b   : > { %3013 = vmatpush1.msra.mxu0 %v2898_v23  ;;  %v2931_v23 = vld [vmem:[#allocation7 + $0x168] sm:$0xff] }
 0x28c   : > { %3014 = vmatprep.subr.mxu0 %v2897_v56  ;;  %v2930_v56 = vld [vmem:[#allocation7 + $0x160] sm:$0xff] }
 0x28d   : > { %3015 = vmatpush1.msra.mxu0 %v2896_v48  ;;  %v2929_v48 = vld [vmem:[#allocation7 + $0x158] sm:$0xff] }
 0x28e   : > { %3016 = vmatprep.subr.mxu0 %v2895_v19  ;;  %v2928_v19 = vld [vmem:[#allocation7 + $0x150] sm:$0xff] }
 0x28f   : > { %3017 = vmatpush1.msra.mxu0 %v2894_v24  ;;  %v2927_v24 = vld [vmem:[#allocation7 + $0x148] sm:$0xff] }
 0x290   : > { %3018 = vmatprep.subr.mxu0 %v2893_v27  ;;  %v2926_v27 = vld [vmem:[#allocation7 + $0x140] sm:$0xff] }
 0x291   : > { %3019 = vmatpush1.msra.mxu0 %v2892_v15  ;;  %v2925_v15 = vld [vmem:[#allocation7 + $0x138] sm:$0xff] }
 0x292   : > { %3020 = vmatprep.subr.mxu0 %v2891_v31  ;;  %v6418_v31 = vld [vmem:[%s7417_s4] ss:$0 sm:$0xff] }
 0x293   : > { %3021 = vmatpush1.msra.mxu0 %v2890_v63  ;;  %v2924_v63 = vld [vmem:[#allocation7 + $0x130] sm:$0xff] }
 0x294   : > { %3022 = vmatprep.subr.mxu0 %v2889_v9  ;;  %v2923_v9 = vld [vmem:[#allocation7 + $0x128] sm:$0xff] }
 0x295   : > { %3023 = vmatpush1.msra.mxu0 %v2888_v60 }
 0x296   : > { %3024 = vmatprep.subr.mxu0 %v2887_v36  ;;  %v2922_v36 = vld [vmem:[#allocation7 + $0x120] sm:$0xff] }
 0x297   : > { %3025 = vmatpush1.msra.mxu0 %v2886_v51 }
 0x298   : > { %3026 = vmatprep.subr.mxu0 %v2949_v35  ;;  %v2921_v35 = vld [vmem:[#allocation7 + $0x118] sm:$0xff] }
 0x299   : > { %3027 = vmatpush2.msra.mxu0 %v2948_v55  ;;  %v2920_v55 = vld [vmem:[#allocation7 + $0x110] sm:$0xff] }
 0x29a   : > { %3028 = vmatprep.subr.mxu0 %v2947_v39  ;;  %v2919_v39 = vld [vmem:[#allocation7 + $0x108] sm:$0xff] }
 0x29b   : > { %3029 = vmatpush2.msra.mxu0 %v2946_v44 }
 0x29c   : > { %3030 = vmatprep.subr.mxu0 %v2945_v49  ;;  %v2918_v49 = vld [vmem:[#allocation7 + $0x100] sm:$0xff] }
 0x29d   : > { %3031 = vmatpush2.msra.mxu0 %v2944_v22 }
 0x29e   : > { %3032 = vmatprep.subr.mxu0 %v2943_v6 }
 0x29f   : > { %3033 = vmatpush2.msra.mxu0 %v2942_v12 }
 0x2a0   : > { %3034 = vmatprep.subr.mxu0 %v2941_v21 }
 0x2a1   : > { %3035 = vmatpush2.msra.mxu0 %v2940_v41 }
 0x2a2   : > { %3036 = vmatprep.subr.mxu0 %v2939_v33 }
 0x2a3   : > { %3037 = vmatpush2.msra.mxu0 %v2938_v5 }
 0x2a4   : > { %3038 = vmatprep.subr.mxu0 %v2937_v62 }
 0x2a5   : > { %3039 = vmatpush2.msra.mxu0 %v2936_v43 }
 0x2a6   : > { %3040 = vmatprep.subr.mxu0 %v2935_v46 }
 0x2a7   : > { %3041 = vmatpush2.msra.mxu0 %v2934_v18 }
 0x2a8   : > { %3042 = vmatprep.subr.mxu0 %v2933_v26 }
 0x2a9   : > { %3043 = vmatpush2.msra.mxu0 %v2932_v58 }
 0x2aa   : > { %3044 = vmatprep.subr.mxu0 %v2931_v23 }
 0x2ab   : > { %3045 = vmatpush2.msra.mxu0 %v2930_v56 }
 0x2ac   : > { %3046 = vmatprep.subr.mxu0 %v2929_v48 }
 0x2ad   : > { %3047 = vmatpush2.msra.mxu0 %v2928_v19 }
 0x2ae   : > { %3048 = vmatprep.subr.mxu0 %v2927_v24 }
 0x2af   : > { %3049 = vmatpush2.msra.mxu0 %v2926_v27 }
 0x2b0   : > { %3050 = vmatprep.subr.mxu0 %v2925_v15 }
 0x2b1   : > { %3051 = vmatpush2.msra.mxu0 %v2924_v63 }
 0x2b2   : > { %3052 = vmatprep.subr.mxu0 %v2923_v9 }
 0x2b3   : > { %3053 = vmatpush2.msra.mxu0 %v2922_v36 }
 0x2b4   : > { %3054 = vmatprep.subr.mxu0 %v2921_v35 }
 0x2b5   : > { %3055 = vmatpush2.msra.mxu0 %v2920_v55 }
 0x2b6   : > { %3056 = vmatprep.subr.mxu0 %v2919_v39 }
 0x2b7   : > { %3057 = vmatpush2.msra.mxu0 %v2918_v49 }
 0x2b8   : > { %3611 = vmatprep.subr.mxu0 %v7827_v0 }
 0x2c2   : > { %v2503_v60 = vpop.f32.mrf.mxu1 }
 0x2c3   : > { %v2504_v51 = vadd.f32 %v6418_v31, %v2503_v60 }
 0x2c4   : > { %v2505_v44 = vpop.f32.mrf.mxu1 }
 0x2c5   : > { %v6421_v22 = vmax.f32 %v2504_v51, 0.0 }
 0x2c6   : > { %v2508_v6 = vpop.f32.mrf.mxu1 }
 0x2c7   : > { %v2509_v12 = vadd.f32 %v6418_v31, %v2508_v6  ;;  %3058 = vmatprep.mubr.f32.mxu0 %v6421_v22  ;;  %v2790_v5 = vrot.slane %v6421_v22, 1 }
 0x2c8   : > { %v2510_v21 = vpop.f32.mrf.mxu1 }
 0x2c9   : > { %v6426_v41 = vmax.f32 %v2509_v12, 0.0 }
 0x2ca   : > { %v2513_v33 = vpop.f32.mrf.mxu1 }
 0x2cb   : > { %v2791_v62 = vrot.slane %v6426_v41, 1  ;;  %v2514_v43 = vadd.f32 %v6418_v31, %v2513_v33 }
 0x2cc   : > { %v2515_v46 = vpop.f32.mrf.mxu1 }
 0x2cd   : > { %v6431_v18 = vmax.f32 %v2514_v43, 0.0  ;;  %v2852_v26 = vsel %vm7828_vm14, %v2790_v5, %v2791_v62  ;;  %vm7829_vm14 = vmmov %vm7823_vm7 }
 0x2ce   : > { %v2518_v58 = vpop.f32.mrf.mxu1  ;;  %3316 = vmatmul.mubr.f32.vlgmr.msra.gmra.mxu1 %v2852_v26 }
 0x2cf   : > { %v2792_v23 = vrot.slane %v6431_v18, 1  ;;  %v2519_v56 = vadd.f32 %v6418_v31, %v2518_v58  ;;  %3321 = vmatprep.mubr.f32.mxu1 %v7827_v0 }
 0x2d0   : > { %v2520_v48 = vpop.f32.mrf.mxu1 }
 0x2d1   : > { %v6440_v19 = vmax.f32 %v2519_v56, 0.0  ;;  %v2851_v24 = vsel %vm7823_vm7, %v2791_v62, %v2792_v23 }
 0x2d2   : > { %v2523_v27 = vpop.f32.mrf.mxu1  ;;  %4351 = vmatmul.mubr.msk.f32.gmra.mxu1 %vm5070_vm1, %v2851_v24  ;;  %vm7830_vm1 = vmmov %vm7823_vm7 }
 0x2d3   : > { %v2793_v15 = vrot.slane %v6440_v19, 1  ;;  %v2524_v63 = vadd.f32 %v6418_v31, %v2523_v27  ;;  %3327 = vmatprep.mubr.f32.mxu1 %v7827_v0  ;;  %vm7831_vm7 = vmmov %vm7830_vm1 }
 0x2d4   : > { %v2525_v9 = vpop.f32.mrf.mxu1 }
 0x2d5   : > { %v6449_v60 = vmax.f32 %v2524_v63, 0.0  ;;  %v2850_v36 = vsel %vm7829_vm14, %v2792_v23, %v2793_v15  ;;  %vm7833_vm14 = vmmov %vm7830_vm1 }
 0x2d6   : > { %v2528_v51 = vpop.f32.mrf.mxu1  ;;  %3328 = vmatmul.mubr.f32.gmra.mxu1 %v2850_v36 }
 0x2d7   : > { %v2794_v35 = vrot.slane %v6449_v60, 1  ;;  %v2529_v55 = vadd.f32 %v6418_v31, %v2528_v51  ;;  %3333 = vmatprep.mubr.f32.mxu1 %v7827_v0 }
 0x2d8   : > { %v2530_v14 = vpop.f32.mrf.mxu1 }
 0x2d9   : > { %v6456_v39 = vmax.f32 %v2529_v55, 0.0  ;;  %v2849_v44 = vsel %vm7830_vm1, %v2793_v15, %v2794_v35 }
 0x2da   : > { %v2533_v49 = vpop.f32.mrf.mxu1  ;;  %4352 = vmatmul.mubr.msk.f32.gmra.mxu1 %vm5086_vm2, %v2849_v44  ;;  %vm7832_vm2 = vmmov %vm7830_vm1 }
 0x2db   : > { %v2795_v6 = vrot.slane %v6456_v39, 1  ;;  %v2534_v12 = vadd.f32 %v6418_v31, %v2533_v49  ;;  %3339 = vmatprep.mubr.f32.mxu1 %v7827_v0 }
 0x2dc   : > { %v2535_v21 = vpop.f32.mrf.mxu1 }
 0x2dd   : > { %v6465_v33 = vmax.f32 %v2534_v12, 0.0  ;;  %v2848_v62 = vsel %vm7831_vm7, %v2794_v35, %v2795_v6  ;;  %vm7836_vm7 = vmmov %vm7830_vm1 }
 0x2de   : > { %v2538_v43 = vpop.f32.mrf.mxu1  ;;  %3340 = vmatmul.mubr.f32.gmra.mxu1 %v2848_v62 }
 0x2df   : > { %v2796_v46 = vrot.slane %v6465_v33, 1  ;;  %v2539_v26 = vadd.f32 %v6418_v31, %v2538_v43  ;;  %3345 = vmatprep.mubr.f32.mxu1 %v7827_v0 }
 0x2e0   : > { %v2540_v20 = vpop.f32.mrf.mxu1 }
 0x2e1   : > { %v6472_v58 = vmax.f32 %v2539_v26, 0.0  ;;  %v2847_v23 = vsel %vm7832_vm2, %v2795_v6, %v2796_v46  ;;  %vm7838_vm2 = vmmov %vm7830_vm1 }
 0x2e2   : > { %v2543_v56 = vpop.f32.mrf.mxu1  ;;  %4353 = vmatmul.mubr.msk.f32.gmra.mxu1 %vm5110_vm4, %v2847_v23  ;;  %vm7834_vm4 = vmmov %vm7830_vm1 }
 0x2e3   : > { %v2797_v48 = vrot.slane %v6472_v58, 1  ;;  %v2544_v24 = vadd.f32 %v6418_v31, %v2543_v56  ;;  %3351 = vmatprep.mubr.f32.mxu1 %v7827_v0 }
 0x2e4   : > { %v2545_v27 = vpop.f32.mrf.mxu1 }
 0x2e5   : > { %v6481_v15 = vmax.f32 %v2544_v24, 0.0  ;;  %v2846_v63 = vsel %vm7833_vm14, %v2796_v46, %v2797_v48 }
 0x2e6   : > { %v2548_v9 = vpop.f32.mrf.mxu1  ;;  %3352 = vmatmul.mubr.f32.gmra.mxu1 %v2846_v63 }
 0x2e7   : > { %v2798_v36 = vrot.slane %v6481_v15, 1  ;;  %v2549_v51 = vadd.f32 %v6418_v31, %v2548_v9  ;;  %3357 = vmatprep.mubr.f32.mxu1 %v7827_v0 }
 0x2e8   : > { %v2550_v32 = vpop.f32.mrf.mxu1 }
 0x2e9   : > { %v6488_v35 = vmax.f32 %v2549_v51, 0.0  ;;  %v2845_v55 = vsel %vm7834_vm4, %v2797_v48, %v2798_v36 }
 0x2ea   : > { %v2553_v14 = vpop.f32.mrf.mxu1  ;;  %4354 = vmatmul.mubr.msk.f32.gmra.mxu1 %vm5135_vm5, %v2845_v55  ;;  %vm7835_vm5 = vmmov %vm7830_vm1 }
 0x2eb   : > { %v2799_v44 = vrot.slane %v6488_v35, 1  ;;  %v2554_v49 = vadd.f32 %v6418_v31, %v2553_v14  ;;  %3363 = vmatprep.mubr.f32.mxu1 %v7827_v0 }
 0x2ec   : > { %v2555_v6 = vpop.f32.mrf.mxu1 }
 0x2ed   : > { %v6497_v12 = vmax.f32 %v2554_v49, 0.0  ;;  %v2844_v21 = vsel %vm7830_vm1, %v2798_v36, %v2799_v44 }
 0x2ee   : > { %v2558_v62 = vpop.f32.mrf.mxu1  ;;  %3364 = vmatmul.mubr.f32.gmra.mxu1 %v2844_v21 }
 0x2ef   : > { %v2800_v43 = vrot.slane %v6497_v12, 1  ;;  %v2559_v46 = vadd.f32 %v6418_v31, %v2558_v62  ;;  %3369 = vmatprep.mubr.f32.mxu1 %v7827_v0 }
 0x2f0   : > { %v2560_v45 = vpop.f32.mrf.mxu1 }
 0x2f1   : > { %v6504_v26 = vmax.f32 %v2559_v46, 0.0  ;;  %v2843_v20 = vsel %vm7835_vm5, %v2799_v44, %v2800_v43 }
 0x2f2   : > { %v2563_v23 = vpop.f32.mrf.mxu1  ;;  %4355 = vmatmul.mubr.msk.f32.gmra.mxu1 %vm7759_vm8, %v2843_v20  ;;  %vm7837_vm8 = vmmov %vm7830_vm1 }
 0x2f3   : > { %v2801_v56 = vrot.slane %v6504_v26, 1  ;;  %v2564_v48 = vadd.f32 %v6418_v31, %v2563_v23  ;;  %3375 = vmatprep.mubr.f32.mxu1 %v7827_v0 }
 0x2f4   : > { %v2565_v24 = vpop.f32.mrf.mxu1 }
 0x2f5   : > { %v6513_v27 = vmax.f32 %v2564_v48, 0.0  ;;  %v2842_v63 = vsel %vm7836_vm7, %v2800_v43, %v2801_v56 }
 0x2f6   : > { %v2568_v9 = vpop.f32.mrf.mxu1  ;;  %3376 = vmatmul.mubr.f32.gmra.mxu1 %v2842_v63 }
 0x2f7   : > { %v2802_v36 = vrot.slane %v6513_v27, 1  ;;  %v2569_v51 = vadd.f32 %v6418_v31, %v2568_v9  ;;  %3381 = vmatprep.mubr.f32.mxu1 %v7827_v0 }
 0x2f8   : > { %v2570_v61 = vpop.f32.mrf.mxu1 }
 0x2f9   : > { %v6520_v32 = vmax.f32 %v2569_v51, 0.0  ;;  %v2841_v55 = vsel %vm7837_vm8, %v2801_v56, %v2802_v36 }
 0x2fa   : > { %v2573_v14 = vpop.f32.mrf.mxu1  ;;  %4356 = vmatmul.mubr.msk.f32.gmra.mxu1 %vm7761_vm0, %v2841_v55  ;;  %vm7839_vm0 = vmmov %vm7830_vm1 }
 0x2fb   : > { %v2803_v44 = vrot.slane %v6520_v32, 1  ;;  %v2574_v49 = vadd.f32 %v6418_v31, %v2573_v14  ;;  %3387 = vmatprep.mubr.f32.mxu1 %v7827_v0  ;;  %vm7840_vm14 = vmmov %vm7839_vm0 }
 0x2fc   : > { %v2575_v6 = vpop.f32.mrf.mxu1  ;;  %vm7842_vm4 = vmmov %vm7839_vm0 }
 0x2fd   : > { %v6529_v21 = vmax.f32 %v2574_v49, 0.0  ;;  %v2840_v62 = vsel %vm7838_vm2, %v2802_v36, %v2803_v44  ;;  %vm7844_vm1 = vmmov %vm7839_vm0  ;;  %vm7852_vm2 = vnez %v7804_v40 }
 0x2fe   : > { %v2578_v43 = vpop.f32.mrf.mxu1  ;;  %3388 = vmatmul.mubr.f32.gmra.mxu1 %v2840_v62  ;;  %vm7846_vm5 = vmmov %vm7839_vm0 }
 0x2ff   : > { %v2804_v46 = vrot.slane %v6529_v21, 1  ;;  %v2579_v45 = vadd.f32 %v6418_v31, %v2578_v43  ;;  %3393 = vmatprep.mubr.f32.mxu1 %v7827_v0  ;;  %vm7848_vm7 = vmmov %vm7839_vm0 }
 0x300   : > { %v2580_v25 = vpop.f32.mrf.mxu1  ;;  %vm7850_vm8 = vmmov %vm7839_vm0 }
 0x301   : > { %v6536_v20 = vmax.f32 %v2579_v45, 0.0  ;;  %v2839_v23 = vsel %vm7839_vm0, %v2803_v44, %v2804_v46 }
 0x302   : > { %v2583_v56 = vpop.f32.mrf.mxu1  ;;  %4357 = vmatmul.mubr.msk.f32.gmra.mxu1 %vm7763_vm15, %v2839_v23  ;;  %vm7841_vm15 = vmmov %vm7839_vm0 }
 0x303   : > { %v2805_v48 = vrot.slane %v6536_v20, 1  ;;  %v2584_v24 = vadd.f32 %v6418_v31, %v2583_v56  ;;  %3399 = vmatprep.mubr.f32.mxu1 %v7827_v0 }
 0x304   : > { %v2585_v63 = vpop.f32.mrf.mxu1 }
 0x305   : > { %v6545_v9 = vmax.f32 %v2584_v24, 0.0  ;;  %v2838_v36 = vsel %vm7840_vm14, %v2804_v46, %v2805_v48  ;;  %vm7853_vm14 = vmmov %vm7839_vm0 }
 0x306   : > { %v2588_v51 = vpop.f32.mrf.mxu1  ;;  %3400 = vmatmul.mubr.f32.gmra.mxu1 %v2838_v36 }
 0x307   : > { %v2806_v61 = vrot.slane %v6545_v9, 1  ;;  %v2589_v55 = vadd.f32 %v6418_v31, %v2588_v51  ;;  %3405 = vmatprep.mubr.f32.mxu1 %v7827_v0 }
 0x308   : > { %v2590_v52 = vpop.f32.mrf.mxu1 }
 0x309   : > { %v6552_v14 = vmax.f32 %v2589_v55, 0.0  ;;  %v2837_v44 = vsel %vm7841_vm15, %v2805_v48, %v2806_v61  ;;  %vm7854_vm15 = vnez %v7811_v30 }
 0x30a   : > { %v2593_v49 = vpop.f32.mrf.mxu1  ;;  %4358 = vmatmul.mubr.msk.f32.gmra.mxu1 %vm7765_vm11, %v2837_v44  ;;  %vm7843_vm11 = vmmov %vm7839_vm0 }
 0x30b   : > { %v2807_v6 = vrot.slane %v6552_v14, 1  ;;  %v2594_v62 = vadd.f32 %v6418_v31, %v2593_v49  ;;  %3411 = vmatprep.mubr.f32.mxu1 %v7827_v0 }
 0x30c   : > { %v2595_v43 = vpop.f32.mrf.mxu1 }
 0x30d   : > { %v6561_v46 = vmax.f32 %v2594_v62, 0.0  ;;  %v2836_v45 = vsel %vm7842_vm4, %v2806_v61, %v2807_v6  ;;  %vm7855_vm4 = vmmov %vm7839_vm0 }
 0x30e   : > { %v2598_v25 = vpop.f32.mrf.mxu1  ;;  %3412 = vmatmul.mubr.f32.gmra.mxu1 %v2836_v45 }
 0x30f   : > { %v2808_v23 = vrot.slane %v6561_v46, 1  ;;  %v2599_v56 = vadd.f32 %v6418_v31, %v2598_v25  ;;  %3417 = vmatprep.mubr.f32.mxu1 %v7827_v0 }
 0x310   : > { %v2600_v13 = vpop.f32.mrf.mxu1 }
 0x311   : > { %v6568_v48 = vmax.f32 %v2599_v56, 0.0  ;;  %v2835_v24 = vsel %vm7843_vm11, %v2807_v6, %v2808_v23  ;;  %vm7856_vm11 = vmmov %vm7839_vm0 }
 0x312   : > { %v2603_v63 = vpop.f32.mrf.mxu1  ;;  %4359 = vmatmul.mubr.msk.f32.gmra.mxu1 %vm7773_vm13, %v2835_v24  ;;  %vm7845_vm13 = vmmov %vm7839_vm0 }
 0x313   : > { %v2809_v36 = vrot.slane %v6568_v48, 1  ;;  %v2604_v51 = vadd.f32 %v6418_v31, %v2603_v63  ;;  %3423 = vmatprep.mubr.f32.mxu1 %v7827_v0 }
 0x314   : > { %v2605_v61 = vpop.f32.mrf.mxu1 }
 0x315   : > { %v6577_v55 = vmax.f32 %v2604_v51, 0.0  ;;  %v2834_v52 = vsel %vm7844_vm1, %v2808_v23, %v2809_v36  ;;  %vm7857_vm1 = vnez %v7818_v7  ;;  %v3587_v7 = vld [vmem:[%s7420_s7 + $0x78] sm:$0xff] }
 0x316   : > { %v2608_v44 = vpop.f32.mrf.mxu1  ;;  %3424 = vmatmul.mubr.f32.gmra.mxu1 %v2834_v52 }
 0x317   : > { %v2810_v49 = vrot.slane %v6577_v55, 1  ;;  %v2609_v6 = vadd.f32 %v6418_v31, %v2608_v44  ;;  %3429 = vmatprep.mubr.f32.mxu1 %v7827_v0 }
 0x318   : > { %v2610_v34 = vpop.f32.mrf.mxu1 }
 0x319   : > { %v6584_v62 = vmax.f32 %v2609_v6, 0.0  ;;  %v2833_v43 = vsel %vm7845_vm13, %v2809_v36, %v2810_v49  ;;  %vm7858_vm13 = vcmp.lt.s32.totalorder %v5037_v1, 1 }
 0x31a   : > { %v2613_v45 = vpop.f32.mrf.mxu1  ;;  %4360 = vmatmul.mubr.msk.f32.gmra.mxu1 %vm7781_vm10, %v2833_v43  ;;  %vm7847_vm10 = vmmov %vm7839_vm0 }
 0x31b   : > { %v2811_v25 = vrot.slane %v6584_v62, 1  ;;  %v2614_v23 = vadd.f32 %v6418_v31, %v2613_v45  ;;  %3435 = vmatprep.mubr.f32.mxu1 %v7827_v0 }
 0x31c   : > { %v2615_v56 = vpop.f32.mrf.mxu1 }
 0x31d   : > { %v6593_v13 = vmax.f32 %v2614_v23, 0.0  ;;  %v2832_v24 = vsel %vm7846_vm5, %v2810_v49, %v2811_v25  ;;  %vm7859_vm5 = vmmov %vm7839_vm0 }
 0x31e   : > { %v2618_v63 = vpop.f32.mrf.mxu1  ;;  %3436 = vmatmul.mubr.f32.gmra.mxu1 %v2832_v24 }
 0x31f   : > { %v2812_v36 = vrot.slane %v6593_v13, 1  ;;  %v2619_v51 = vadd.f32 %v6418_v31, %v2618_v63  ;;  %3441 = vmatprep.mubr.f32.mxu1 %v7827_v0 }
 0x320   : > { %v2620_v2 = vpop.f32.mrf.mxu1 }
 0x321   : > { %v6600_v61 = vmax.f32 %v2619_v51, 0.0  ;;  %v2831_v52 = vsel %vm7847_vm10, %v2811_v25, %v2812_v36 }
 0x322   : > { %v2623_v44 = vpop.f32.mrf.mxu1  ;;  %4361 = vmatmul.mubr.msk.f32.gmra.mxu1 %vm7789_vm12, %v2831_v52  ;;  %vm7849_vm12 = vmmov %vm7839_vm0 }
 0x323   : > { %v2813_v49 = vrot.slane %v6600_v61, 1  ;;  %v2624_v6 = vadd.f32 %v6418_v31, %v2623_v44  ;;  %3447 = vmatprep.mubr.f32.mxu1 %v7827_v0 }
 0x324   : > { %v2625_v34 = vpop.f32.mrf.mxu1 }
 0x325   : > { %v6609_v43 = vmax.f32 %v2624_v6, 0.0  ;;  %v2830_v45 = vsel %vm7848_vm7, %v2812_v36, %v2813_v49  ;;  %vm7862_vm7 = vmmov %vm7858_vm13 }
 0x326   : > { %v2628_v23 = vpop.f32.mrf.mxu1  ;;  %3448 = vmatmul.mubr.f32.gmra.mxu1 %v2830_v45 }
 0x327   : > { %v2814_v25 = vrot.slane %v6609_v43, 1  ;;  %v2629_v56 = vadd.f32 %v6418_v31, %v2628_v23  ;;  %3453 = vmatprep.mubr.f32.mxu1 %v7827_v0 }
 0x328   : > { %v2630_v57 = vpop.f32.mrf.mxu1 }
 0x329   : > { %v6616_v24 = vmax.f32 %v2629_v56, 0.0  ;;  %v2829_v63 = vsel %vm7849_vm12, %v2813_v49, %v2814_v25  ;;  %vm7863_vm12 = vmmov %vm7839_vm0 }
 0x32a   : > { %v2633_v51 = vpop.f32.mrf.mxu1  ;;  %4362 = vmatmul.mubr.msk.f32.gmra.mxu1 %vm7797_vm6, %v2829_v63  ;;  %vm7851_vm6 = vmmov %vm7839_vm0 }
 0x32b   : > { %v2815_v36 = vrot.slane %v6616_v24, 1  ;;  %v2634_v2 = vadd.f32 %v6418_v31, %v2633_v51  ;;  %3459 = vmatprep.mubr.f32.mxu1 %v7827_v0 }
 0x32c   : > { %v2635_v52 = vpop.f32.mrf.mxu1 }
 0x32d   : > { %v6625_v44 = vmax.f32 %v2634_v2, 0.0  ;;  %v2828_v6 = vsel %vm7850_vm8, %v2814_v25, %v2815_v36  ;;  %vm7864_vm8 = vmmov %vm7862_vm7 }
 0x32e   : > { %v2638_v34 = vpop.f32.mrf.mxu1  ;;  %3460 = vmatmul.mubr.f32.gmra.mxu1 %v2828_v6 }
 0x32f   : > { %v2816_v49 = vrot.slane %v6625_v44, 1  ;;  %v2639_v45 = vadd.f32 %v6418_v31, %v2638_v34  ;;  %3465 = vmatprep.mubr.f32.mxu1 %v7827_v0 }
 0x330   : > { %v2640_v53 = vpop.f32.mrf.mxu1 }
 0x331   : > { %v6632_v23 = vmax.f32 %v2639_v45, 0.0  ;;  %v2827_v56 = vsel %vm7851_vm6, %v2815_v36, %v2816_v49  ;;  %vm7866_vm6 = vmmov %vm7862_vm7 }
 0x332   : > { %v2643_v57 = vpop.f32.mrf.mxu1  ;;  %4363 = vmatmul.mubr.msk.f32.gmra.mxu1 %vm7852_vm2, %v2827_v56  ;;  %vm7867_vm2 = vmmov %vm7866_vm6 }
 0x333   : > { %v2817_v25 = vrot.slane %v6632_v23, 1  ;;  %v2644_v63 = vadd.f32 %v6418_v31, %v2643_v57  ;;  %3471 = vmatprep.mubr.f32.mxu1 %v7827_v0 }
 0x334   : > { %v2645_v51 = vpop.f32.mrf.mxu1 }
 0x335   : > { %v6641_v2 = vmax.f32 %v2644_v63, 0.0  ;;  %v2826_v52 = vsel %vm7839_vm0, %v2816_v49, %v2817_v25  ;;  %vm7868_vm0 = vnez %v7584_v42 }
 0x336   : > { %v2648_v6 = vpop.f32.mrf.mxu1  ;;  %3472 = vmatmul.mubr.f32.gmra.mxu1 %v2826_v52 }
 0x337   : > { %v2818_v36 = vrot.slane %v6641_v2, 1  ;;  %v2649_v34 = vadd.f32 %v6418_v31, %v2648_v6  ;;  %3477 = vmatprep.mubr.f32.mxu1 %v7827_v0 }
 0x338   : > { %v2650_v40 = vpop.f32.mrf.mxu1 }
 0x339   : > { %v6648_v45 = vmax.f32 %v2649_v34, 0.0  ;;  %v2825_v53 = vsel %vm7853_vm14, %v2817_v25, %v2818_v36  ;;  %vm7869_vm14 = vmmov %vm7867_vm2 }
 0x33a   : > { %v2653_v56 = vpop.f32.mrf.mxu1  ;;  %4364 = vmatmul.mubr.msk.f32.gmra.mxu1 %vm7854_vm15, %v2825_v53  ;;  %vm7870_vm15 = vmmov %vm7867_vm2 }
 0x33b   : > { %v2819_v49 = vrot.slane %v6648_v45, 1  ;;  %v2654_v57 = vadd.f32 %v6418_v31, %v2653_v56  ;;  %3483 = vmatprep.mubr.f32.mxu1 %v7827_v0  ;;  %v2694_v56 = vrot.slane %v6421_v22, 7  ;;  %v3584_v22 = vld [vmem:[%s7420_s7 + $0x60] sm:$0xff] }
 0x33c   : > { %v2655_v63 = vpop.f32.mrf.mxu1 }
 0x33d   : > { %v6657_v51 = vmax.f32 %v2654_v57, 0.0  ;;  %v2824_v52 = vsel %vm7855_vm4, %v2818_v36, %v2819_v49  ;;  %vm7871_vm4 = vnez %v7589_v16 }
 0x33e   : > { %v2658_v6 = vpop.f32.mrf.mxu1  ;;  %3484 = vmatmul.mubr.f32.gmra.mxu1 %v2824_v52  ;;  %v7860_v52 = vld [vmem:[#allocation21_spill] sm:$0xff] }
 0x33f   : > { %v2820_v25 = vrot.slane %v6657_v51, 1  ;;  %v2659_v34 = vadd.f32 %v6418_v31, %v2658_v6  ;;  %3489 = vmatprep.mubr.f32.mxu1 %v7827_v0  ;;  %v2695_v31 = vrot.slane %v6426_v41, 7  ;;  %vm7861_vm10 = vnez %v7860_v52  ;;  %v3586_v6 = vld [vmem:[%s7420_s7 + $0x70] sm:$0xff]  ;;  %v3576_v52 = vld [vmem:[%s7420_s7 + $0x20] sm:$0xff] }
 0x340   : > { %v2660_v30 = vpop.f32.mrf.mxu1 }
 0x341   : > { %v6664_v40 = vmax.f32 %v2659_v34, 0.0  ;;  %v2823_v53 = vsel %vm7856_vm11, %v2819_v49, %v2820_v25  ;;  %v2696_v34 = vrot.slane %v6431_v18, 7  ;;  %vm7872_vm11 = vmmov %vm7867_vm2 }
 0x342   : > { %4365 = vmatmul.mubr.msk.f32.gmra.mxu1 %vm7857_vm1, %v2823_v53  ;;  %vm7873_vm1 = vmmov %vm7867_vm2 }
 0x343   : > { %v2725_v36 = vrot.slane %v6664_v40, 7  ;;  %v2821_v57 = vrot.slane %v6664_v40, 1  ;;  %3495 = vmatprep.mubr.f32.mxu1 %v7827_v0  ;;  %v2755_v53 = vsel %vm7864_vm8, %v2695_v31, %v2696_v34  ;;  %vm7879_vm8 = vmmov %vm7873_vm1 }
 0x345   : > { %v2757_v63 = vsel %vm7858_vm13, %v2725_v36, %v2694_v56  ;;  %v2822_v49 = vsel %vm7859_vm5, %v2820_v25, %v2821_v57  ;;  %v2756_v25 = vsel %vm7862_vm7, %v2694_v56, %v2695_v31  ;;  %v2853_v30 = vsel %vm7863_vm12, %v2821_v57, %v2790_v5  ;;  %v3580_v57 = vld [vmem:[%s7420_s7 + $0x40] sm:$0xff]  ;;  %vm7875_vm5 = vmmov %vm7873_vm1 }
 0x346   : > { %4335 = vmatmul.mubr.msk.f32.vlgmr.msra.gmra.mxu0 %vm7861_vm10, %v2757_v63  ;;  %3496 = vmatmul.mubr.f32.gmra.mxu1 %v2822_v49  ;;  %v2697_v5 = vrot.slane %v6440_v19, 7  ;;  %v2698_v56 = vrot.slane %v6449_v60, 7  ;;  %v2699_v31 = vrot.slane %v6456_v39, 7  ;;  %v3578_v49 = vld [vmem:[%s7420_s7 + $0x30] sm:$0xff]  ;;  %vm7874_vm13 = vnez %v7593_v29  ;;  %vm7876_vm10 = vmmov %vm7873_vm1 }
 0x347   : > { %3064 = vmatprep.mubr.f32.mxu0 %v6426_v41  ;;  %3501 = vmatprep.mubr.f32.mxu1 %v7827_v0  ;;  %v3585_v41 = vld [vmem:[%s7420_s7 + $0x68] sm:$0xff]  ;;  %vm7877_vm7 = vnez %v7597_v8  ;;  %vm7878_vm12 = vmmov %vm7873_vm1 }
 0x348   : > { %3612 = vmatpush1.msra.mxu0 %v3587_v7  ;;  %v2753_v63 = vsel %vm7867_vm2, %v2697_v5, %v2698_v56  ;;  %v2700_v7 = vrot.slane %v6465_v33, 7  ;;  %v2752_v42 = vsel %vm7869_vm14, %v2698_v56, %v2699_v31  ;;  %v2705_v56 = vrot.slane %v6504_v26, 7  ;;  %vm7882_vm2 = vmmov %vm7873_vm1 }
 0x349   : > { %3613 = vmatprep.subr.mxu0 %v7827_v0  ;;  %vm7884_vm14 = vmmov %vm7873_vm1 }
 0x34a   : > { %3065 = vmatmul.mubr.f32.gmra.mxu0 %v2756_v25  ;;  %4366 = vmatmul.mubr.msk.f32.gmra.mxu1 %vm7826_vm3, %v2853_v30  ;;  %vm7865_vm3 = vnez %v7574_v28  ;;  %v2754_v28 = vsel %vm7866_vm6, %v2696_v34, %v2697_v5  ;;  %v2751_v34 = vsel %vm7870_vm15, %v2699_v31, %v2700_v7  ;;  %v3574_v25 = vld [vmem:[%s7420_s7 + $0x10] sm:$0xff]  ;;  %v2702_v30 = vrot.slane %v6481_v15, 7  ;;  %v3596_v31 = vld [vmem:[%s7420_s7 + $0xc0] sm:$0xff]  ;;  %vm7881_vm6 = vmmov %vm7873_vm1 }
 0x34b   : > { %3070 = vmatprep.mubr.f32.mxu0 %v6431_v18  ;;  %3614 = vmatpush1.msra.mxu0 %v3586_v6  ;;  %v3582_v18 = vld [vmem:[%s7420_s7 + $0x50] sm:$0xff]  ;;  %v2701_v6 = vrot.slane %v6472_v58, 7  ;;  %vm7885_vm15 = vmmov %vm7873_vm1 }
 0x34c   : > { %3615 = vmatprep.subr.mxu0 %v7827_v0 }
 0x34d   : > { %3616 = vmatpush1.msra.mxu0 %v3585_v41  ;;  %v2750_v16 = vsel %vm7872_vm11, %v2700_v7, %v2701_v6  ;;  %v3572_v41 = vld [vmem:[%s7420_s7] sm:$0xff]  ;;  %v2749_v5 = vsel %vm7873_vm1, %v2701_v6, %v2702_v30  ;;  %v2708_v7 = vrot.slane %v6529_v21, 7  ;;  %v2710_v6 = vrot.slane %v6545_v9, 7  ;;  %vm7887_vm11 = vmmov %vm7873_vm1 }
 0x34e   : > { %4336 = vmatmul.mubr.msk.f32.gmra.mxu0 %vm7865_vm3, %v2755_v53  ;;  %3617 = vmatprep.subr.mxu0 %v7827_v0  ;;  %v3602_v53 = vld [vmem:[%s7420_s7 + $0xf0] sm:$0xff]  ;;  %vm7880_vm3 = vnez %v7601_v17 }
 0x34f   : > { %3076 = vmatprep.mubr.f32.mxu0 %v6440_v19  ;;  %3618 = vmatpush1.msra.mxu0 %v3584_v22  ;;  %v3581_v19 = vld [vmem:[%s7420_s7 + $0x48] sm:$0xff]  ;;  %v2703_v22 = vrot.slane %v6488_v35, 7 }
 0x350   : > { %3619 = vmatprep.subr.mxu0 %v7827_v0 }
 0x351   : > { %3620 = vmatpush1.msra.mxu0 %v3583_v11  ;;  %v2704_v11 = vrot.slane %v6497_v12, 7  ;;  %v2748_v29 = vsel %vm7875_vm5, %v2702_v30, %v2703_v22  ;;  %v3589_v30 = vld [vmem:[%s7420_s7 + $0x88] sm:$0xff]  ;;  %vm7889_vm5 = vmmov %vm7873_vm1 }
 0x352   : > { %3077 = vmatmul.mubr.f32.gmra.mxu0 %v2754_v28  ;;  %3621 = vmatprep.subr.mxu0 %v7827_v0 }
 0x353   : > { %3082 = vmatprep.mubr.f32.mxu0 %v6449_v60  ;;  %3622 = vmatpush1.msra.mxu0 %v3582_v18  ;;  %v3579_v60 = vld [vmem:[%s7420_s7 + $0x38] sm:$0xff]  ;;  %v3600_v18 = vld [vmem:[%s7420_s7 + $0xe0] sm:$0xff]  ;;  %v2747_v28 = vsel %vm7876_vm10, %v2703_v22, %v2704_v11  ;;  %v2746_v8 = vsel %vm7878_vm12, %v2704_v11, %v2705_v56  ;;  %vm7890_vm10 = vmmov %vm7873_vm1 }
 0x354   : > { %3623 = vmatprep.subr.mxu0 %v7827_v0  ;;  %vm7892_vm12 = vmmov %vm7873_vm1 }
 0x355   : > { %3624 = vmatpush1.msra.mxu0 %v3581_v19  ;;  %v3598_v19 = vld [vmem:[%s7420_s7 + $0xd0] sm:$0xff] }
 0x356   : > { %4337 = vmatmul.mubr.msk.f32.gmra.mxu0 %vm7868_vm0, %v2753_v63  ;;  %3625 = vmatprep.subr.mxu0 %v7827_v0  ;;  %v2707_v63 = vrot.slane %v6520_v32, 7  ;;  %vm7883_vm0 = vnez %v7605_v37  ;;  %v3590_v37 = vld [vmem:[%s7420_s7 + $0x90] sm:$0xff] }
 0x357   : > { %3088 = vmatprep.mubr.f32.mxu0 %v6456_v39  ;;  %3626 = vmatpush1.msra.mxu0 %v3580_v57  ;;  %v3577_v39 = vld [vmem:[%s7420_s7 + $0x28] sm:$0xff]  ;;  %v2706_v57 = vrot.slane %v6513_v27, 7 }
 0x358   : > { %3627 = vmatprep.subr.mxu0 %v7827_v0 }
 0x359   : > { %3628 = vmatpush1.msra.mxu0 %v3579_v60  ;;  %v2745_v60 = vsel %vm7879_vm8, %v2705_v56, %v2706_v57  ;;  %v2744_v17 = vsel %vm7881_vm6, %v2706_v57, %v2707_v63  ;;  %vm7893_vm8 = vmmov %vm7873_vm1 }
 0x35a   : > { %3089 = vmatmul.mubr.f32.gmra.mxu0 %v2752_v42  ;;  %3629 = vmatprep.subr.mxu0 %v7827_v0  ;;  %v3592_v42 = vld [vmem:[%s7420_s7 + $0xa0] sm:$0xff]  ;;  %vm7895_vm6 = vmmov %vm7873_vm1 }
 0x35b   : > { %3094 = vmatprep.mubr.f32.mxu0 %v6465_v33  ;;  %3630 = vmatpush1.msra.mxu0 %v3578_v49  ;;  %v3575_v33 = vld [vmem:[%s7420_s7 + $0x18] sm:$0xff]  ;;  %v3594_v49 = vld [vmem:[%s7420_s7 + $0xb0] sm:$0xff] }
 0x35c   : > { %3631 = vmatprep.subr.mxu0 %v7827_v0 }
 0x35d   : > { %3632 = vmatpush1.msra.mxu0 %v3577_v39  ;;  %v2709_v39 = vrot.slane %v6536_v20, 7 }
 0x35e   : > { %4338 = vmatmul.mubr.msk.f32.gmra.mxu0 %vm7871_vm4, %v2751_v34  ;;  %3633 = vmatprep.subr.mxu0 %v7827_v0  ;;  %vm7886_vm4 = vnez %v7769_v47  ;;  %v2713_v47 = vrot.slane %v6568_v48, 7 }
 0x35f   : > { %3100 = vmatprep.mubr.f32.mxu0 %v6472_v58  ;;  %3634 = vmatpush1.msra.mxu0 %v3576_v52  ;;  %v3573_v58 = vld [vmem:[%s7420_s7 + $0x8] sm:$0xff]  ;;  %v2743_v52 = vsel %vm7882_vm2, %v2707_v63, %v2708_v7  ;;  %v2742_v34 = vsel %vm7884_vm14, %v2708_v7, %v2709_v39  ;;  %vm7896_vm2 = vmmov %vm7873_vm1 }
 0x360   : > { %3635 = vmatprep.subr.mxu0 %v7827_v0  ;;  %vm7898_vm14 = vmmov %vm7873_vm1 }
 0x361   : > { %3636 = vmatpush1.msra.mxu0 %v3575_v33  ;;  %v2741_v33 = vsel %vm7885_vm15, %v2709_v39, %v2710_v6  ;;  %vm7899_vm15 = vmmov %vm7873_vm1 }
 0x362   : > { %3101 = vmatmul.mubr.f32.gmra.mxu0 %v2750_v16  ;;  %3637 = vmatprep.subr.mxu0 %v7827_v0 }
 0x363   : > { %3106 = vmatprep.mubr.f32.mxu0 %v6481_v15  ;;  %3638 = vmatpush1.msra.mxu0 %v3574_v25  ;;  %v3603_v15 = vld [vmem:[%s7420_s7 + $0xf8] sm:$0xff]  ;;  %v2712_v25 = vrot.slane %v6561_v46, 7 }
 0x364   : > { %3639 = vmatprep.subr.mxu0 %v7827_v0 }
 0x365   : > { %3640 = vmatpush1.msra.mxu0 %v3573_v58  ;;  %v2738_v22 = vsel %vm7889_vm5, %v2712_v25, %v2713_v47  ;;  %vm7903_vm5 = vmmov %vm7873_vm1 }
 0x366   : > { %4339 = vmatmul.mubr.msk.f32.gmra.mxu0 %vm7874_vm13, %v2749_v5  ;;  %3641 = vmatprep.subr.mxu0 %v7827_v0  ;;  %vm7888_vm13 = vnez %v7777_v3  ;;  %v2715_v3 = vrot.slane %v6584_v62, 7 }
 0x367   : > { %3112 = vmatprep.mubr.f32.mxu0 %v6488_v35  ;;  %3642 = vmatpush1.msra.mxu0 %v3572_v41  ;;  %v3601_v35 = vld [vmem:[%s7420_s7 + $0xe8] sm:$0xff]  ;;  %v2714_v41 = vrot.slane %v6577_v55, 7 }
 0x368   : > { %3643 = vmatprep.subr.mxu0 %v7827_v0 }
 0x369   : > { %3644 = vmatpush2.msra.mxu0 %v3603_v15  ;;  %v2716_v15 = vrot.slane %v6593_v13, 7 }
 0x36a   : > { %3113 = vmatmul.mubr.f32.gmra.mxu0 %v2748_v29  ;;  %3645 = vmatprep.subr.mxu0 %v7827_v0 }
 0x36b   : > { %3118 = vmatprep.mubr.f32.mxu0 %v6497_v12  ;;  %3646 = vmatpush2.msra.mxu0 %v3602_v53  ;;  %v3599_v12 = vld [vmem:[%s7420_s7 + $0xd8] sm:$0xff]  ;;  %v2736_v53 = vsel %vm7892_vm12, %v2714_v41, %v2715_v3  ;;  %v2735_v29 = vsel %vm7893_vm8, %v2715_v3, %v2716_v15 }
 0x36c   : > { %3647 = vmatprep.subr.mxu0 %v7827_v0 }
 0x36d   : > { %3648 = vmatpush2.msra.mxu0 %v3601_v35 }
 0x36e   : > { %4340 = vmatmul.mubr.msk.f32.gmra.mxu0 %vm7877_vm7, %v2747_v28  ;;  %3649 = vmatprep.subr.mxu0 %v7827_v0  ;;  %vm7891_vm7 = vnez %v7785_v38  ;;  %v2718_v38 = vrot.slane %v6609_v43, 7 }
 0x36f   : > { %3124 = vmatprep.mubr.f32.mxu0 %v6504_v26  ;;  %3650 = vmatpush2.msra.mxu0 %v3600_v18  ;;  %v3597_v26 = vld [vmem:[%s7420_s7 + $0xc8] sm:$0xff] }
 0x370   : > { %3651 = vmatprep.subr.mxu0 %v7827_v0 }
 0x371   : > { %3652 = vmatpush2.msra.mxu0 %v3599_v12 }
 0x372   : > { %3125 = vmatmul.mubr.f32.gmra.mxu0 %v2746_v8  ;;  %3653 = vmatprep.subr.mxu0 %v7827_v0 }
 0x373   : > { %3130 = vmatprep.mubr.f32.mxu0 %v6513_v27  ;;  %3654 = vmatpush2.msra.mxu0 %v3598_v19  ;;  %v3595_v27 = vld [vmem:[%s7420_s7 + $0xb8] sm:$0xff] }
 0x374   : > { %3655 = vmatprep.subr.mxu0 %v7827_v0 }
 0x375   : > { %3656 = vmatpush2.msra.mxu0 %v3597_v26 }
 0x376   : > { %4341 = vmatmul.mubr.msk.f32.gmra.mxu0 %vm7880_vm3, %v2745_v60  ;;  %3657 = vmatprep.subr.mxu0 %v7827_v0  ;;  %vm7894_vm3 = vnez %v7793_v4  ;;  %v2720_v4 = vrot.slane %v6625_v44, 7 }
 0x377   : > { %3136 = vmatprep.mubr.f32.mxu0 %v6520_v32  ;;  %3658 = vmatpush2.msra.mxu0 %v3596_v31  ;;  %v3593_v32 = vld [vmem:[%s7420_s7 + $0xa8] sm:$0xff] }
 0x378   : > { %3659 = vmatprep.subr.mxu0 %v7827_v0 }
 0x379   : > { %3660 = vmatpush2.msra.mxu0 %v3595_v27 }
 0x37a   : > { %3137 = vmatmul.mubr.f32.gmra.mxu0 %v2744_v17  ;;  %3661 = vmatprep.subr.mxu0 %v7827_v0 }
 0x37b   : > { %3142 = vmatprep.mubr.f32.mxu0 %v6529_v21  ;;  %3662 = vmatpush2.msra.mxu0 %v3594_v49  ;;  %v3591_v21 = vld [vmem:[%s7420_s7 + $0x98] sm:$0xff] }
 0x37c   : > { %3663 = vmatprep.subr.mxu0 %v7827_v0 }
 0x37d   : > { %3664 = vmatpush2.msra.mxu0 %v3593_v32 }
 0x37e   : > { %4342 = vmatmul.mubr.msk.f32.gmra.mxu0 %vm7883_vm0, %v2743_v52  ;;  %3665 = vmatprep.subr.mxu0 %v7827_v0  ;;  %vm7897_vm0 = vnez %v7801_v59  ;;  %v2722_v59 = vrot.slane %v6641_v2, 7 }
 0x37f   : > { %3148 = vmatprep.mubr.f32.mxu0 %v6536_v20  ;;  %3666 = vmatpush2.msra.mxu0 %v3592_v42  ;;  %v2711_v20 = vrot.slane %v6552_v14, 7 }
 0x380   : > { %3667 = vmatprep.subr.mxu0 %v7827_v0 }
 0x381   : > { %3668 = vmatpush2.msra.mxu0 %v3591_v21  ;;  %v2739_v16 = vsel %vm7873_vm1, %v2711_v20, %v2712_v25 }
 0x382   : > { %3149 = vmatmul.mubr.f32.gmra.mxu0 %v2742_v34  ;;  %3669 = vmatprep.subr.mxu0 %v7827_v0 }
 0x383   : > { %3154 = vmatprep.mubr.f32.mxu0 %v6545_v9  ;;  %3670 = vmatpush2.msra.mxu0 %v3590_v37  ;;  %v2740_v9 = vsel %vm7887_vm11, %v2710_v6, %v2711_v20  ;;  %vm7901_vm11 = vmmov %vm7873_vm1  ;;  %v2986_v37 = vsub.s32 0, %v5037_v1  ;;  %v2982_v20 = vld [vmem:[%s7419_s6] sm:$0x3] }
 0x384   : > { %3671 = vmatprep.subr.mxu0 %v7827_v0 }
 0x385   : > { %3672 = vmatpush2.msra.mxu0 %v3589_v30 }
 0x386   : > { %4343 = vmatmul.mubr.msk.f32.gmra.mxu0 %vm7886_vm4, %v2741_v33  ;;  %3673 = vmatprep.subr.mxu0 %v7827_v0  ;;  %vm7900_vm4 = vnez %v7809_v10  ;;  %v2724_v10 = vrot.slane %v6657_v51, 7  ;;  %v2990_v33 = vsub.s32 1, %v5037_v1 }
 0x387   : > { %3160 = vmatprep.mubr.f32.mxu0 %v6552_v14 }
 0x388   : > { %v7040_v30 = vrot.slane %v2982_v20, %v2990_v33 }
 0x38a   : > { %3161 = vmatmul.mubr.f32.gmra.mxu0 %v2740_v9  ;;  %v7038_v9 = vrot.slane %v2982_v20, %v2986_v37 }
 0x38b   : > { %3166 = vmatprep.mubr.f32.mxu0 %v6561_v46  ;;  %v3588_v46 = vld [vmem:[%s7420_s7 + $0x80] sm:$0xff] }
 0x38c   : > { %3674 = vmatpush2.msra.mxu0 %v3588_v46 }
 0x38e   : > { %4344 = vmatmul.mubr.msk.f32.gmra.mxu0 %vm7888_vm13, %v2739_v16  ;;  %v6904_v14 = vpop.f32.mrf.mxu1  ;;  %vm7902_vm13 = vnez %v7816_v54 }
 0x38f   : > { %3172 = vmatprep.mubr.f32.mxu0 %v6568_v48  ;;  %v2737_v48 = vsel %vm7890_vm10, %v2713_v47, %v2714_v41  ;;  %vm7904_vm10 = vmmov %vm7873_vm1 }
 0x390   : > { %v6910_v58 = vpop.f32.mrf.mxu1 }
 0x392   : > { %3173 = vmatmul.mubr.f32.gmra.mxu0 %v2738_v22  ;;  %v6915_v0 = vpop.f32.mrf.mxu1 }
 0x393   : > { %3178 = vmatprep.mubr.f32.mxu0 %v6577_v55  ;;  %v2717_v55 = vrot.slane %v6600_v61, 7 }
 0x394   : > { %v6921_v5 = vpop.f32.mrf.mxu1 }
 0x395   : > { %v2733_v56 = vsel %vm7896_vm2, %v2717_v55, %v2718_v38 }
 0x396   : > { %4345 = vmatmul.mubr.msk.f32.gmra.mxu0 %vm7891_vm7, %v2737_v48  ;;  %v6929_v11 = vpop.f32.mrf.mxu1  ;;  %vm7905_vm7 = vmmov %vm7873_vm1 }
 0x397   : > { %3184 = vmatprep.mubr.f32.mxu0 %v6584_v62  ;;  %v2734_v62 = vsel %vm7895_vm6, %v2716_v15, %v2717_v55  ;;  %v2726_v54 = vsel %vm7905_vm7, %v2724_v10, %v2725_v36 }
 0x398   : > { %v6935_v35 = vpop.f32.mrf.mxu1 }
 0x39a   : > { %3185 = vmatmul.mubr.f32.gmra.mxu0 %v2736_v53  ;;  %v6943_v18 = vpop.f32.mrf.mxu1 }
 0x39b   : > { %3190 = vmatprep.mubr.f32.mxu0 %v6593_v13  ;;  %v2719_v13 = vrot.slane %v6616_v24, 7 }
 0x39c   : > { %v6949_v28 = vpop.f32.mrf.mxu1 }
 0x39d   : > { %v2731_v19 = vsel %vm7899_vm15, %v2719_v13, %v2720_v4 }
 0x39e   : > { %4346 = vmatmul.mubr.msk.f32.gmra.mxu0 %vm7894_vm3, %v2735_v29  ;;  %v6957_v12 = vpop.f32.mrf.mxu1  ;;  %v3883_v29 = vld [vmem:[%s7422_s9 + $0x78] sm:$0xff] }
 0x39f   : > { %3196 = vmatprep.mubr.f32.mxu0 %v6600_v61  ;;  %v2732_v61 = vsel %vm7898_vm14, %v2718_v38, %v2719_v13  ;;  %4598 = vmatprep.subr.mxu1 %v3883_v29 }
 0x3a0   : > { %v6963_v57 = vpop.f32.mrf.mxu1  ;;  %4518 = vmatprep.subr.mxu0 %v3883_v29  ;;  %4614 = vmatpush3.msra.mxu1 %v3883_v29 }
 0x3a2   : > { %3197 = vmatmul.mubr.f32.gmra.mxu0 %v2734_v62  ;;  %v6971_v8 = vpop.f32.mrf.mxu1 }
 0x3a3   : > { %3202 = vmatprep.mubr.f32.mxu0 %v6609_v43  ;;  %v2721_v43 = vrot.slane %v6632_v23, 7 }
 0x3a4   : > { %v6977_v31 = vpop.f32.mrf.mxu1 }
 0x3a5   : > { %v2729_v26 = vsel %vm7873_vm1, %v2721_v43, %v2722_v59 }
 0x3a6   : > { %4347 = vmatmul.mubr.msk.f32.gmra.mxu0 %vm7897_vm0, %v2733_v56  ;;  %v6985_v63 = vpop.f32.mrf.mxu1 }
 0x3a7   : > { %3208 = vmatprep.mubr.f32.mxu0 %v6616_v24  ;;  %v2730_v24 = vsel %vm7901_vm11, %v2720_v4, %v2721_v43 }
 0x3a8   : > { %v6990_v60 = vpop.f32.mrf.mxu1 }
 0x3aa   : > { %3209 = vmatmul.mubr.f32.gmra.mxu0 %v2732_v61 }
 0x3ab   : > { %3214 = vmatprep.mubr.f32.mxu0 %v6625_v44  ;;  %v2723_v44 = vrot.slane %v6648_v45, 7 }
 0x3ae   : > { %4348 = vmatmul.mubr.msk.f32.gmra.mxu0 %vm7900_vm4, %v2731_v19 }
 0x3af   : > { %3220 = vmatprep.mubr.f32.mxu0 %v6632_v23  ;;  %v2728_v23 = vsel %vm7903_vm5, %v2722_v59, %v2723_v44  ;;  %v3881_v59 = vld [vmem:[%s7422_s9 + $0x68] sm:$0xff] }
 0x3b2   : > { %3221 = vmatmul.mubr.f32.gmra.mxu0 %v2730_v24 }
 0x3b3   : > { %3226 = vmatprep.mubr.f32.mxu0 %v6641_v2  ;;  %v2727_v2 = vsel %vm7904_vm10, %v2723_v44, %v2724_v10 }
 0x3b6   : > { %4349 = vmatmul.mubr.msk.f32.gmra.mxu0 %vm7902_vm13, %v2729_v26 }
 0x3b7   : > { %3232 = vmatprep.mubr.f32.mxu0 %v6648_v45  ;;  %v6999_v45 = vpop.f32.mrf.mxu1 }
 0x3b9   : > { %v7001_v27 = vpop.f32.mrf.mxu1 }
 0x3ba   : > { %3233 = vmatmul.mubr.f32.gmra.mxu0 %v2728_v23 }
 0x3bb   : > { %3238 = vmatprep.mubr.f32.mxu0 %v6657_v51  ;;  %v7003_v51 = vpop.f32.mrf.mxu1 }
 0x3bd   : > { %v7005_v49 = vpop.f32.mrf.mxu1 }
 0x3be   : > { %4350 = vmatmul.mubr.msk.f32.gmra.mxu0 %vm5772_vm9, %v2727_v2 }
 0x3bf   : > { %3244 = vmatprep.mubr.f32.mxu0 %v6664_v40  ;;  %v7007_v7 = vpop.f32.mrf.mxu1 }
 0x3c1   : > { %v7009_v50 = vpop.f32.mrf.mxu1 }
 0x3c2   : > { %3245 = vmatmul.mubr.f32.gmra.mxu0 %v2726_v54  ;;  %v3880_v54 = vld [vmem:[%s7422_s9 + $0x60] sm:$0xff] }
 0x3c3   : > { %v7011_v17 = vpop.f32.mrf.mxu1 }
 0x3c5   : > { %v7013_v32 = vpop.f32.mrf.mxu1 }
 0x3c7   : > { %v7015_v40 = vpop.f32.mrf.mxu1 }
 0x3c9   : > { %v7017_v36 = vpop.f32.mrf.mxu1 }
 0x3cb   : > { %v7019_v42 = vpop.f32.mrf.mxu1 }
 0x3cd   : > { %v7021_v39 = vpop.f32.mrf.mxu1 }
 0x3cf   : > { %v7023_v52 = vpop.f32.mrf.mxu1 }
 0x3d1   : > { %v7025_v21 = vpop.f32.mrf.mxu1 }
 0x3d3   : > { %v7027_v6 = vpop.f32.mrf.mxu1 }
 0x3d5   : > { %v7029_v34 = vpop.f32.mrf.mxu1 }
 0x3d7   : > { %v7036_v25 = vpop.f32.mrf.mxu1 }
 0x3d9   : > { %v7042_v47 = vpop.f32.mrf.mxu1 }
 0x3db   : > { %v7046_v3 = vpop.f32.mrf.mxu1 }
 0x3dd   : > { %v7055_v13 = vpop.f32.mrf.mxu1 }
 0x3df   : > { %v7067_v44 = vpop.f32.mrf.mxu1 }
 0x406   : > { %v3060_v16 = vpop.f32.mrf.mxu0 }
 0x407   : > { %v3061_v46 = vadd.f32 %v3060_v16, %v7038_v9 }
 0x408   : > { %v3062_v41 = vpop.f32.mrf.mxu0 }
 0x409   : > { %v3063_v22 = vadd.f32 %v3062_v41, %v7040_v30  ;;  %v3318_v48 = vadd.f32 %v6904_v14, %v3061_v46 }
 0x40a   : > { %v3066_v15 = vpop.f32.mrf.mxu0 }
 0x40b   : > { %v3320_v1 = vadd.f32 %v6910_v58, %v3063_v22  ;;  %v3067_v53 = vadd.f32 %v3066_v15, %v7038_v9  ;;  %v3508_v56 = vmax.f32 %v3318_v48, 0.0  ;;  %v3882_v58 = vld [vmem:[%s7422_s9 + $0x70] sm:$0xff] }
 0x40c   : > { %v3068_v55 = vpop.f32.mrf.mxu0  ;;  %4599 = vmatprep.subr.mxu1 %v3882_v58 }
 0x40d   : > { %v3069_v38 = vadd.f32 %v3068_v55, %v7040_v30  ;;  %v3509_v62 = vmax.f32 %v3320_v1, 0.0  ;;  %v3324_v14 = vadd.f32 %v6915_v0, %v3067_v53  ;;  %4615 = vmatpush3.msra.mxu1 %v3882_v58  ;;  %v3878_v1 = vld [vmem:[%s7422_s9 + $0x50] sm:$0xff] }
 0x40e   : > { %v3072_v4 = vpop.f32.mrf.mxu0  ;;  %4600 = vmatprep.subr.mxu1 %v3881_v59 }
 0x40f   : > { %v3326_v61 = vadd.f32 %v6921_v5, %v3069_v38  ;;  %v3073_v43 = vadd.f32 %v3072_v4, %v7038_v9  ;;  %3675 = vmatprep.mubr.f32.mxu0 %v3509_v62  ;;  %v3510_v26 = vmax.f32 %v3324_v14, 0.0  ;;  %4616 = vmatpush3.msra.mxu1 %v3881_v59  ;;  %v3877_v14 = vld [vmem:[%s7422_s9 + $0x48] sm:$0xff] }
 0x410   : > { %v3074_v19 = vpop.f32.mrf.mxu0  ;;  %3676 = vmatmul.mubr.f32.vlgmr.msra.gmra.mxu0 %v3508_v56  ;;  %4601 = vmatprep.subr.mxu1 %v3880_v54 }
 0x411   : > { %v3075_v0 = vadd.f32 %v3074_v19, %v7040_v30  ;;  %v3511_v24 = vmax.f32 %v3326_v61, 0.0  ;;  %4519 = vmatpush3.msra.mxu0 %v3883_v29  ;;  %v3330_v5 = vadd.f32 %v6929_v11, %v3073_v43  ;;  %4617 = vmatpush3.msra.mxu1 %v3880_v54  ;;  %v3879_v11 = vld [vmem:[%s7422_s9 + $0x58] sm:$0xff] }
 0x412   : > { %v3078_v10 = vpop.f32.mrf.mxu0  ;;  %4520 = vmatprep.subr.mxu0 %v3882_v58  ;;  %4602 = vmatprep.subr.mxu1 %v3879_v11 }
 0x413   : > { %v3332_v23 = vadd.f32 %v6935_v35, %v3075_v0  ;;  %v3079_v2 = vadd.f32 %v3078_v10, %v7038_v9  ;;  %3680 = vmatprep.mubr.f32.mxu0 %v3511_v24  ;;  %4521 = vmatpush3.msra.mxu0 %v3882_v58  ;;  %v7079_v35 = vpop.f32.mrf.mxu1  ;;  %v3512_v16 = vmax.f32 %v3330_v5, 0.0 }
 0x414   : > { %v3080_v37 = vpop.f32.mrf.mxu0  ;;  %3681 = vmatmul.mubr.f32.gmra.mxu0 %v3510_v26  ;;  %4522 = vmatprep.subr.mxu0 %v3881_v59  ;;  %v3875_v26 = vld [vmem:[%s7422_s9 + $0x38] sm:$0xff] }
 0x415   : > { %v3081_v20 = vadd.f32 %v3080_v37, %v7040_v30  ;;  %v3513_v33 = vmax.f32 %v3332_v23, 0.0  ;;  %v3336_v46 = vadd.f32 %v6943_v18, %v3079_v2  ;;  %4523 = vmatpush3.msra.mxu0 %v3881_v59  ;;  %4618 = vmatpush3.msra.mxu1 %v3879_v11  ;;  %v7088_v18 = vpop.f32.mrf.mxu1 }
 0x416   : > { %v3084_v41 = vpop.f32.mrf.mxu0  ;;  %4524 = vmatprep.subr.mxu0 %v3880_v54  ;;  %4603 = vmatprep.subr.mxu1 %v3878_v1 }
 0x417   : > { %v3338_v22 = vadd.f32 %v6949_v28, %v3081_v20  ;;  %v3085_v48 = vadd.f32 %v3084_v41, %v7038_v9  ;;  %3685 = vmatprep.mubr.f32.mxu0 %v3513_v33  ;;  %4525 = vmatpush3.msra.mxu0 %v3880_v54  ;;  %v3514_v29 = vmax.f32 %v3336_v46, 0.0 }
 0x418   : > { %v3086_v15 = vpop.f32.mrf.mxu0  ;;  %3686 = vmatmul.mubr.f32.gmra.mxu0 %v3512_v16  ;;  %4526 = vmatprep.subr.mxu0 %v3879_v11 }
 0x419   : > { %v3087_v53 = vadd.f32 %v3086_v15, %v7040_v30  ;;  %v3515_v55 = vmax.f32 %v3338_v22, 0.0  ;;  %v3342_v28 = vadd.f32 %v6957_v12, %v3085_v48  ;;  %4619 = vmatpush3.msra.mxu1 %v3878_v1  ;;  %4527 = vmatpush3.msra.mxu0 %v3879_v11  ;;  %v3876_v12 = vld [vmem:[%s7422_s9 + $0x40] sm:$0xff]  ;;  %v3873_v11 = vld [vmem:[%s7422_s9 + $0x28] sm:$0xff] }
 0x41a   : > { %v3090_v38 = vpop.f32.mrf.mxu0  ;;  %4528 = vmatprep.subr.mxu0 %v3878_v1  ;;  %4604 = vmatprep.subr.mxu1 %v3877_v14 }
 0x41b   : > { %v3344_v62 = vadd.f32 %v6963_v57, %v3087_v53  ;;  %v3091_v56 = vadd.f32 %v3090_v38, %v7038_v9  ;;  %3690 = vmatprep.mubr.f32.mxu0 %v3515_v55  ;;  %4529 = vmatpush3.msra.mxu0 %v3878_v1  ;;  %v7100_v57 = vpop.f32.mrf.mxu1  ;;  %v3516_v43 = vmax.f32 %v3342_v28, 0.0 }
 0x41c   : > { %v3092_v4 = vpop.f32.mrf.mxu0  ;;  %3691 = vmatmul.mubr.f32.gmra.mxu0 %v3514_v29  ;;  %4530 = vmatprep.subr.mxu0 %v3877_v14 }
 0x41d   : > { %v3093_v58 = vadd.f32 %v3092_v4, %v7040_v30  ;;  %v3517_v61 = vmax.f32 %v3344_v62, 0.0  ;;  %v3348_v19 = vadd.f32 %v6971_v8, %v3091_v56  ;;  %4620 = vmatpush3.msra.mxu1 %v3877_v14  ;;  %4531 = vmatpush3.msra.mxu0 %v3877_v14  ;;  %v3874_v8 = vld [vmem:[%s7422_s9 + $0x30] sm:$0xff] }
 0x41e   : > { %v3096_v59 = vpop.f32.mrf.mxu0  ;;  %4532 = vmatprep.subr.mxu0 %v3876_v12  ;;  %4605 = vmatprep.subr.mxu1 %v3876_v12 }
 0x41f   : > { %v3350_v0 = vadd.f32 %v6977_v31, %v3093_v58  ;;  %v3097_v24 = vadd.f32 %v3096_v59, %v7038_v9  ;;  %3695 = vmatprep.mubr.f32.mxu0 %v3517_v61  ;;  %4533 = vmatpush3.msra.mxu0 %v3876_v12  ;;  %v7112_v31 = vpop.f32.mrf.mxu1  ;;  %v3518_v2 = vmax.f32 %v3348_v19, 0.0 }
 0x420   : > { %v3098_v5 = vpop.f32.mrf.mxu0  ;;  %3696 = vmatmul.mubr.f32.gmra.mxu0 %v3516_v43  ;;  %4534 = vmatprep.subr.mxu0 %v3875_v26 }
 0x421   : > { %v3099_v10 = vadd.f32 %v3098_v5, %v7040_v30  ;;  %v3519_v23 = vmax.f32 %v3350_v0, 0.0  ;;  %v3354_v54 = vadd.f32 %v6985_v63, %v3097_v24  ;;  %4621 = vmatpush3.msra.mxu1 %v3876_v12  ;;  %4535 = vmatpush3.msra.mxu0 %v3875_v26  ;;  %v3872_v63 = vld [vmem:[%s7422_s9 + $0x20] sm:$0xff] }
 0x422   : > { %v3102_v37 = vpop.f32.mrf.mxu0  ;;  %4536 = vmatprep.subr.mxu0 %v3874_v8  ;;  %4606 = vmatprep.subr.mxu1 %v3875_v26 }
 0x423   : > { %v3356_v20 = vadd.f32 %v6990_v60, %v3099_v10  ;;  %v3103_v33 = vadd.f32 %v3102_v37, %v7038_v9  ;;  %3700 = vmatprep.mubr.f32.mxu0 %v3519_v23  ;;  %4537 = vmatpush3.msra.mxu0 %v3874_v8  ;;  %v7124_v60 = vpop.f32.mrf.mxu1  ;;  %v3520_v22 = vmax.f32 %v3354_v54, 0.0 }
 0x424   : > { %v3104_v16 = vpop.f32.mrf.mxu0  ;;  %3701 = vmatmul.mubr.f32.gmra.mxu0 %v3518_v2  ;;  %4538 = vmatprep.subr.mxu0 %v3873_v11 }
 0x425   : > { %v3105_v46 = vadd.f32 %v3104_v16, %v7040_v30  ;;  %v3521_v41 = vmax.f32 %v3356_v20, 0.0  ;;  %v3360_v48 = vadd.f32 %v6999_v45, %v3103_v33  ;;  %4622 = vmatpush3.msra.mxu1 %v3875_v26  ;;  %4539 = vmatpush3.msra.mxu0 %v3873_v11  ;;  %v7130_v38 = vpop.f32.mrf.mxu1 }
 0x426   : > { %v3108_v15 = vpop.f32.mrf.mxu0  ;;  %4540 = vmatprep.subr.mxu0 %v3872_v63  ;;  %4607 = vmatprep.subr.mxu1 %v3874_v8 }
 0x427   : > { %v3362_v1 = vadd.f32 %v7001_v27, %v3105_v46  ;;  %v3109_v53 = vadd.f32 %v3108_v15, %v7038_v9  ;;  %3705 = vmatprep.mubr.f32.mxu0 %v3521_v41  ;;  %4541 = vmatpush3.msra.mxu0 %v3872_v63  ;;  %v3522_v45 = vmax.f32 %v3360_v48, 0.0  ;;  %v7136_v12 = vpop.f32.mrf.mxu1 }
 0x428   : > { %v3110_v55 = vpop.f32.mrf.mxu0  ;;  %3706 = vmatmul.mubr.f32.gmra.mxu0 %v3520_v22  ;;  %4623 = vmatpush3.msra.mxu1 %v3874_v8 }
 0x429   : > { %v3111_v29 = vadd.f32 %v3110_v55, %v7040_v30  ;;  %v3523_v28 = vmax.f32 %v3362_v1, 0.0  ;;  %v3366_v62 = vadd.f32 %v7003_v51, %v3109_v53  ;;  %4608 = vmatprep.subr.mxu1 %v3873_v11  ;;  %v7142_v5 = vpop.f32.mrf.mxu1 }
 0x42a   : > { %v3114_v56 = vpop.f32.mrf.mxu0  ;;  %4624 = vmatpush3.msra.mxu1 %v3873_v11 }
 0x42b   : > { %v3368_v27 = vadd.f32 %v7005_v49, %v3111_v29  ;;  %v3115_v14 = vadd.f32 %v3114_v56, %v7038_v9  ;;  %3710 = vmatprep.mubr.f32.mxu0 %v3523_v28  ;;  %4609 = vmatprep.subr.mxu1 %v3872_v63  ;;  %v3524_v43 = vmax.f32 %v3366_v62, 0.0  ;;  %v7148_v20 = vpop.f32.mrf.mxu1 }
 0x42c   : > { %v3116_v4 = vpop.f32.mrf.mxu0  ;;  %3711 = vmatmul.mubr.f32.gmra.mxu0 %v3522_v45  ;;  %4625 = vmatpush3.msra.mxu1 %v3872_v63 }
 0x42d   : > { %v3117_v58 = vadd.f32 %v3116_v4, %v7040_v30  ;;  %v3525_v61 = vmax.f32 %v3368_v27, 0.0  ;;  %v3372_v51 = vadd.f32 %v7007_v7, %v3115_v14  ;;  %v7154_v22 = vpop.f32.mrf.mxu1 }
 0x42e   : > { %v3120_v19 = vpop.f32.mrf.mxu0 }
 0x42f   : > { %v3374_v49 = vadd.f32 %v7009_v50, %v3117_v58  ;;  %v3121_v59 = vadd.f32 %v3120_v19, %v7038_v9  ;;  %3715 = vmatprep.mubr.f32.mxu0 %v3525_v61  ;;  %v3526_v10 = vmax.f32 %v3372_v51, 0.0  ;;  %v7160_v28 = vpop.f32.mrf.mxu1 }
 0x430   : > { %v3122_v0 = vpop.f32.mrf.mxu0  ;;  %3716 = vmatmul.mubr.f32.gmra.mxu0 %v3524_v43 }
 0x431   : > { %v3123_v24 = vadd.f32 %v3122_v0, %v7040_v30  ;;  %v3527_v26 = vmax.f32 %v3374_v49, 0.0  ;;  %v3378_v23 = vadd.f32 %v7011_v17, %v3121_v59  ;;  %v7166_v58 = vpop.f32.mrf.mxu1 }
 0x432   : > { %v3126_v8 = vpop.f32.mrf.mxu0 }
 0x433   : > { %v3380_v7 = vadd.f32 %v7013_v32, %v3123_v24  ;;  %v3127_v2 = vadd.f32 %v3126_v8, %v7038_v9  ;;  %3720 = vmatprep.mubr.f32.mxu0 %v3527_v26  ;;  %v3528_v33 = vmax.f32 %v3378_v23, 0.0  ;;  %v7172_v0 = vpop.f32.mrf.mxu1 }
 0x434   : > { %v3128_v50 = vpop.f32.mrf.mxu0  ;;  %3721 = vmatmul.mubr.f32.gmra.mxu0 %v3526_v10 }
 0x435   : > { %v3129_v54 = vadd.f32 %v3128_v50, %v7040_v30  ;;  %v3529_v37 = vmax.f32 %v3380_v7, 0.0  ;;  %v3384_v11 = vadd.f32 %v7015_v40, %v3127_v2  ;;  %v7178_v2 = vpop.f32.mrf.mxu1 }
 0x436   : > { %v3132_v16 = vpop.f32.mrf.mxu0 }
 0x437   : > { %v3386_v46 = vadd.f32 %v7017_v36, %v3129_v54  ;;  %v3133_v17 = vadd.f32 %v3132_v16, %v7038_v9  ;;  %3725 = vmatprep.mubr.f32.mxu0 %v3529_v37  ;;  %v3530_v48 = vmax.f32 %v3384_v11, 0.0 }
 0x438   : > { %v3134_v32 = vpop.f32.mrf.mxu0  ;;  %3726 = vmatmul.mubr.f32.gmra.mxu0 %v3528_v33 }
 0x439   : > { %v3135_v41 = vadd.f32 %v3134_v32, %v7040_v30  ;;  %v3531_v63 = vmax.f32 %v3386_v46, 0.0  ;;  %v3390_v15 = vadd.f32 %v7019_v42, %v3133_v17  ;;  %v7184_v46 = vpop.f32.mrf.mxu1 }
 0x43a   : > { %v3138_v1 = vpop.f32.mrf.mxu0 }
 0x43b   : > { %v3392_v53 = vadd.f32 %v7021_v39, %v3135_v41  ;;  %v3139_v40 = vadd.f32 %v3138_v1, %v7038_v9  ;;  %3730 = vmatprep.mubr.f32.mxu0 %v3531_v63  ;;  %v3532_v45 = vmax.f32 %v3390_v15, 0.0  ;;  %v7190_v1 = vpop.f32.mrf.mxu1 }
 0x43c   : > { %v3140_v36 = vpop.f32.mrf.mxu0  ;;  %3731 = vmatmul.mubr.f32.gmra.mxu0 %v3530_v48 }
 0x43d   : > { %v3533_v55 = vmax.f32 %v3392_v53, 0.0  ;;  %v3141_v29 = vadd.f32 %v3140_v36, %v7040_v30  ;;  %v3396_v62 = vadd.f32 %v7023_v52, %v3139_v40 }
 0x43e   : > { %v3144_v56 = vpop.f32.mrf.mxu0 }
 0x43f   : > { %v3398_v27 = vadd.f32 %v7025_v21, %v3141_v29  ;;  %v3145_v42 = vadd.f32 %v3144_v56, %v7038_v9  ;;  %3735 = vmatprep.mubr.f32.mxu0 %v3533_v55  ;;  %v3534_v61 = vmax.f32 %v3396_v62, 0.0  ;;  %v3870_v29 = vld [vmem:[%s7422_s9 + $0x10] sm:$0xff]  ;;  %v7202_v56 = vpop.f32.mrf.mxu1 }
 0x440   : > { %v3146_v39 = vpop.f32.mrf.mxu0  ;;  %3736 = vmatmul.mubr.f32.gmra.mxu0 %v3532_v45 }
 0x441   : > { %v3535_v14 = vmax.f32 %v3398_v27, 0.0  ;;  %v3147_v4 = vadd.f32 %v3146_v39, %v7040_v30  ;;  %v3402_v43 = vadd.f32 %v7027_v6, %v3145_v42  ;;  %v3869_v39 = vld [vmem:[%s7422_s9 + $0x8] sm:$0xff] }
 0x442   : > { %v3150_v51 = vpop.f32.mrf.mxu0 }
 0x443   : > { %v3404_v19 = vadd.f32 %v7029_v34, %v3147_v4  ;;  %v3151_v52 = vadd.f32 %v3150_v51, %v7038_v9  ;;  %3740 = vmatprep.mubr.f32.mxu0 %v3535_v14  ;;  %v3536_v24 = vmax.f32 %v3402_v43, 0.0 }
 0x444   : > { %v3152_v21 = vpop.f32.mrf.mxu0  ;;  %3741 = vmatmul.mubr.f32.gmra.mxu0 %v3534_v61  ;;  %v3868_v61 = vld [vmem:[%s7422_s9] sm:$0xff] }
 0x445   : > { %v3537_v49 = vmax.f32 %v3404_v19, 0.0  ;;  %v3153_v59 = vadd.f32 %v3152_v21, %v7040_v30  ;;  %v3408_v26 = vadd.f32 %v7036_v25, %v3151_v52  ;;  %v7214_v19 = vpop.f32.mrf.mxu1 }
 0x446   : > { %v3156_v10 = vpop.f32.mrf.mxu0 }
 0x447   : > { %v3410_v23 = vadd.f32 %v7042_v47, %v3153_v59  ;;  %v3157_v6 = vadd.f32 %v3156_v10, %v7038_v9  ;;  %3745 = vmatprep.mubr.f32.mxu0 %v3537_v49  ;;  %v3538_v50 = vmax.f32 %v3408_v26, 0.0 }
 0x448   : > { %v3158_v34 = vpop.f32.mrf.mxu0  ;;  %3746 = vmatmul.mubr.f32.gmra.mxu0 %v3536_v24 }
 0x449   : > { %v3539_v8 = vmax.f32 %v3410_v23, 0.0  ;;  %v3159_v7 = vadd.f32 %v3158_v34, %v7040_v30  ;;  %v3414_v54 = vadd.f32 %v7046_v3, %v3157_v6  ;;  %v3475_v23 = vpop.f32.mrf.mxu1 }
 0x44a   : > { %v3162_v37 = vpop.f32.mrf.mxu0 }
 0x44b   : > { %v3416_v33 = vadd.f32 %v7055_v13, %v3159_v7  ;;  %v3163_v25 = vadd.f32 %v3162_v37, %v7038_v9  ;;  %3750 = vmatprep.mubr.f32.mxu0 %v3539_v8  ;;  %v3540_v17 = vmax.f32 %v3414_v54, 0.0  ;;  %v3479_v37 = vpop.f32.mrf.mxu1 }
 0x44c   : > { %v3164_v47 = vpop.f32.mrf.mxu0  ;;  %3751 = vmatmul.mubr.f32.gmra.mxu0 %v3538_v50 }
 0x44d   : > { %v3541_v11 = vmax.f32 %v3416_v33, 0.0  ;;  %v3165_v16 = vadd.f32 %v3164_v47, %v7040_v30  ;;  %v3420_v32 = vadd.f32 %v7067_v44, %v3163_v25  ;;  %v3871_v44 = vld [vmem:[%s7422_s9 + $0x18] sm:$0xff] }
 0x44e   : > { %v3168_v41 = vpop.f32.mrf.mxu0  ;;  %4542 = vmatprep.subr.mxu0 %v3871_v44  ;;  %4610 = vmatprep.subr.mxu1 %v3871_v44 }
 0x44f   : > { %v3422_v63 = vadd.f32 %v7079_v35, %v3165_v16  ;;  %v3169_v3 = vadd.f32 %v3168_v41, %v7038_v9  ;;  %3755 = vmatprep.mubr.f32.mxu0 %v3541_v11  ;;  %v3542_v53 = vmax.f32 %v3420_v32, 0.0  ;;  %4543 = vmatpush3.msra.mxu0 %v3871_v44  ;;  %v3481_v32 = vpop.f32.mrf.mxu1 }
 0x450   : > { %v3170_v13 = vpop.f32.mrf.mxu0  ;;  %3756 = vmatmul.mubr.f32.gmra.mxu0 %v3540_v17  ;;  %4626 = vmatpush3.msra.mxu1 %v3871_v44 }
 0x451   : > { %v3543_v48 = vmax.f32 %v3422_v63, 0.0  ;;  %v3171_v15 = vadd.f32 %v3170_v13, %v7040_v30  ;;  %v3426_v40 = vadd.f32 %v7088_v18, %v3169_v3  ;;  %4544 = vmatprep.subr.mxu0 %v3870_v29  ;;  %4611 = vmatprep.subr.mxu1 %v3870_v29 }
 0x452   : > { %v3174_v36 = vpop.f32.mrf.mxu0  ;;  %4545 = vmatpush3.msra.mxu0 %v3870_v29  ;;  %4627 = vmatpush3.msra.mxu1 %v3870_v29 }
 0x453   : > { %v3428_v35 = vadd.f32 %v7100_v57, %v3171_v15  ;;  %v3175_v55 = vadd.f32 %v3174_v36, %v7038_v9  ;;  %3760 = vmatprep.mubr.f32.mxu0 %v3543_v48  ;;  %v3544_v27 = vmax.f32 %v3426_v40, 0.0  ;;  %4546 = vmatprep.subr.mxu0 %v3869_v39 }
 0x454   : > { %v3176_v45 = vpop.f32.mrf.mxu0  ;;  %3761 = vmatmul.mubr.f32.gmra.mxu0 %v3542_v53  ;;  %4612 = vmatprep.subr.mxu1 %v3869_v39  ;;  %v3485_v53 = vpop.f32.mrf.mxu1 }
 0x455   : > { %v3545_v62 = vmax.f32 %v3428_v35, 0.0  ;;  %v3177_v18 = vadd.f32 %v3176_v45, %v7040_v30  ;;  %v3432_v57 = vadd.f32 %v7112_v31, %v3175_v55  ;;  %4547 = vmatpush3.msra.mxu0 %v3869_v39  ;;  %4628 = vmatpush3.msra.mxu1 %v3869_v39 }
 0x456   : > { %v3180_v42 = vpop.f32.mrf.mxu0  ;;  %4548 = vmatprep.subr.mxu0 %v3868_v61  ;;  %4613 = vmatprep.subr.mxu1 %v3868_v61  ;;  %v3487_v45 = vpop.f32.mrf.mxu1 }
 0x457   : > { %v3434_v14 = vadd.f32 %v7124_v60, %v3177_v18  ;;  %v3181_v4 = vadd.f32 %v3180_v42, %v7038_v9  ;;  %3765 = vmatprep.mubr.f32.mxu0 %v3545_v62  ;;  %v3546_v52 = vmax.f32 %v3432_v57, 0.0  ;;  %4549 = vmatpush3.msra.mxu0 %v3868_v61 }
 0x458   : > { %v3182_v43 = vpop.f32.mrf.mxu0  ;;  %3766 = vmatmul.mubr.f32.gmra.mxu0 %v3544_v27  ;;  %4629 = vmatpush3.msra.mxu1 %v3868_v61 }
 0x459   : > { %v3547_v31 = vmax.f32 %v3434_v14, 0.0  ;;  %v3183_v51 = vadd.f32 %v3182_v43, %v7040_v30  ;;  %v3438_v60 = vadd.f32 %v7130_v38, %v3181_v4  ;;  %v3491_v14 = vpop.f32.mrf.mxu1 }
 0x45a   : > { %v3186_v21 = vpop.f32.mrf.mxu0 }
 0x45b   : > { %v3440_v49 = vadd.f32 %v7136_v12, %v3183_v51  ;;  %v3187_v59 = vadd.f32 %v3186_v21, %v7038_v9  ;;  %3770 = vmatprep.mubr.f32.mxu0 %v3547_v31  ;;  %v3548_v6 = vmax.f32 %v3438_v60, 0.0  ;;  %v3493_v60 = vpop.f32.mrf.mxu1 }
 0x45c   : > { %v3188_v24 = vpop.f32.mrf.mxu0  ;;  %3771 = vmatmul.mubr.f32.gmra.mxu0 %v3546_v52 }
 0x45d   : > { %v3549_v26 = vmax.f32 %v3440_v49, 0.0  ;;  %v3189_v10 = vadd.f32 %v3188_v24, %v7040_v30  ;;  %v3444_v38 = vadd.f32 %v7142_v5, %v3187_v59 }
 0x45e   : > { %v3192_v34 = vpop.f32.mrf.mxu0 }
 0x45f   : > { %v3446_v8 = vadd.f32 %v7148_v20, %v3189_v10  ;;  %v3193_v12 = vadd.f32 %v3192_v34, %v7038_v9  ;;  %3775 = vmatprep.mubr.f32.mxu0 %v3549_v26  ;;  %v3550_v33 = vmax.f32 %v3444_v38, 0.0 }
 0x460   : > { %v3194_v7 = vpop.f32.mrf.mxu0  ;;  %3776 = vmatmul.mubr.f32.gmra.mxu0 %v3548_v6  ;;  %v3497_v6 = vpop.f32.mrf.mxu1 }
 0x461   : > { %v3551_v50 = vmax.f32 %v3446_v8, 0.0  ;;  %v3195_v54 = vadd.f32 %v3194_v7, %v7040_v30  ;;  %v3450_v25 = vadd.f32 %v7154_v22, %v3193_v12 }
 0x462   : > { %v3198_v47 = vpop.f32.mrf.mxu0 }
 0x463   : > { %v3452_v11 = vadd.f32 %v7160_v28, %v3195_v54  ;;  %v3199_v5 = vadd.f32 %v3198_v47, %v7038_v9  ;;  %3780 = vmatprep.mubr.f32.mxu0 %v3551_v50  ;;  %v3552_v41 = vmax.f32 %v3450_v25, 0.0 }
 0x464   : > { %v3200_v16 = vpop.f32.mrf.mxu0  ;;  %3781 = vmatmul.mubr.f32.gmra.mxu0 %v3550_v33  ;;  %v3499_v33 = vpop.f32.mrf.mxu1 }
 0x465   : > { %v3553_v20 = vmax.f32 %v3452_v11, 0.0  ;;  %v3201_v17 = vadd.f32 %v3200_v16, %v7040_v30  ;;  %v3456_v63 = vadd.f32 %v7166_v58, %v3199_v5 }
 0x466   : > { %v3204_v3 = vpop.f32.mrf.mxu0 }
 0x467   : > { %v3458_v13 = vadd.f32 %v7172_v0, %v3201_v17  ;;  %v3205_v22 = vadd.f32 %v3204_v3, %v7038_v9  ;;  %3785 = vmatprep.mubr.f32.mxu0 %v3553_v20  ;;  %v3554_v40 = vmax.f32 %v3456_v63, 0.0 }
 0x468   : > { %v3206_v48 = vpop.f32.mrf.mxu0  ;;  %3786 = vmatmul.mubr.f32.gmra.mxu0 %v3552_v41  ;;  %v3503_v41 = vpop.f32.mrf.mxu1 }
 0x469   : > { %v3555_v28 = vmax.f32 %v3458_v13, 0.0  ;;  %v3207_v15 = vadd.f32 %v3206_v48, %v7040_v30  ;;  %v3462_v36 = vadd.f32 %v7178_v2, %v3205_v22 }
 0x46a   : > { %v3210_v44 = vpop.f32.mrf.mxu0 }
 0x46b   : > { %v3464_v35 = vadd.f32 %v7184_v46, %v3207_v15  ;;  %v3211_v58 = vadd.f32 %v3210_v44, %v7038_v9  ;;  %3790 = vmatprep.mubr.f32.mxu0 %v3555_v28  ;;  %v3556_v62 = vmax.f32 %v3462_v36, 0.0 }
 0x46c   : > { %v3212_v55 = vpop.f32.mrf.mxu0  ;;  %3791 = vmatmul.mubr.f32.gmra.mxu0 %v3554_v40  ;;  %v3505_v40 = vpop.f32.mrf.mxu1 }
 0x46d   : > { %v3557_v0 = vmax.f32 %v3464_v35, 0.0  ;;  %v3213_v29 = vadd.f32 %v3212_v55, %v7040_v30  ;;  %v3468_v18 = vadd.f32 %v7190_v1, %v3211_v58 }
 0x46e   : > { %v3216_v27 = vpop.f32.mrf.mxu0 }
 0x46f   : > { %v3470_v57 = vadd.f32 %v7202_v56, %v3213_v29  ;;  %v3217_v2 = vadd.f32 %v3216_v27, %v7038_v9  ;;  %3795 = vmatprep.mubr.f32.mxu0 %v3557_v0  ;;  %v3558_v4 = vmax.f32 %v3468_v18, 0.0 }
 0x470   : > { %v3218_v42 = vpop.f32.mrf.mxu0  ;;  %3796 = vmatmul.mubr.f32.gmra.mxu0 %v3556_v62 }
 0x471   : > { %v3559_v46 = vmax.f32 %v3470_v57, 0.0  ;;  %v3219_v39 = vadd.f32 %v3218_v42, %v7040_v30  ;;  %v3474_v61 = vadd.f32 %v7214_v19, %v3217_v2 }
 0x472   : > { %v3222_v43 = vpop.f32.mrf.mxu0 }
 0x473   : > { %v3476_v31 = vadd.f32 %v3475_v23, %v3219_v39  ;;  %v3223_v51 = vadd.f32 %v3222_v43, %v7038_v9  ;;  %3800 = vmatprep.mubr.f32.mxu0 %v3559_v46  ;;  %v3560_v21 = vmax.f32 %v3474_v61, 0.0 }
 0x474   : > { %v3224_v1 = vpop.f32.mrf.mxu0  ;;  %3801 = vmatmul.mubr.f32.gmra.mxu0 %v3558_v4 }
 0x475   : > { %v3561_v56 = vmax.f32 %v3476_v31, 0.0  ;;  %v3225_v52 = vadd.f32 %v3224_v1, %v7040_v30  ;;  %v3480_v49 = vadd.f32 %v3479_v37, %v3223_v51 }
 0x476   : > { %v3228_v59 = vpop.f32.mrf.mxu0 }
 0x477   : > { %v3482_v24 = vadd.f32 %v3481_v32, %v3225_v52  ;;  %v3229_v26 = vadd.f32 %v3228_v59, %v7038_v9  ;;  %3805 = vmatprep.mubr.f32.mxu0 %v3561_v56  ;;  %v3562_v38 = vmax.f32 %v3480_v49, 0.0 }
 0x478   : > { %v3230_v10 = vpop.f32.mrf.mxu0  ;;  %3806 = vmatmul.mubr.f32.gmra.mxu0 %v3560_v21 }
 0x479   : > { %v3563_v19 = vmax.f32 %v3482_v24, 0.0  ;;  %v3231_v23 = vadd.f32 %v3230_v10, %v7040_v30  ;;  %v3486_v34 = vadd.f32 %v3485_v53, %v3229_v26 }
 0x47a   : > { %v3234_v8 = vpop.f32.mrf.mxu0 }
 0x47b   : > { %v3488_v12 = vadd.f32 %v3487_v45, %v3231_v23  ;;  %v3235_v7 = vadd.f32 %v3234_v8, %v7038_v9  ;;  %3810 = vmatprep.mubr.f32.mxu0 %v3563_v19  ;;  %v3564_v25 = vmax.f32 %v3486_v34, 0.0 }
 0x47c   : > { %v3236_v50 = vpop.f32.mrf.mxu0  ;;  %3811 = vmatmul.mubr.f32.gmra.mxu0 %v3562_v38 }
 0x47d   : > { %v3565_v54 = vmax.f32 %v3488_v12, 0.0  ;;  %v3237_v37 = vadd.f32 %v3236_v50, %v7040_v30  ;;  %v3492_v47 = vadd.f32 %v3491_v14, %v3235_v7 }
 0x47e   : > { %v3240_v11 = vpop.f32.mrf.mxu0 }
 0x47f   : > { %v3494_v5 = vadd.f32 %v3493_v60, %v3237_v37  ;;  %v3241_v16 = vadd.f32 %v3240_v11, %v7038_v9  ;;  %3815 = vmatprep.mubr.f32.mxu0 %v3565_v54  ;;  %v3566_v63 = vmax.f32 %v3492_v47, 0.0 }
 0x480   : > { %v3242_v20 = vpop.f32.mrf.mxu0  ;;  %3816 = vmatmul.mubr.f32.gmra.mxu0 %v3564_v25 }
 0x481   : > { %v3567_v17 = vmax.f32 %v3494_v5, 0.0  ;;  %v3243_v32 = vadd.f32 %v3242_v20, %v7040_v30  ;;  %v3498_v3 = vadd.f32 %v3497_v6, %v3241_v16 }
 0x482   : > { %v3246_v13 = vpop.f32.mrf.mxu0 }
 0x483   : > { %v3500_v22 = vadd.f32 %v3499_v33, %v3243_v32  ;;  %v3247_v48 = vadd.f32 %v3246_v13, %v7038_v9  ;;  %3820 = vmatprep.mubr.f32.mxu0 %v3567_v17  ;;  %v3568_v36 = vmax.f32 %v3498_v3, 0.0  ;;  %v7254_v9 = vld [vmem:[%s7421_s8] ss:$0 sm:$0xff] }
 0x484   : > { %v3248_v28 = vpop.f32.mrf.mxu0  ;;  %3821 = vmatmul.mubr.f32.gmra.mxu0 %v3566_v63 }
 0x485   : > { %v3569_v15 = vmax.f32 %v3500_v22, 0.0  ;;  %v3249_v53 = vadd.f32 %v3248_v28, %v7040_v30  ;;  %v3504_v44 = vadd.f32 %v3503_v41, %v3247_v48 }
 0x487   : > { %v3506_v35 = vadd.f32 %v3505_v40, %v3249_v53  ;;  %3825 = vmatprep.mubr.f32.mxu0 %v3569_v15  ;;  %v3570_v55 = vmax.f32 %v3504_v44, 0.0 }
 0x488   : > { %3826 = vmatmul.mubr.f32.gmra.mxu0 %v3568_v36 }
 0x489   : > { %v3571_v58 = vmax.f32 %v3506_v35, 0.0 }
 0x48b   : > { %3830 = vmatprep.mubr.f32.mxu0 %v3571_v58 }
 0x48c   : > { %3831 = vmatmul.mubr.f32.gmra.mxu0 %v3570_v55 }
 0x4d0   : > { %v3677_v0 = vpop.f32.mrf.mxu0 }
 0x4d1   : > { %v3678_v29 = vadd.f32 %v7254_v9, %v3677_v0 }
 0x4d2   : > { %v3679_v45 = vpop.f32.mrf.mxu0 }
 0x4d3   : > { %v3836_v30 = vmax.f32 %v3678_v29, 0.0 }
 0x4d4   : > { %v3682_v62 = vpop.f32.mrf.mxu0 }
 0x4d5   : > { %v3683_v18 = vadd.f32 %v7254_v9, %v3682_v62  ;;  %4550 = vmatprep.mubr.f32.mxu0 %v3836_v30 }
 0x4d6   : > { %v3684_v27 = vpop.f32.mrf.mxu0 }
 0x4d7   : > { %v3837_v57 = vmax.f32 %v3683_v18, 0.0 }
 0x4d8   : > { %v3687_v2 = vpop.f32.mrf.mxu0 }
 0x4d9   : > { %v3688_v42 = vadd.f32 %v7254_v9, %v3687_v2  ;;  %4551 = vmatmul.mubr.f32.vlgmr.msra.gmra.mxu0 %v3837_v57 }
 0x4da   : > { %v3689_v46 = vpop.f32.mrf.mxu0 }
 0x4db   : > { %v3838_v39 = vmax.f32 %v3688_v42, 0.0 }
 0x4dc   : > { %v3692_v14 = vpop.f32.mrf.mxu0 }
 0x4dd   : > { %v3693_v4 = vadd.f32 %v7254_v9, %v3692_v14  ;;  %4553 = vmatprep.mubr.f32.mxu0 %v3838_v39 }
 0x4de   : > { %v3694_v61 = vpop.f32.mrf.mxu0 }
 0x4df   : > { %v3839_v43 = vmax.f32 %v3693_v4, 0.0 }
 0x4e0   : > { %v3697_v31 = vpop.f32.mrf.mxu0 }
 0x4e1   : > { %v3698_v51 = vadd.f32 %v7254_v9, %v3697_v31  ;;  %4554 = vmatmul.mubr.f32.gmra.mxu0 %v3839_v43 }
 0x4e2   : > { %v3699_v1 = vpop.f32.mrf.mxu0 }
 0x4e3   : > { %v3840_v56 = vmax.f32 %v3698_v51, 0.0 }
 0x4e4   : > { %v3702_v52 = vpop.f32.mrf.mxu0 }
 0x4e5   : > { %v3703_v60 = vadd.f32 %v7254_v9, %v3702_v52  ;;  %4556 = vmatprep.mubr.f32.mxu0 %v3840_v56 }
 0x4e6   : > { %v3704_v21 = vpop.f32.mrf.mxu0 }
 0x4e7   : > { %v3841_v49 = vmax.f32 %v3703_v60, 0.0 }
 0x4e8   : > { %v3707_v59 = vpop.f32.mrf.mxu0 }
 0x4e9   : > { %v3708_v24 = vadd.f32 %v7254_v9, %v3707_v59  ;;  %4557 = vmatmul.mubr.f32.gmra.mxu0 %v3841_v49 }
 0x4ea   : > { %v3709_v26 = vpop.f32.mrf.mxu0 }
 0x4eb   : > { %v3842_v10 = vmax.f32 %v3708_v24, 0.0 }
 0x4ec   : > { %v3712_v19 = vpop.f32.mrf.mxu0 }
 0x4ed   : > { %v3713_v23 = vadd.f32 %v7254_v9, %v3712_v19  ;;  %4559 = vmatprep.mubr.f32.mxu0 %v3842_v10 }
 0x4ee   : > { %v3714_v6 = vpop.f32.mrf.mxu0 }
 0x4ef   : > { %v3843_v38 = vmax.f32 %v3713_v23, 0.0 }
 0x4f0   : > { %v3717_v34 = vpop.f32.mrf.mxu0 }
 0x4f1   : > { %v3718_v8 = vadd.f32 %v7254_v9, %v3717_v34  ;;  %4560 = vmatmul.mubr.f32.gmra.mxu0 %v3843_v38 }
 0x4f2   : > { %v3719_v12 = vpop.f32.mrf.mxu0 }
 0x4f3   : > { %v3844_v7 = vmax.f32 %v3718_v8, 0.0 }
 0x4f4   : > { %v3722_v50 = vpop.f32.mrf.mxu0 }
 0x4f5   : > { %v3723_v54 = vadd.f32 %v7254_v9, %v3722_v50  ;;  %4562 = vmatprep.mubr.f32.mxu1 %v3844_v7 }
 0x4f6   : > { %v3724_v37 = vpop.f32.mrf.mxu0 }
 0x4f7   : > { %v3845_v33 = vmax.f32 %v3723_v54, 0.0 }
 0x4f8   : > { %v3727_v25 = vpop.f32.mrf.mxu0 }
 0x4f9   : > { %v3728_v47 = vadd.f32 %v7254_v9, %v3727_v25  ;;  %4563 = vmatmul.mubr.f32.vlgmr.msra.gmra.mxu1 %v3845_v33 }
 0x4fa   : > { %v3729_v11 = vpop.f32.mrf.mxu0 }
 0x4fb   : > { %v3846_v5 = vmax.f32 %v3728_v47, 0.0 }
 0x4fc   : > { %v3732_v16 = vpop.f32.mrf.mxu0 }
 0x4fd   : > { %v3733_v20 = vadd.f32 %v7254_v9, %v3732_v16  ;;  %4565 = vmatprep.mubr.f32.mxu1 %v3846_v5 }
 0x4fe   : > { %v3734_v17 = vpop.f32.mrf.mxu0 }
 0x4ff   : > { %v3847_v32 = vmax.f32 %v3733_v20, 0.0 }
 0x500   : > { %v3737_v41 = vpop.f32.mrf.mxu0 }
 0x501   : > { %v3738_v63 = vadd.f32 %v7254_v9, %v3737_v41  ;;  %4566 = vmatmul.mubr.f32.gmra.mxu1 %v3847_v32 }
 0x502   : > { %v3739_v3 = vpop.f32.mrf.mxu0 }
 0x503   : > { %v3848_v13 = vmax.f32 %v3738_v63, 0.0 }
 0x504   : > { %v3742_v22 = vpop.f32.mrf.mxu0 }
 0x505   : > { %v3743_v48 = vadd.f32 %v7254_v9, %v3742_v22  ;;  %4568 = vmatprep.mubr.f32.mxu1 %v3848_v13 }
 0x506   : > { %v3744_v28 = vpop.f32.mrf.mxu0 }
 0x507   : > { %v3849_v15 = vmax.f32 %v3743_v48, 0.0 }
 0x508   : > { %v3747_v53 = vpop.f32.mrf.mxu0 }
 0x509   : > { %v3748_v40 = vadd.f32 %v7254_v9, %v3747_v53  ;;  %4569 = vmatmul.mubr.f32.gmra.mxu1 %v3849_v15 }
 0x50a   : > { %v3749_v36 = vpop.f32.mrf.mxu0 }
 0x50b   : > { %v3850_v44 = vmax.f32 %v3748_v40, 0.0 }
 0x50c   : > { %v3752_v35 = vpop.f32.mrf.mxu0 }
 0x50d   : > { %v3753_v58 = vadd.f32 %v7254_v9, %v3752_v35  ;;  %4571 = vmatprep.mubr.f32.mxu1 %v3850_v44 }
 0x50e   : > { %v3754_v55 = vpop.f32.mrf.mxu0 }
 0x50f   : > { %v3851_v0 = vmax.f32 %v3753_v58, 0.0 }
 0x510   : > { %v3757_v29 = vpop.f32.mrf.mxu0 }
 0x511   : > { %v3758_v45 = vadd.f32 %v7254_v9, %v3757_v29  ;;  %4572 = vmatmul.mubr.f32.gmra.mxu1 %v3851_v0 }
 0x512   : > { %v3759_v30 = vpop.f32.mrf.mxu0 }
 0x513   : > { %v3852_v62 = vmax.f32 %v3758_v45, 0.0  ;;  %v7294_v45 = vld [vmem:[%s7423_s10] ss:$0 sm:$0xff] }
 0x514   : > { %v3762_v18 = vpop.f32.mrf.mxu0 }
 0x515   : > { %v3763_v27 = vadd.f32 %v7254_v9, %v3762_v18  ;;  %4574 = vmatprep.mubr.f32.mxu1 %v3852_v62 }
 0x516   : > { %v3764_v57 = vpop.f32.mrf.mxu0 }
 0x517   : > { %v3853_v2 = vmax.f32 %v3763_v27, 0.0 }
 0x518   : > { %v3767_v42 = vpop.f32.mrf.mxu0 }
 0x519   : > { %v3768_v46 = vadd.f32 %v7254_v9, %v3767_v42  ;;  %4575 = vmatmul.mubr.f32.gmra.mxu1 %v3853_v2 }
 0x51a   : > { %v3769_v39 = vpop.f32.mrf.mxu0 }
 0x51b   : > { %v3854_v14 = vmax.f32 %v3768_v46, 0.0 }
 0x51c   : > { %v3772_v4 = vpop.f32.mrf.mxu0 }
 0x51d   : > { %v3773_v61 = vadd.f32 %v7254_v9, %v3772_v4  ;;  %4577 = vmatprep.mubr.f32.mxu1 %v3854_v14 }
 0x51e   : > { %v3774_v43 = vpop.f32.mrf.mxu0 }
 0x51f   : > { %v3855_v31 = vmax.f32 %v3773_v61, 0.0 }
 0x520   : > { %v3777_v51 = vpop.f32.mrf.mxu0 }
 0x521   : > { %v3778_v1 = vadd.f32 %v7254_v9, %v3777_v51  ;;  %4578 = vmatmul.mubr.f32.gmra.mxu1 %v3855_v31 }
 0x522   : > { %v3779_v56 = vpop.f32.mrf.mxu0 }
 0x523   : > { %v3856_v52 = vmax.f32 %v3778_v1, 0.0 }
 0x524   : > { %v3782_v60 = vpop.f32.mrf.mxu0 }
 0x525   : > { %v3783_v21 = vadd.f32 %v7254_v9, %v3782_v60  ;;  %4580 = vmatprep.mubr.f32.mxu1 %v3856_v52 }
 0x526   : > { %v3784_v49 = vpop.f32.mrf.mxu0 }
 0x527   : > { %v3857_v59 = vmax.f32 %v3783_v21, 0.0 }
 0x528   : > { %v3787_v24 = vpop.f32.mrf.mxu0 }
 0x529   : > { %v3788_v26 = vadd.f32 %v7254_v9, %v3787_v24  ;;  %4581 = vmatmul.mubr.f32.gmra.mxu1 %v3857_v59 }
 0x52a   : > { %v3789_v10 = vpop.f32.mrf.mxu0 }
 0x52b   : > { %v3858_v19 = vmax.f32 %v3788_v26, 0.0 }
 0x52c   : > { %v3792_v23 = vpop.f32.mrf.mxu0 }
 0x52d   : > { %v3793_v6 = vadd.f32 %v7254_v9, %v3792_v23  ;;  %4583 = vmatprep.mubr.f32.mxu1 %v3858_v19 }
 0x52e   : > { %v3794_v38 = vpop.f32.mrf.mxu0 }
 0x52f   : > { %v3859_v34 = vmax.f32 %v3793_v6, 0.0 }
 0x530   : > { %v3797_v8 = vpop.f32.mrf.mxu0 }
 0x531   : > { %v3798_v12 = vadd.f32 %v7254_v9, %v3797_v8  ;;  %4584 = vmatmul.mubr.f32.gmra.mxu1 %v3859_v34 }
 0x532   : > { %v3799_v7 = vpop.f32.mrf.mxu0 }
 0x533   : > { %v3860_v50 = vmax.f32 %v3798_v12, 0.0 }
 0x534   : > { %v3802_v54 = vpop.f32.mrf.mxu0 }
 0x535   : > { %v3803_v37 = vadd.f32 %v7254_v9, %v3802_v54  ;;  %4586 = vmatprep.mubr.f32.mxu1 %v3860_v50 }
 0x536   : > { %v3804_v33 = vpop.f32.mrf.mxu0 }
 0x537   : > { %v3861_v25 = vmax.f32 %v3803_v37, 0.0 }
 0x538   : > { %v3807_v47 = vpop.f32.mrf.mxu0 }
 0x539   : > { %v3808_v11 = vadd.f32 %v7254_v9, %v3807_v47  ;;  %4587 = vmatmul.mubr.f32.gmra.mxu1 %v3861_v25 }
 0x53a   : > { %v3809_v5 = vpop.f32.mrf.mxu0 }
 0x53b   : > { %v3862_v16 = vmax.f32 %v3808_v11, 0.0 }
 0x53c   : > { %v3812_v20 = vpop.f32.mrf.mxu0 }
 0x53d   : > { %v3813_v17 = vadd.f32 %v7254_v9, %v3812_v20  ;;  %4589 = vmatprep.mubr.f32.mxu1 %v3862_v16 }
 0x53e   : > { %v3814_v32 = vpop.f32.mrf.mxu0 }
 0x53f   : > { %v3863_v41 = vmax.f32 %v3813_v17, 0.0 }
 0x540   : > { %v3817_v63 = vpop.f32.mrf.mxu0 }
 0x541   : > { %v3818_v3 = vadd.f32 %v7254_v9, %v3817_v63  ;;  %4590 = vmatmul.mubr.f32.gmra.mxu1 %v3863_v41 }
 0x542   : > { %v3819_v13 = vpop.f32.mrf.mxu0 }
 0x543   : > { %v3864_v22 = vmax.f32 %v3818_v3, 0.0 }
 0x544   : > { %v3822_v48 = vpop.f32.mrf.mxu0 }
 0x545   : > { %v3823_v28 = vadd.f32 %v7254_v9, %v3822_v48  ;;  %4592 = vmatprep.mubr.f32.mxu1 %v3864_v22 }
 0x546   : > { %v3824_v15 = vpop.f32.mrf.mxu0 }
 0x547   : > { %v3865_v53 = vmax.f32 %v3823_v28, 0.0 }
 0x548   : > { %v3827_v40 = vpop.f32.mrf.mxu0 }
 0x549   : > { %v3828_v36 = vadd.f32 %v7254_v9, %v3827_v40  ;;  %4593 = vmatmul.mubr.f32.gmra.mxu1 %v3865_v53 }
 0x54a   : > { %v3829_v44 = vpop.f32.mrf.mxu0 }
 0x54b   : > { %v3866_v35 = vmax.f32 %v3828_v36, 0.0 }
 0x54c   : > { %v3832_v58 = vpop.f32.mrf.mxu0 }
 0x54d   : > { %v3833_v55 = vadd.f32 %v7254_v9, %v3832_v58  ;;  %4595 = vmatprep.mubr.f32.mxu1 %v3866_v35 }
 0x54e   : > { %v3834_v0 = vpop.f32.mrf.mxu0 }
 0x54f   : > { %v3867_v29 = vmax.f32 %v3833_v55, 0.0 }
 0x551   : > { %4596 = vmatmul.mubr.f32.gmra.mxu1 %v3867_v29 }
 0x599   : > { %v4552_v30 = vpop.f32.mrf.mxu0 }
 0x59a   : > { %v3963_v62 = vadd.f32 %v4552_v30, %v7294_v45 }
 0x59b   : > { %v3957_v18 = vpop.f32.mrf.mxu0 }
 0x59c   : > { %4117 = vst [vmem:[%s7297_s22 + $0x8] sm:$0xff] %v3963_v62  ;;  %v3958_v9 = vadd.f32 %v7294_v45, %v3957_v18 }
 0x59e   : > { %4116 = vst [vmem:[%s7297_s22] sm:$0xff] %v3958_v9 }
 0x5a1   : > { %v4555_v27 = vpop.f32.mrf.mxu0 }
 0x5a2   : > { %v3973_v57 = vadd.f32 %v4555_v27, %v7294_v45 }
 0x5a3   : > { %v3967_v2 = vpop.f32.mrf.mxu0 }
 0x5a4   : > { %4119 = vst [vmem:[%s7297_s22 + $0x18] sm:$0xff] %v3973_v57  ;;  %v3968_v42 = vadd.f32 %v7294_v45, %v3967_v2 }
 0x5a6   : > { %4118 = vst [vmem:[%s7297_s22 + $0x10] sm:$0xff] %v3968_v42 }
 0x5a9   : > { %v4558_v46 = vpop.f32.mrf.mxu0 }
 0x5aa   : > { %v3983_v39 = vadd.f32 %v4558_v46, %v7294_v45 }
 0x5ab   : > { %v3977_v14 = vpop.f32.mrf.mxu0 }
 0x5ac   : > { %4121 = vst [vmem:[%s7297_s22 + $0x28] sm:$0xff] %v3983_v39  ;;  %v3978_v4 = vadd.f32 %v7294_v45, %v3977_v14 }
 0x5ae   : > { %4120 = vst [vmem:[%s7297_s22 + $0x20] sm:$0xff] %v3978_v4 }
 0x5b1   : > { %v4561_v61 = vpop.f32.mrf.mxu0 }
 0x5b2   : > { %v3993_v43 = vadd.f32 %v4561_v61, %v7294_v45 }
 0x5b3   : > { %v3987_v31 = vpop.f32.mrf.mxu0 }
 0x5b4   : > { %4123 = vst [vmem:[%s7297_s22 + $0x38] sm:$0xff] %v3993_v43  ;;  %v3988_v51 = vadd.f32 %v7294_v45, %v3987_v31 }
 0x5b6   : > { %4122 = vst [vmem:[%s7297_s22 + $0x30] sm:$0xff] %v3988_v51 }
 0x5b9   : > { %v4564_v1 = vpop.f32.mrf.mxu1 }
 0x5ba   : > { %v4003_v56 = vadd.f32 %v4564_v1, %v7294_v45 }
 0x5bb   : > { %v3997_v52 = vpop.f32.mrf.mxu1 }
 0x5bc   : > { %4125 = vst [vmem:[%s7297_s22 + $0x48] sm:$0xff] %v4003_v56  ;;  %v3998_v60 = vadd.f32 %v7294_v45, %v3997_v52 }
 0x5be   : > { %4124 = vst [vmem:[%s7297_s22 + $0x40] sm:$0xff] %v3998_v60 }
 0x5c1   : > { %v4567_v21 = vpop.f32.mrf.mxu1 }
 0x5c2   : > { %v4013_v49 = vadd.f32 %v4567_v21, %v7294_v45 }
 0x5c3   : > { %v4007_v59 = vpop.f32.mrf.mxu1 }
 0x5c4   : > { %4127 = vst [vmem:[%s7297_s22 + $0x58] sm:$0xff] %v4013_v49  ;;  %v4008_v24 = vadd.f32 %v7294_v45, %v4007_v59 }
 0x5c6   : > { %4126 = vst [vmem:[%s7297_s22 + $0x50] sm:$0xff] %v4008_v24 }
 0x5c9   : > { %v4570_v26 = vpop.f32.mrf.mxu1 }
 0x5ca   : > { %v4023_v10 = vadd.f32 %v4570_v26, %v7294_v45 }
 0x5cb   : > { %v4017_v19 = vpop.f32.mrf.mxu1 }
 0x5cc   : > { %4129 = vst [vmem:[%s7297_s22 + $0x68] sm:$0xff] %v4023_v10  ;;  %v4018_v23 = vadd.f32 %v7294_v45, %v4017_v19 }
 0x5ce   : > { %4128 = vst [vmem:[%s7297_s22 + $0x60] sm:$0xff] %v4018_v23 }
 0x5d1   : > { %v4573_v6 = vpop.f32.mrf.mxu1 }
 0x5d2   : > { %v4033_v38 = vadd.f32 %v4573_v6, %v7294_v45 }
 0x5d3   : > { %v4027_v34 = vpop.f32.mrf.mxu1 }
 0x5d4   : > { %4131 = vst [vmem:[%s7297_s22 + $0x78] sm:$0xff] %v4033_v38  ;;  %v4028_v8 = vadd.f32 %v7294_v45, %v4027_v34 }
 0x5d6   : > { %4130 = vst [vmem:[%s7297_s22 + $0x70] sm:$0xff] %v4028_v8 }
 0x5d9   : > { %v4576_v12 = vpop.f32.mrf.mxu1 }
 0x5da   : > { %v4043_v7 = vadd.f32 %v4576_v12, %v7294_v45 }
 0x5db   : > { %v4037_v50 = vpop.f32.mrf.mxu1 }
 0x5dc   : > { %4133 = vst [vmem:[%s7297_s22 + $0x88] sm:$0xff] %v4043_v7  ;;  %v4038_v54 = vadd.f32 %v7294_v45, %v4037_v50 }
 0x5de   : > { %4132 = vst [vmem:[%s7297_s22 + $0x80] sm:$0xff] %v4038_v54 }
 0x5e1   : > { %v4579_v37 = vpop.f32.mrf.mxu1 }
 0x5e2   : > { %v4053_v33 = vadd.f32 %v4579_v37, %v7294_v45 }
 0x5e3   : > { %v4047_v25 = vpop.f32.mrf.mxu1 }
 0x5e4   : > { %4135 = vst [vmem:[%s7297_s22 + $0x98] sm:$0xff] %v4053_v33  ;;  %v4048_v47 = vadd.f32 %v7294_v45, %v4047_v25 }
 0x5e6   : > { %4134 = vst [vmem:[%s7297_s22 + $0x90] sm:$0xff] %v4048_v47 }
 0x5e9   : > { %v4582_v11 = vpop.f32.mrf.mxu1 }
 0x5ea   : > { %v4063_v5 = vadd.f32 %v4582_v11, %v7294_v45 }
 0x5eb   : > { %v4057_v16 = vpop.f32.mrf.mxu1 }
 0x5ec   : > { %4137 = vst [vmem:[%s7297_s22 + $0xa8] sm:$0xff] %v4063_v5  ;;  %v4058_v20 = vadd.f32 %v7294_v45, %v4057_v16 }
 0x5ee   : > { %4136 = vst [vmem:[%s7297_s22 + $0xa0] sm:$0xff] %v4058_v20 }
 0x5f1   : > { %v4585_v17 = vpop.f32.mrf.mxu1 }
 0x5f2   : > { %v4073_v32 = vadd.f32 %v4585_v17, %v7294_v45 }
 0x5f3   : > { %v4067_v41 = vpop.f32.mrf.mxu1 }
 0x5f4   : > { %4139 = vst [vmem:[%s7297_s22 + $0xb8] sm:$0xff] %v4073_v32  ;;  %v4068_v63 = vadd.f32 %v7294_v45, %v4067_v41 }
 0x5f6   : > { %4138 = vst [vmem:[%s7297_s22 + $0xb0] sm:$0xff] %v4068_v63 }
 0x5f9   : > { %v4588_v3 = vpop.f32.mrf.mxu1 }
 0x5fa   : > { %v4083_v13 = vadd.f32 %v4588_v3, %v7294_v45 }
 0x5fb   : > { %v4077_v22 = vpop.f32.mrf.mxu1 }
 0x5fc   : > { %4141 = vst [vmem:[%s7297_s22 + $0xc8] sm:$0xff] %v4083_v13  ;;  %v4078_v48 = vadd.f32 %v7294_v45, %v4077_v22 }
 0x5fe   : > { %4140 = vst [vmem:[%s7297_s22 + $0xc0] sm:$0xff] %v4078_v48 }
 0x601   : > { %v4591_v28 = vpop.f32.mrf.mxu1 }
 0x602   : > { %v4093_v15 = vadd.f32 %v4591_v28, %v7294_v45 }
 0x603   : > { %v4087_v53 = vpop.f32.mrf.mxu1 }
 0x604   : > { %4143 = vst [vmem:[%s7297_s22 + $0xd8] sm:$0xff] %v4093_v15  ;;  %v4088_v40 = vadd.f32 %v7294_v45, %v4087_v53 }
 0x606   : > { %4142 = vst [vmem:[%s7297_s22 + $0xd0] sm:$0xff] %v4088_v40 }
 0x609   : > { %v4594_v36 = vpop.f32.mrf.mxu1 }
 0x60a   : > { %v4103_v44 = vadd.f32 %v4594_v36, %v7294_v45 }
 0x60b   : > { %v4097_v35 = vpop.f32.mrf.mxu1 }
 0x60c   : > { %4145 = vst [vmem:[%s7297_s22 + $0xe8] sm:$0xff] %v4103_v44  ;;  %v4098_v58 = vadd.f32 %v7294_v45, %v4097_v35 }
 0x60e   : > { %4144 = vst [vmem:[%s7297_s22 + $0xe0] sm:$0xff] %v4098_v58 }
 0x611   : > { %v4597_v55 = vpop.f32.mrf.mxu1 }
 0x612   : > { %v4113_v0 = vadd.f32 %v4597_v55, %v7294_v45 }
 0x613   : > { %v4107_v29 = vpop.f32.mrf.mxu1 }
 0x614   : > { %4147 = vst [vmem:[%s7297_s22 + $0xf8] sm:$0xff] %v4113_v0  ;;  %v4108_v30 = vadd.f32 %v7294_v45, %v4107_v29 }
 0x616   : > { %4146 = vst [vmem:[%s7297_s22 + $0xf0] sm:$0xff] %v4108_v30 }
 0x617   : > { %4801 = shalt.err (!%p4798_p0)
}
 0x618   : > { %s4802_s19 = scalar_lea.hbm %s7364_s13, 4096  ;;  %s4806_s22 = scalar_lea.hbm %s7424_s11, 8192 }
 0x619   : > { %p4803_p3 = scmp.ne.s32.totalorder %s7364_s13, %s4802_s19  ;;  %p4807_p4 = scmp.lt.s32.totalorder %s7364_s13, %s7424_s11 }
 0x61a   : > { %p4808_p13 = scmp.lt.s32.totalorder %s4806_s22, %s4802_s19 }
 0x61b   : > { %p4804_p1 = pnand %p4803_p3, %p4970_p5 }
 0x61c   : > { %p4809_p9 = por %p4808_p13, %p4807_p4 }
 0x61d   : > { %p4805_p2 = pneg %p4804_p1 }
 0x61f   : > { %p4810_p10 = pnand %p4809_p9, %p4805_p2 }
 0x621   : > { %4813 = shalt.err (!%p4810_p10)
}
 0x622   : > { %s4870_s12 = smov 128   ;;  %s4871_s16 = smov 8  }
 0x623   : > { %4642 = dma.vmem_to_hbm [thread:$0]  (%p4970_p5), %s7366_s25, 4096, %s7364_s13, %s7373_s21, %s4870_s12, %s4870_s12, %s4871_s16  }
 0x624 PF: > { %p4664_p12 = scmp.ge.s32.totalorder %s4856_s20, 2  ;;  %s4177_s14 = sand.u32 1, %s4844_s17  }
 0x625   : > { %s4178_s2 = scalar_lea.sflag [#allocation4], %s4177_s14 }
 0x626   : > { %p4655_p7 = pnand %p4664_p12, %p4974_p6 }
 0x628   : > { %p4656_p8 = pneg %p4655_p7 }
 0x62a   : > { %4839 = dma.done.wait (%p4656_p8), %s4178_s2, 4096  }
 0x62b   : > { %4841 = vsyncadd (%p4656_p8), %s4178_s2, 4294963200  ;;  %s7906_s26 = sld [smem:[#allocation12_spill]]  ;;  %p23_p11 = scmp.ge.s32.totalorder %s4957_s23, 4  }
 0x62c   : > { %s7907_s19 = sld [smem:[#allocation13_spill]]  ;;  %s7908_s17 = smov %s4848_s18 }
 0x62d   : > { %s7910_s20 = smov %s4957_s23  ;;  %25 = sbr.rel (!%p23_p11) target bundleno = 7 (0x7), region = 112 }
 0x631   : > { %s7909_s18 = smov %s7906_s26 }
 0x632   :  { %4183 = vsyncpa [#allocation3], 1 }
 0x633   :  { %4185 = vsyncpa [#allocation3 + $0x1], 1 }
 0x634   :  { %4186 = vsyncpa [#allocation6], 1 }
 0x635   :  { %4187 = vsyncpa [#allocation4], 1 }
 0x636   :  { %4189 = vsyncpa [#allocation4 + $0x1], 1 }

</bundles_post_ra>
